<compile_context>
chip_gen: v5e
topology: v5e:2x2
jax: 0.10.0
libtpu: 0.0.40
codegen_flags: <defaults>
</compile_context>

<pallas_src>
import functools

import jax
import jax.numpy as jnp
from jax import lax
from jax.experimental import pallas as pl
from jax.experimental.pallas import tpu as pltpu


# ------------------------------ Pallas kernel -------------------------------- #
def _fused_downproj_kernel(ho, wo, nf,
                           alpha_ref,                       # SMEM (3,) PReLU slopes
                           xph_ref,                         # (ho+2, wo+2, 4*nf) bf16
                           w1_ref, b1_ref,                  # (36nf, nf) bf16, (1, nf) f32
                           w2_ref, b2_ref,                  # (9nf, 4nf) bf16, (1, 4nf) f32
                           w3_ref, b3_ref,                  # (36nf, nf) bf16, (1, nf) f32
                           out_ref,                         # (ho*wo, nf) f32
                           pbig_ref,                        # scratch (ho, wo, 36nf) bf16
                           l0pad_ref,                       # scratch (ho+2, wo+2, nf) f32
                           p2_ref,                          # scratch (ho, wo, 9nf) bf16
                           dpad_ref):                       # scratch (ho+2, wo+2, 4nf) f32
    m = ho * wo
    c4 = 4 * nf

    # ---- stage 1: conv_1 (stride-2 conv == 3x3 conv on space-to-depth input) ----
    for dh in range(3):
        for dw in range(3):
            j = 3 * dh + dw
            pbig_ref[:, :, j * c4:(j + 1) * c4] = xph_ref[dh:dh + ho, dw:dw + wo, :]
    acc1 = jnp.dot(pbig_ref[...].reshape(m, 9 * c4), w1_ref[...],
                   preferred_element_type=jnp.float32)
    acc1 = acc1 + b1_ref[...]
    a1 = alpha_ref[0]
    l0 = jnp.where(acc1 >= 0.0, acc1, a1 * acc1)            # L_0_t  (m, nf) f32

    # ---- stage 2: deconv_1 (4 sub-pixel phases, each a 3x3 conv of L_0_t) -------
    l0pad_ref[...] = jnp.zeros_like(l0pad_ref)
    l0pad_ref[1:ho + 1, 1:wo + 1, :] = l0.reshape(ho, wo, nf)
    for th in range(3):
        for tw in range(3):
            j = 3 * th + tw
            p2_ref[:, :, j * nf:(j + 1) * nf] = (
                l0pad_ref[th:th + ho, tw:tw + wo, :].astype(jnp.bfloat16))
    acc2 = jnp.dot(p2_ref[...].reshape(m, 9 * nf), w2_ref[...],
                   preferred_element_type=jnp.float32)
    acc2 = acc2 + b2_ref[...]
    a2 = alpha_ref[1]
    h0 = jnp.where(acc2 >= 0.0, acc2, a2 * acc2)            # H_0_t phases (m, 4nf)

    # residual: D = H_0_t - x, phase-for-phase (x = interior of the padded input)
    xint = xph_ref[1:ho + 1, 1:wo + 1, :]
    d = h0 - xint.reshape(m, c4).astype(jnp.float32)

    # ---- stage 3: conv_2 on the D phases (another space-to-depth 3x3 conv) ------
    dpad_ref[...] = jnp.zeros_like(dpad_ref)
    dpad_ref[1:ho + 1, 1:wo + 1, :] = d.reshape(ho, wo, c4)
    for dh in range(3):
        for dw in range(3):
            j = 3 * dh + dw
            pbig_ref[:, :, j * c4:(j + 1) * c4] = (
                dpad_ref[dh:dh + ho, dw:dw + wo, :].astype(jnp.bfloat16))
    acc3 = jnp.dot(pbig_ref[...].reshape(m, 9 * c4), w3_ref[...],
                   preferred_element_type=jnp.float32)
    acc3 = acc3 + b3_ref[...]
    a3 = alpha_ref[2]
    l1 = jnp.where(acc3 >= 0.0, acc3, a3 * acc3)            # L_1_t

    out_ref[...] = l0 + l1                                  # L_0_t + L_1_t


# --------------------------- wrapper-side prep (JAX) ------------------------- #
def _space_to_depth_pad(x_nchw):
    """x (N,C,H,W) -> bf16 phase map (N, H/2+2, W/2+2, 4*C), zero-padded by 1.

    Channel layout: block g = 2*a + b holds phase (a, b), i.e.
    out[n, i+1, j+1, g*C + c] = x[n, c, 2*i + a, 2*j + b]."""
    n, c, h, w = x_nchw.shape
    ho, wo = h // 2, w // 2
    xb = x_nchw.astype(jnp.bfloat16)                        # layout work in bf16
    xr = xb.reshape(n, c, ho, 2, wo, 2)                     # (n, c, i, a, j, b)
    xr = jnp.transpose(xr, (0, 2, 4, 3, 5, 1))              # (n, i, j, a, b, c)
    xph = xr.reshape(n, ho, wo, 4 * c)
    return jnp.pad(xph, ((0, 0), (1, 1), (1, 1), (0, 0)))


def _s2d_conv_matrix(w):
    """Conv2d weight (Cout, Cin, 6, 6) -> (9*4*Cin, Cout) space-to-depth matrix.

    Row index = (3*dh+dw)*4*Cin + (2*a+b)*Cin + ci  with kh = 2*dh+a, kw = 2*dw+b."""
    cout, cin, _, _ = w.shape
    wr = w.reshape(cout, cin, 3, 2, 3, 2)                   # (co, ci, dh, a, dw, b)
    wr = jnp.transpose(wr, (2, 4, 3, 5, 1, 0))              # (dh, dw, a, b, ci, co)
    return wr.reshape(9 * 4 * cin, cout)


def _phase_deconv_matrix(w):
    """ConvTranspose2d weight (Cin, Cout, 6, 6) -> (9*Cin, 4*Cout) phase matrix.

    M[(3*th+tw)*Cin + ci, (2*rh+rw)*Cout + co] = w[ci, co, 4+rh-2*th, 4+rw-2*tw]."""
    cin, cout, _, _ = w.shape
    t = jnp.arange(3)
    r = jnp.arange(2)
    q = 4 + r[None, :] - 2 * t[:, None]                     # (3, 2): q[t, r]
    wg = w[:, :, q][:, :, :, :, q]                          # (ci, co, th, rh, tw, rw)
    wg = jnp.transpose(wg, (2, 4, 0, 3, 5, 1))              # (th, tw, ci, rh, rw, co)
    return wg.reshape(9 * cin, 4 * cout)


@functools.partial(jax.jit, static_argnums=(2, 3, 4))
def downproj_block(x_nchw, params, k, s, p):
    (w1, b1, a1, w2, b2, a2, w3, b3, a3) = params
    n, c, h, w = x_nchw.shape
    cout = w1.shape[0]
    assert (k, s, p) == (6, 2, 2), "only the upscale_factor=2 projection config"
    assert c == cout, "DownprojBlock uses in_channels == out_channels"
    assert h % 2 == 0 and w % 2 == 0
    nf = c
    ho, wo = h // 2, w // 2
    m = ho * wo

    # Input / weight preparation (tiny XLA glue, all fused under this jit).
    xph = _space_to_depth_pad(x_nchw)                              # bf16
    w1m = _s2d_conv_matrix(w1).astype(jnp.bfloat16)                # (36nf, nf)
    w2m = _phase_deconv_matrix(w2).astype(jnp.bfloat16)            # (9nf, 4nf)
    w3m = _s2d_conv_matrix(w3).astype(jnp.bfloat16)                # (36nf, nf)
    b1r = b1.astype(jnp.float32).reshape(1, nf)
    b2r = jnp.tile(b2.astype(jnp.float32), 4).reshape(1, 4 * nf)   # per-phase bias
    b3r = b3.astype(jnp.float32).reshape(1, nf)
    alphas = jnp.stack([jnp.asarray(a1, jnp.float32),
                        jnp.asarray(a2, jnp.float32),
                        jnp.asarray(a3, jnp.float32)])

    # VMEM budget from actual block / scratch sizes (generous margin, <= 48 MiB
    # so it also fits v7x's 64 MiB physical VMEM).
    bf, f4 = 2, 4
    blk_bytes = ((ho + 2) * (wo + 2) * 4 * nf * bf
                 + 36 * nf * nf * bf + 9 * nf * 4 * nf * bf + 36 * nf * nf * bf
                 + 6 * nf * f4
                 + m * nf * f4)
    scratch_bytes = (ho * wo * 36 * nf * bf
                     + (ho + 2) * (wo + 2) * nf * f4
                     + ho * wo * 9 * nf * bf
                     + (ho + 2) * (wo + 2) * 4 * nf * f4)
    vmem_bytes = int(min(max(2 * blk_bytes + scratch_bytes + (4 << 20), 16 << 20),
                         48 << 20))

    kernel = functools.partial(_fused_downproj_kernel, ho, wo, nf)
    out_flat = pl.pallas_call(
        kernel,
        out_shape=jax.ShapeDtypeStruct((n, m, nf), jnp.float32),
        grid=(n,),
        in_specs=[
            pl.BlockSpec(memory_space=pltpu.MemorySpace.SMEM),               # alphas
            pl.BlockSpec((None, ho + 2, wo + 2, 4 * nf),
                         lambda i: (i, 0, 0, 0)),                            # x phases
            pl.BlockSpec((36 * nf, nf), lambda i: (0, 0)),                   # w1 (resident)
            pl.BlockSpec((1, nf), lambda i: (0, 0)),                         # b1
            pl.BlockSpec((9 * nf, 4 * nf), lambda i: (0, 0)),                # w2 (resident)
            pl.BlockSpec((1, 4 * nf), lambda i: (0, 0)),                     # b2
            pl.BlockSpec((36 * nf, nf), lambda i: (0, 0)),                   # w3 (resident)
            pl.BlockSpec((1, nf), lambda i: (0, 0)),                         # b3
        ],
        out_specs=pl.BlockSpec((None, m, nf), lambda i: (i, 0, 0)),
        scratch_shapes=[
            pltpu.VMEM((ho, wo, 36 * nf), jnp.bfloat16),      # patch buf (stages 1 & 3)
            pltpu.VMEM((ho + 2, wo + 2, nf), jnp.float32),    # zero-padded L_0_t
            pltpu.VMEM((ho, wo, 9 * nf), jnp.bfloat16),       # stage-2 patches
            pltpu.VMEM((ho + 2, wo + 2, 4 * nf), jnp.float32),  # zero-padded (H_0_t - x)
        ],
        compiler_params=pltpu.CompilerParams(
            dimension_semantics=("parallel",),
            vmem_limit_bytes=vmem_bytes),
    )(alphas, xph, w1m, b1r, w2m, b2r, w3m, b3r)

    out = out_flat.reshape(n, ho, wo, nf)
    return jnp.transpose(out, (0, 3, 1, 2))                  # back to NCHW


# --------------------------- pure-JAX references ----------------------------- #
def _ref_downproj(x, params, k, s, p, matmul_dtype=jnp.float32):
    """Reference. matmul_dtype=bf16 emulates the kernel's bf16 MXU-input (and
    bf16 input-read) rounding with f32 accumulation / bias / PReLU / residual."""
    (w1, b1, a1, w2, b2, a2, w3, b3, a3) = params
    if matmul_dtype == jnp.bfloat16:
        x = x.astype(jnp.bfloat16).astype(jnp.float32)       # kernel reads x as bf16
    dn = ('NCHW', 'OIHW', 'NCHW')
    prelu = lambda v, a: jnp.where(v >= 0, v, a * v)
    cast = lambda t: t.astype(matmul_dtype)
    conv = lambda v, wt: lax.conv_general_dilated(
        cast(v), cast(wt), (s, s), [(p, p), (p, p)], dimension_numbers=dn,
        preferred_element_type=jnp.float32)
    l0 = prelu(conv(x, w1) + b1.reshape(1, -1, 1, 1), a1)
    w2f = jnp.transpose(w2, (1, 0, 2, 3))[:, :, ::-1, ::-1]
    h0 = lax.conv_general_dilated(
        cast(l0), cast(w2f), (1, 1), [(k - 1 - p,) * 2] * 2, lhs_dilation=(s, s),
        dimension_numbers=dn, preferred_element_type=jnp.float32)
    h0 = prelu(h0 + b2.reshape(1, -1, 1, 1), a2)
    l1 = prelu(conv(h0 - x, w3) + b3.reshape(1, -1, 1, 1), a3)
    return l0 + l1


# ---------------------------------- main -------------------------------------- #
def _make_params(key, c, k):
    ks = jax.random.split(key, 6)
    w1 = 0.05 * jax.random.normal(ks[0], (c, c, k, k), jnp.float32)  # Conv2d OIHW
    b1 = 0.05 * jax.random.normal(ks[1], (c,), jnp.float32)
    w2 = 0.05 * jax.random.normal(ks[2], (c, c, k, k), jnp.float32)  # ConvT IOHW
    b2 = 0.05 * jax.random.normal(ks[3], (c,), jnp.float32)
    w3 = 0.05 * jax.random.normal(ks[4], (c, c, k, k), jnp.float32)  # Conv2d OIHW
    b3 = 0.05 * jax.random.normal(ks[5], (c,), jnp.float32)
    a1 = a2 = a3 = jnp.float32(0.2)            # PReLU init (num_parameters=1)
    return (w1, b1, a1, w2, b2, a2, w3, b3, a3)


def _run_case(x, params, k, s, p):
    out = jax.block_until_ready(downproj_block(x, params, k, s, p))
    ref_bf = jax.block_until_ready(
        _ref_downproj(x, params, k, s, p, matmul_dtype=jnp.bfloat16))
    ref_f32 = jax.block_until_ready(
        _ref_downproj(x, params, k, s, p, matmul_dtype=jnp.float32))

    n, c, h, w = x.shape
    assert out.shape == (n, c, h // s, w // s), out.shape
    # Strict check vs. a reference with the same bf16 input rounding.
    assert jnp.allclose(out, ref_bf, rtol=2e-3, atol=2e-3), \
        float(jnp.max(jnp.abs(out - ref_bf)))
    # Loose check vs. the full-f32 reference (bf16 matmul-input accuracy).
    assert jnp.allclose(out, ref_f32, rtol=5e-2, atol=5e-2), \
        float(jnp.max(jnp.abs(out - ref_f32)))


if __name__ == "__main__":
    # SRFBN/DBPN projection-unit hyperparameters for upscale_factor=2:
    # kernel_size=6, stride=2, padding=2, in_channel=out_channel.
    K, S, P = 6, 2, 2
    C = 4

    key = jax.random.PRNGKey(0)
    kp, kx1, kx2 = jax.random.split(key, 3)
    params = _make_params(kp, C, K)

    # Small canonical test size.
    x1 = jax.random.normal(kx1, (2, C, 16, 16), jnp.float32)
    _run_case(x1, params, K, S, P)

    # Larger spatial size: same fused kernel, bigger per-step VMEM working set.
    x2 = jax.random.normal(kx2, (2, C, 32, 32), jnp.float32)
    _run_case(x2, params, K, S, P)

    print("KERNEL_OK")
</pallas_src>

<mosaic_0001>
module attributes {stable_mosaic.version = 11 : i64} {
  func.func @_fused_downproj_kernel(%arg0: i32, %arg1: memref<3xf32, #tpu.memory_space<smem>>, %arg2: memref<1x10x10x16xbf16, #tpu.memory_space<vmem>>, %arg3: memref<144x4xbf16, #tpu.memory_space<vmem>>, %arg4: memref<1x4xf32, #tpu.memory_space<vmem>>, %arg5: memref<36x16xbf16, #tpu.memory_space<vmem>>, %arg6: memref<1x16xf32, #tpu.memory_space<vmem>>, %arg7: memref<144x4xbf16, #tpu.memory_space<vmem>>, %arg8: memref<1x4xf32, #tpu.memory_space<vmem>>, %arg9: memref<1x64x4xf32, #tpu.memory_space<vmem>>, %arg10: memref<8x8x144xbf16, #tpu.memory_space<vmem>>, %arg11: memref<10x10x4xf32, #tpu.memory_space<vmem>>, %arg12: memref<8x8x36xbf16, #tpu.memory_space<vmem>>, %arg13: memref<10x10x16xf32, #tpu.memory_space<vmem>>) attributes {dimension_semantics = [#tpu.dimension_semantics<parallel>], iteration_bounds = array<i64: 2>, scalar_prefetch = 0 : i64, scratch_operands = 4 : i64, tpu.core_type = #tpu.core_type<tc>, window_params = [{transform_indices = @transform_0, window_bounds = array<i64: 3>}, {transform_indices = @transform_1, window_bounds = array<i64: 1, 10, 10, 16>}, {pipeline_mode = #tpu.pipeline_mode<synchronous>, transform_indices = @transform_2, window_bounds = array<i64: 144, 4>}, {pipeline_mode = #tpu.pipeline_mode<synchronous>, transform_indices = @transform_3, window_bounds = array<i64: 1, 4>}, {pipeline_mode = #tpu.pipeline_mode<synchronous>, transform_indices = @transform_4, window_bounds = array<i64: 36, 16>}, {pipeline_mode = #tpu.pipeline_mode<synchronous>, transform_indices = @transform_5, window_bounds = array<i64: 1, 16>}, {pipeline_mode = #tpu.pipeline_mode<synchronous>, transform_indices = @transform_6, window_bounds = array<i64: 144, 4>}, {pipeline_mode = #tpu.pipeline_mode<synchronous>, transform_indices = @transform_7, window_bounds = array<i64: 1, 4>}, {transform_indices = @transform_8, window_bounds = array<i64: 1, 64, 4>}]} {
    %c0 = arith.constant 0 : index
    %c0_0 = arith.constant 0 : index
    %c0_1 = arith.constant 0 : index
    %c0_2 = arith.constant 0 : index
    %0 = vector.load %arg2[%c0, %c0_0, %c0_1, %c0_2] : memref<1x10x10x16xbf16, #tpu.memory_space<vmem>>, vector<1x8x8x16xbf16>
    %1 = vector.shape_cast %0 : vector<1x8x8x16xbf16> to vector<8x8x16xbf16>
    %c0_3 = arith.constant 0 : index
    %c0_4 = arith.constant 0 : index
    %c0_5 = arith.constant 0 : index
    %2 = vector.load %arg10[%c0_3, %c0_4, %c0_5] : memref<8x8x144xbf16, #tpu.memory_space<vmem>>, vector<8x8x16xbf16>
    tpu.vector_store %arg10[%c0_3, %c0_4, %c0_5], %1 {strides = array<i32>} : memref<8x8x144xbf16, #tpu.memory_space<vmem>>, vector<8x8x16xbf16>,
    %c0_6 = arith.constant 0 : index
    %c0_7 = arith.constant 0 : index
    %c1 = arith.constant 1 : index
    %c0_8 = arith.constant 0 : index
    %3 = vector.load %arg2[%c0_6, %c0_7, %c1, %c0_8] : memref<1x10x10x16xbf16, #tpu.memory_space<vmem>>, vector<1x8x8x16xbf16>
    %4 = vector.shape_cast %3 : vector<1x8x8x16xbf16> to vector<8x8x16xbf16>
    %c0_9 = arith.constant 0 : index
    %c0_10 = arith.constant 0 : index
    %c16 = arith.constant 16 : index
    %5 = vector.load %arg10[%c0_9, %c0_10, %c16] : memref<8x8x144xbf16, #tpu.memory_space<vmem>>, vector<8x8x16xbf16>
    tpu.vector_store %arg10[%c0_9, %c0_10, %c16], %4 {strides = array<i32>} : memref<8x8x144xbf16, #tpu.memory_space<vmem>>, vector<8x8x16xbf16>,
    %c0_11 = arith.constant 0 : index
    %c0_12 = arith.constant 0 : index
    %c2 = arith.constant 2 : index
    %c0_13 = arith.constant 0 : index
    %6 = vector.load %arg2[%c0_11, %c0_12, %c2, %c0_13] : memref<1x10x10x16xbf16, #tpu.memory_space<vmem>>, vector<1x8x8x16xbf16>
    %7 = vector.shape_cast %6 : vector<1x8x8x16xbf16> to vector<8x8x16xbf16>
    %c0_14 = arith.constant 0 : index
    %c0_15 = arith.constant 0 : index
    %c32 = arith.constant 32 : index
    %8 = vector.load %arg10[%c0_14, %c0_15, %c32] : memref<8x8x144xbf16, #tpu.memory_space<vmem>>, vector<8x8x16xbf16>
    tpu.vector_store %arg10[%c0_14, %c0_15, %c32], %7 {strides = array<i32>} : memref<8x8x144xbf16, #tpu.memory_space<vmem>>, vector<8x8x16xbf16>,
    %c0_16 = arith.constant 0 : index
    %c1_17 = arith.constant 1 : index
    %c0_18 = arith.constant 0 : index
    %c0_19 = arith.constant 0 : index
    %9 = vector.load %arg2[%c0_16, %c1_17, %c0_18, %c0_19] : memref<1x10x10x16xbf16, #tpu.memory_space<vmem>>, vector<1x8x8x16xbf16>
    %10 = vector.shape_cast %9 : vector<1x8x8x16xbf16> to vector<8x8x16xbf16>
    %c0_20 = arith.constant 0 : index
    %c0_21 = arith.constant 0 : index
    %c48 = arith.constant 48 : index
    %11 = vector.load %arg10[%c0_20, %c0_21, %c48] : memref<8x8x144xbf16, #tpu.memory_space<vmem>>, vector<8x8x16xbf16>
    tpu.vector_store %arg10[%c0_20, %c0_21, %c48], %10 {strides = array<i32>} : memref<8x8x144xbf16, #tpu.memory_space<vmem>>, vector<8x8x16xbf16>,
    %c0_22 = arith.constant 0 : index
    %c1_23 = arith.constant 1 : index
    %c1_24 = arith.constant 1 : index
    %c0_25 = arith.constant 0 : index
    %12 = vector.load %arg2[%c0_22, %c1_23, %c1_24, %c0_25] : memref<1x10x10x16xbf16, #tpu.memory_space<vmem>>, vector<1x8x8x16xbf16>
    %13 = vector.shape_cast %12 : vector<1x8x8x16xbf16> to vector<8x8x16xbf16>
    %c0_26 = arith.constant 0 : index
    %c0_27 = arith.constant 0 : index
    %c64 = arith.constant 64 : index
    %14 = vector.load %arg10[%c0_26, %c0_27, %c64] : memref<8x8x144xbf16, #tpu.memory_space<vmem>>, vector<8x8x16xbf16>
    tpu.vector_store %arg10[%c0_26, %c0_27, %c64], %13 {strides = array<i32>} : memref<8x8x144xbf16, #tpu.memory_space<vmem>>, vector<8x8x16xbf16>,
    %c0_28 = arith.constant 0 : index
    %c1_29 = arith.constant 1 : index
    %c2_30 = arith.constant 2 : index
    %c0_31 = arith.constant 0 : index
    %15 = vector.load %arg2[%c0_28, %c1_29, %c2_30, %c0_31] : memref<1x10x10x16xbf16, #tpu.memory_space<vmem>>, vector<1x8x8x16xbf16>
    %16 = vector.shape_cast %15 : vector<1x8x8x16xbf16> to vector<8x8x16xbf16>
    %c0_32 = arith.constant 0 : index
    %c0_33 = arith.constant 0 : index
    %c80 = arith.constant 80 : index
    %17 = vector.load %arg10[%c0_32, %c0_33, %c80] : memref<8x8x144xbf16, #tpu.memory_space<vmem>>, vector<8x8x16xbf16>
    tpu.vector_store %arg10[%c0_32, %c0_33, %c80], %16 {strides = array<i32>} : memref<8x8x144xbf16, #tpu.memory_space<vmem>>, vector<8x8x16xbf16>,
    %c0_34 = arith.constant 0 : index
    %c2_35 = arith.constant 2 : index
    %c0_36 = arith.constant 0 : index
    %c0_37 = arith.constant 0 : index
    %18 = vector.load %arg2[%c0_34, %c2_35, %c0_36, %c0_37] : memref<1x10x10x16xbf16, #tpu.memory_space<vmem>>, vector<1x8x8x16xbf16>
    %19 = vector.shape_cast %18 : vector<1x8x8x16xbf16> to vector<8x8x16xbf16>
    %c0_38 = arith.constant 0 : index
    %c0_39 = arith.constant 0 : index
    %c96 = arith.constant 96 : index
    %20 = vector.load %arg10[%c0_38, %c0_39, %c96] : memref<8x8x144xbf16, #tpu.memory_space<vmem>>, vector<8x8x16xbf16>
    tpu.vector_store %arg10[%c0_38, %c0_39, %c96], %19 {strides = array<i32>} : memref<8x8x144xbf16, #tpu.memory_space<vmem>>, vector<8x8x16xbf16>,
    %c0_40 = arith.constant 0 : index
    %c2_41 = arith.constant 2 : index
    %c1_42 = arith.constant 1 : index
    %c0_43 = arith.constant 0 : index
    %21 = vector.load %arg2[%c0_40, %c2_41, %c1_42, %c0_43] : memref<1x10x10x16xbf16, #tpu.memory_space<vmem>>, vector<1x8x8x16xbf16>
    %22 = vector.shape_cast %21 : vector<1x8x8x16xbf16> to vector<8x8x16xbf16>
    %c0_44 = arith.constant 0 : index
    %c0_45 = arith.constant 0 : index
    %c112 = arith.constant 112 : index
    %23 = vector.load %arg10[%c0_44, %c0_45, %c112] : memref<8x8x144xbf16, #tpu.memory_space<vmem>>, vector<8x8x16xbf16>
    tpu.vector_store %arg10[%c0_44, %c0_45, %c112], %22 {strides = array<i32>} : memref<8x8x144xbf16, #tpu.memory_space<vmem>>, vector<8x8x16xbf16>,
    %c0_46 = arith.constant 0 : index
    %c2_47 = arith.constant 2 : index
    %c2_48 = arith.constant 2 : index
    %c0_49 = arith.constant 0 : index
    %24 = vector.load %arg2[%c0_46, %c2_47, %c2_48, %c0_49] : memref<1x10x10x16xbf16, #tpu.memory_space<vmem>>, vector<1x8x8x16xbf16>
    %25 = vector.shape_cast %24 : vector<1x8x8x16xbf16> to vector<8x8x16xbf16>
    %c0_50 = arith.constant 0 : index
    %c0_51 = arith.constant 0 : index
    %c128 = arith.constant 128 : index
    %26 = vector.load %arg10[%c0_50, %c0_51, %c128] : memref<8x8x144xbf16, #tpu.memory_space<vmem>>, vector<8x8x16xbf16>
    tpu.vector_store %arg10[%c0_50, %c0_51, %c128], %25 {strides = array<i32>} : memref<8x8x144xbf16, #tpu.memory_space<vmem>>, vector<8x8x16xbf16>,
    %c0_52 = arith.constant 0 : index
    %c0_53 = arith.constant 0 : index
    %c0_54 = arith.constant 0 : index
    %27 = vector.load %arg10[%c0_52, %c0_53, %c0_54] : memref<8x8x144xbf16, #tpu.memory_space<vmem>>, vector<8x8x144xbf16>
    %28 = vector.shape_cast %27 : vector<8x8x144xbf16> to vector<64x144xbf16>
    %c0_55 = arith.constant 0 : index
    %c0_56 = arith.constant 0 : index
    %29 = vector.load %arg3[%c0_55, %c0_56] : memref<144x4xbf16, #tpu.memory_space<vmem>>, vector<144x4xbf16>
    %cst = arith.constant dense<0.000000e+00> : vector<64x4xf32>
    %30 = tpu.matmul %28, %29, %cst {dimension_numbers = #tpu.dot_dimension_numbers<[1], [0], [0], [1], [0, 0, 1, 1], [], []>} : vector<64x144xbf16>, vector<144x4xbf16>, vector<64x4xf32> -> vector<64x4xf32>
    %c0_57 = arith.constant 0 : index
    %c0_58 = arith.constant 0 : index
    %31 = vector.load %arg4[%c0_57, %c0_58] : memref<1x4xf32, #tpu.memory_space<vmem>>, vector<1x4xf32>
    %32 = vector.broadcast %31 : vector<1x4xf32> to vector<64x4xf32>
    %33 = arith.addf %30, %32 : vector<64x4xf32>
    %c0_59 = arith.constant 0 : index
    %34 = memref.load %arg1[%c0_59] : memref<3xf32, #tpu.memory_space<smem>>
    %cst_60 = arith.constant 0.000000e+00 : f32
    %35 = vector.broadcast %cst_60 : f32 to vector<64x4xf32>
    %36 = arith.cmpf oge, %33, %35 : vector<64x4xf32>
    %37 = vector.broadcast %34 : f32 to vector<64x4xf32>
    %38 = arith.mulf %37, %33 : vector<64x4xf32>
    %39 = arith.select %36, %33, %38 : vector<64x4xi1>, vector<64x4xf32>
    %cst_61 = arith.constant 0.000000e+00 : f32
    %40 = vector.broadcast %cst_61 : f32 to vector<10x10x4xf32>
    %c0_62 = arith.constant 0 : index
    %c0_63 = arith.constant 0 : index
    %c0_64 = arith.constant 0 : index
    %41 = vector.load %arg11[%c0_62, %c0_63, %c0_64] : memref<10x10x4xf32, #tpu.memory_space<vmem>>, vector<10x10x4xf32>
    tpu.vector_store %arg11[%c0_62, %c0_63, %c0_64], %40 {strides = array<i32>} : memref<10x10x4xf32, #tpu.memory_space<vmem>>, vector<10x10x4xf32>,
    %42 = vector.shape_cast %39 : vector<64x4xf32> to vector<8x8x4xf32>
    %c1_65 = arith.constant 1 : index
    %c1_66 = arith.constant 1 : index
    %c0_67 = arith.constant 0 : index
    %43 = vector.load %arg11[%c1_65, %c1_66, %c0_67] : memref<10x10x4xf32, #tpu.memory_space<vmem>>, vector<8x8x4xf32>
    tpu.vector_store %arg11[%c1_65, %c1_66, %c0_67], %42 {strides = array<i32>} : memref<10x10x4xf32, #tpu.memory_space<vmem>>, vector<8x8x4xf32>,
    %c0_68 = arith.constant 0 : index
    %c0_69 = arith.constant 0 : index
    %c0_70 = arith.constant 0 : index
    %44 = vector.load %arg11[%c0_68, %c0_69, %c0_70] : memref<10x10x4xf32, #tpu.memory_space<vmem>>, vector<8x8x4xf32>
    %45 = arith.truncf %44 : vector<8x8x4xf32> to vector<8x8x4xbf16>
    %c0_71 = arith.constant 0 : index
    %c0_72 = arith.constant 0 : index
    %c0_73 = arith.constant 0 : index
    %46 = vector.load %arg12[%c0_71, %c0_72, %c0_73] : memref<8x8x36xbf16, #tpu.memory_space<vmem>>, vector<8x8x4xbf16>
    tpu.vector_store %arg12[%c0_71, %c0_72, %c0_73], %45 {strides = array<i32>} : memref<8x8x36xbf16, #tpu.memory_space<vmem>>, vector<8x8x4xbf16>,
    %c0_74 = arith.constant 0 : index
    %c1_75 = arith.constant 1 : index
    %c0_76 = arith.constant 0 : index
    %47 = vector.load %arg11[%c0_74, %c1_75, %c0_76] : memref<10x10x4xf32, #tpu.memory_space<vmem>>, vector<8x8x4xf32>
    %48 = arith.truncf %47 : vector<8x8x4xf32> to vector<8x8x4xbf16>
    %c0_77 = arith.constant 0 : index
    %c0_78 = arith.constant 0 : index
    %c4 = arith.constant 4 : index
    %49 = vector.load %arg12[%c0_77, %c0_78, %c4] : memref<8x8x36xbf16, #tpu.memory_space<vmem>>, vector<8x8x4xbf16>
    tpu.vector_store %arg12[%c0_77, %c0_78, %c4], %48 {strides = array<i32>} : memref<8x8x36xbf16, #tpu.memory_space<vmem>>, vector<8x8x4xbf16>,
    %c0_79 = arith.constant 0 : index
    %c2_80 = arith.constant 2 : index
    %c0_81 = arith.constant 0 : index
    %50 = vector.load %arg11[%c0_79, %c2_80, %c0_81] : memref<10x10x4xf32, #tpu.memory_space<vmem>>, vector<8x8x4xf32>
    %51 = arith.truncf %50 : vector<8x8x4xf32> to vector<8x8x4xbf16>
    %c0_82 = arith.constant 0 : index
    %c0_83 = arith.constant 0 : index
    %c8 = arith.constant 8 : index
    %52 = vector.load %arg12[%c0_82, %c0_83, %c8] : memref<8x8x36xbf16, #tpu.memory_space<vmem>>, vector<8x8x4xbf16>
    tpu.vector_store %arg12[%c0_82, %c0_83, %c8], %51 {strides = array<i32>} : memref<8x8x36xbf16, #tpu.memory_space<vmem>>, vector<8x8x4xbf16>,
    %c1_84 = arith.constant 1 : index
    %c0_85 = arith.constant 0 : index
    %c0_86 = arith.constant 0 : index
    %53 = vector.load %arg11[%c1_84, %c0_85, %c0_86] : memref<10x10x4xf32, #tpu.memory_space<vmem>>, vector<8x8x4xf32>
    %54 = arith.truncf %53 : vector<8x8x4xf32> to vector<8x8x4xbf16>
    %c0_87 = arith.constant 0 : index
    %c0_88 = arith.constant 0 : index
    %c12 = arith.constant 12 : index
    %55 = vector.load %arg12[%c0_87, %c0_88, %c12] : memref<8x8x36xbf16, #tpu.memory_space<vmem>>, vector<8x8x4xbf16>
    tpu.vector_store %arg12[%c0_87, %c0_88, %c12], %54 {strides = array<i32>} : memref<8x8x36xbf16, #tpu.memory_space<vmem>>, vector<8x8x4xbf16>,
    %c1_89 = arith.constant 1 : index
    %c1_90 = arith.constant 1 : index
    %c0_91 = arith.constant 0 : index
    %56 = vector.load %arg11[%c1_89, %c1_90, %c0_91] : memref<10x10x4xf32, #tpu.memory_space<vmem>>, vector<8x8x4xf32>
    %57 = arith.truncf %56 : vector<8x8x4xf32> to vector<8x8x4xbf16>
    %c0_92 = arith.constant 0 : index
    %c0_93 = arith.constant 0 : index
    %c16_94 = arith.constant 16 : index
    %58 = vector.load %arg12[%c0_92, %c0_93, %c16_94] : memref<8x8x36xbf16, #tpu.memory_space<vmem>>, vector<8x8x4xbf16>
    tpu.vector_store %arg12[%c0_92, %c0_93, %c16_94], %57 {strides = array<i32>} : memref<8x8x36xbf16, #tpu.memory_space<vmem>>, vector<8x8x4xbf16>,
    %c1_95 = arith.constant 1 : index
    %c2_96 = arith.constant 2 : index
    %c0_97 = arith.constant 0 : index
    %59 = vector.load %arg11[%c1_95, %c2_96, %c0_97] : memref<10x10x4xf32, #tpu.memory_space<vmem>>, vector<8x8x4xf32>
    %60 = arith.truncf %59 : vector<8x8x4xf32> to vector<8x8x4xbf16>
    %c0_98 = arith.constant 0 : index
    %c0_99 = arith.constant 0 : index
    %c20 = arith.constant 20 : index
    %61 = vector.load %arg12[%c0_98, %c0_99, %c20] : memref<8x8x36xbf16, #tpu.memory_space<vmem>>, vector<8x8x4xbf16>
    tpu.vector_store %arg12[%c0_98, %c0_99, %c20], %60 {strides = array<i32>} : memref<8x8x36xbf16, #tpu.memory_space<vmem>>, vector<8x8x4xbf16>,
    %c2_100 = arith.constant 2 : index
    %c0_101 = arith.constant 0 : index
    %c0_102 = arith.constant 0 : index
    %62 = vector.load %arg11[%c2_100, %c0_101, %c0_102] : memref<10x10x4xf32, #tpu.memory_space<vmem>>, vector<8x8x4xf32>
    %63 = arith.truncf %62 : vector<8x8x4xf32> to vector<8x8x4xbf16>
    %c0_103 = arith.constant 0 : index
    %c0_104 = arith.constant 0 : index
    %c24 = arith.constant 24 : index
    %64 = vector.load %arg12[%c0_103, %c0_104, %c24] : memref<8x8x36xbf16, #tpu.memory_space<vmem>>, vector<8x8x4xbf16>
    tpu.vector_store %arg12[%c0_103, %c0_104, %c24], %63 {strides = array<i32>} : memref<8x8x36xbf16, #tpu.memory_space<vmem>>, vector<8x8x4xbf16>,
    %c2_105 = arith.constant 2 : index
    %c1_106 = arith.constant 1 : index
    %c0_107 = arith.constant 0 : index
    %65 = vector.load %arg11[%c2_105, %c1_106, %c0_107] : memref<10x10x4xf32, #tpu.memory_space<vmem>>, vector<8x8x4xf32>
    %66 = arith.truncf %65 : vector<8x8x4xf32> to vector<8x8x4xbf16>
    %c0_108 = arith.constant 0 : index
    %c0_109 = arith.constant 0 : index
    %c28 = arith.constant 28 : index
    %67 = vector.load %arg12[%c0_108, %c0_109, %c28] : memref<8x8x36xbf16, #tpu.memory_space<vmem>>, vector<8x8x4xbf16>
    tpu.vector_store %arg12[%c0_108, %c0_109, %c28], %66 {strides = array<i32>} : memref<8x8x36xbf16, #tpu.memory_space<vmem>>, vector<8x8x4xbf16>,
    %c2_110 = arith.constant 2 : index
    %c2_111 = arith.constant 2 : index
    %c0_112 = arith.constant 0 : index
    %68 = vector.load %arg11[%c2_110, %c2_111, %c0_112] : memref<10x10x4xf32, #tpu.memory_space<vmem>>, vector<8x8x4xf32>
    %69 = arith.truncf %68 : vector<8x8x4xf32> to vector<8x8x4xbf16>
    %c0_113 = arith.constant 0 : index
    %c0_114 = arith.constant 0 : index
    %c32_115 = arith.constant 32 : index
    %70 = vector.load %arg12[%c0_113, %c0_114, %c32_115] : memref<8x8x36xbf16, #tpu.memory_space<vmem>>, vector<8x8x4xbf16>
    tpu.vector_store %arg12[%c0_113, %c0_114, %c32_115], %69 {strides = array<i32>} : memref<8x8x36xbf16, #tpu.memory_space<vmem>>, vector<8x8x4xbf16>,
    %c0_116 = arith.constant 0 : index
    %c0_117 = arith.constant 0 : index
    %c0_118 = arith.constant 0 : index
    %71 = vector.load %arg12[%c0_116, %c0_117, %c0_118] : memref<8x8x36xbf16, #tpu.memory_space<vmem>>, vector<8x8x36xbf16>
    %72 = vector.shape_cast %71 : vector<8x8x36xbf16> to vector<64x36xbf16>
    %c0_119 = arith.constant 0 : index
    %c0_120 = arith.constant 0 : index
    %73 = vector.load %arg5[%c0_119, %c0_120] : memref<36x16xbf16, #tpu.memory_space<vmem>>, vector<36x16xbf16>
    %cst_121 = arith.constant dense<0.000000e+00> : vector<64x16xf32>
    %74 = tpu.matmul %72, %73, %cst_121 {dimension_numbers = #tpu.dot_dimension_numbers<[1], [0], [0], [1], [0, 0, 1, 1], [], []>} : vector<64x36xbf16>, vector<36x16xbf16>, vector<64x16xf32> -> vector<64x16xf32>
    %c0_122 = arith.constant 0 : index
    %c0_123 = arith.constant 0 : index
    %75 = vector.load %arg6[%c0_122, %c0_123] : memref<1x16xf32, #tpu.memory_space<vmem>>, vector<1x16xf32>
    %76 = vector.broadcast %75 : vector<1x16xf32> to vector<64x16xf32>
    %77 = arith.addf %74, %76 : vector<64x16xf32>
    %c1_124 = arith.constant 1 : index
    %78 = memref.load %arg1[%c1_124] : memref<3xf32, #tpu.memory_space<smem>>
    %cst_125 = arith.constant 0.000000e+00 : f32
    %79 = vector.broadcast %cst_125 : f32 to vector<64x16xf32>
    %80 = arith.cmpf oge, %77, %79 : vector<64x16xf32>
    %81 = vector.broadcast %78 : f32 to vector<64x16xf32>
    %82 = arith.mulf %81, %77 : vector<64x16xf32>
    %83 = arith.select %80, %77, %82 : vector<64x16xi1>, vector<64x16xf32>
    %c0_126 = arith.constant 0 : index
    %c1_127 = arith.constant 1 : index
    %c1_128 = arith.constant 1 : index
    %c0_129 = arith.constant 0 : index
    %84 = vector.load %arg2[%c0_126, %c1_127, %c1_128, %c0_129] : memref<1x10x10x16xbf16, #tpu.memory_space<vmem>>, vector<1x8x8x16xbf16>
    %85 = vector.shape_cast %84 : vector<1x8x8x16xbf16> to vector<8x8x16xbf16>
    %86 = vector.shape_cast %85 : vector<8x8x16xbf16> to vector<64x16xbf16>
    %87 = arith.extf %86 : vector<64x16xbf16> to vector<64x16xf32>
    %88 = arith.subf %83, %87 : vector<64x16xf32>
    %cst_130 = arith.constant 0.000000e+00 : f32
    %89 = vector.broadcast %cst_130 : f32 to vector<10x10x16xf32>
    %c0_131 = arith.constant 0 : index
    %c0_132 = arith.constant 0 : index
    %c0_133 = arith.constant 0 : index
    %90 = vector.load %arg13[%c0_131, %c0_132, %c0_133] : memref<10x10x16xf32, #tpu.memory_space<vmem>>, vector<10x10x16xf32>
    tpu.vector_store %arg13[%c0_131, %c0_132, %c0_133], %89 {strides = array<i32>} : memref<10x10x16xf32, #tpu.memory_space<vmem>>, vector<10x10x16xf32>,
    %91 = vector.shape_cast %88 : vector<64x16xf32> to vector<8x8x16xf32>
    %c1_134 = arith.constant 1 : index
    %c1_135 = arith.constant 1 : index
    %c0_136 = arith.constant 0 : index
    %92 = vector.load %arg13[%c1_134, %c1_135, %c0_136] : memref<10x10x16xf32, #tpu.memory_space<vmem>>, vector<8x8x16xf32>
    tpu.vector_store %arg13[%c1_134, %c1_135, %c0_136], %91 {strides = array<i32>} : memref<10x10x16xf32, #tpu.memory_space<vmem>>, vector<8x8x16xf32>,
    %c0_137 = arith.constant 0 : index
    %c0_138 = arith.constant 0 : index
    %c0_139 = arith.constant 0 : index
    %93 = vector.load %arg13[%c0_137, %c0_138, %c0_139] : memref<10x10x16xf32, #tpu.memory_space<vmem>>, vector<8x8x16xf32>
    %94 = arith.truncf %93 : vector<8x8x16xf32> to vector<8x8x16xbf16>
    %c0_140 = arith.constant 0 : index
    %c0_141 = arith.constant 0 : index
    %c0_142 = arith.constant 0 : index
    %95 = vector.load %arg10[%c0_140, %c0_141, %c0_142] : memref<8x8x144xbf16, #tpu.memory_space<vmem>>, vector<8x8x16xbf16>
    tpu.vector_store %arg10[%c0_140, %c0_141, %c0_142], %94 {strides = array<i32>} : memref<8x8x144xbf16, #tpu.memory_space<vmem>>, vector<8x8x16xbf16>,
    %c0_143 = arith.constant 0 : index
    %c1_144 = arith.constant 1 : index
    %c0_145 = arith.constant 0 : index
    %96 = vector.load %arg13[%c0_143, %c1_144, %c0_145] : memref<10x10x16xf32, #tpu.memory_space<vmem>>, vector<8x8x16xf32>
    %97 = arith.truncf %96 : vector<8x8x16xf32> to vector<8x8x16xbf16>
    %c0_146 = arith.constant 0 : index
    %c0_147 = arith.constant 0 : index
    %c16_148 = arith.constant 16 : index
    %98 = vector.load %arg10[%c0_146, %c0_147, %c16_148] : memref<8x8x144xbf16, #tpu.memory_space<vmem>>, vector<8x8x16xbf16>
    tpu.vector_store %arg10[%c0_146, %c0_147, %c16_148], %97 {strides = array<i32>} : memref<8x8x144xbf16, #tpu.memory_space<vmem>>, vector<8x8x16xbf16>,
    %c0_149 = arith.constant 0 : index
    %c2_150 = arith.constant 2 : index
    %c0_151 = arith.constant 0 : index
    %99 = vector.load %arg13[%c0_149, %c2_150, %c0_151] : memref<10x10x16xf32, #tpu.memory_space<vmem>>, vector<8x8x16xf32>
    %100 = arith.truncf %99 : vector<8x8x16xf32> to vector<8x8x16xbf16>
    %c0_152 = arith.constant 0 : index
    %c0_153 = arith.constant 0 : index
    %c32_154 = arith.constant 32 : index
    %101 = vector.load %arg10[%c0_152, %c0_153, %c32_154] : memref<8x8x144xbf16, #tpu.memory_space<vmem>>, vector<8x8x16xbf16>
    tpu.vector_store %arg10[%c0_152, %c0_153, %c32_154], %100 {strides = array<i32>} : memref<8x8x144xbf16, #tpu.memory_space<vmem>>, vector<8x8x16xbf16>,
    %c1_155 = arith.constant 1 : index
    %c0_156 = arith.constant 0 : index
    %c0_157 = arith.constant 0 : index
    %102 = vector.load %arg13[%c1_155, %c0_156, %c0_157] : memref<10x10x16xf32, #tpu.memory_space<vmem>>, vector<8x8x16xf32>
    %103 = arith.truncf %102 : vector<8x8x16xf32> to vector<8x8x16xbf16>
    %c0_158 = arith.constant 0 : index
    %c0_159 = arith.constant 0 : index
    %c48_160 = arith.constant 48 : index
    %104 = vector.load %arg10[%c0_158, %c0_159, %c48_160] : memref<8x8x144xbf16, #tpu.memory_space<vmem>>, vector<8x8x16xbf16>
    tpu.vector_store %arg10[%c0_158, %c0_159, %c48_160], %103 {strides = array<i32>} : memref<8x8x144xbf16, #tpu.memory_space<vmem>>, vector<8x8x16xbf16>,
    %c1_161 = arith.constant 1 : index
    %c1_162 = arith.constant 1 : index
    %c0_163 = arith.constant 0 : index
    %105 = vector.load %arg13[%c1_161, %c1_162, %c0_163] : memref<10x10x16xf32, #tpu.memory_space<vmem>>, vector<8x8x16xf32>
    %106 = arith.truncf %105 : vector<8x8x16xf32> to vector<8x8x16xbf16>
    %c0_164 = arith.constant 0 : index
    %c0_165 = arith.constant 0 : index
    %c64_166 = arith.constant 64 : index
    %107 = vector.load %arg10[%c0_164, %c0_165, %c64_166] : memref<8x8x144xbf16, #tpu.memory_space<vmem>>, vector<8x8x16xbf16>
    tpu.vector_store %arg10[%c0_164, %c0_165, %c64_166], %106 {strides = array<i32>} : memref<8x8x144xbf16, #tpu.memory_space<vmem>>, vector<8x8x16xbf16>,
    %c1_167 = arith.constant 1 : index
    %c2_168 = arith.constant 2 : index
    %c0_169 = arith.constant 0 : index
    %108 = vector.load %arg13[%c1_167, %c2_168, %c0_169] : memref<10x10x16xf32, #tpu.memory_space<vmem>>, vector<8x8x16xf32>
    %109 = arith.truncf %108 : vector<8x8x16xf32> to vector<8x8x16xbf16>
    %c0_170 = arith.constant 0 : index
    %c0_171 = arith.constant 0 : index
    %c80_172 = arith.constant 80 : index
    %110 = vector.load %arg10[%c0_170, %c0_171, %c80_172] : memref<8x8x144xbf16, #tpu.memory_space<vmem>>, vector<8x8x16xbf16>
    tpu.vector_store %arg10[%c0_170, %c0_171, %c80_172], %109 {strides = array<i32>} : memref<8x8x144xbf16, #tpu.memory_space<vmem>>, vector<8x8x16xbf16>,
    %c2_173 = arith.constant 2 : index
    %c0_174 = arith.constant 0 : index
    %c0_175 = arith.constant 0 : index
    %111 = vector.load %arg13[%c2_173, %c0_174, %c0_175] : memref<10x10x16xf32, #tpu.memory_space<vmem>>, vector<8x8x16xf32>
    %112 = arith.truncf %111 : vector<8x8x16xf32> to vector<8x8x16xbf16>
    %c0_176 = arith.constant 0 : index
    %c0_177 = arith.constant 0 : index
    %c96_178 = arith.constant 96 : index
    %113 = vector.load %arg10[%c0_176, %c0_177, %c96_178] : memref<8x8x144xbf16, #tpu.memory_space<vmem>>, vector<8x8x16xbf16>
    tpu.vector_store %arg10[%c0_176, %c0_177, %c96_178], %112 {strides = array<i32>} : memref<8x8x144xbf16, #tpu.memory_space<vmem>>, vector<8x8x16xbf16>,
    %c2_179 = arith.constant 2 : index
    %c1_180 = arith.constant 1 : index
    %c0_181 = arith.constant 0 : index
    %114 = vector.load %arg13[%c2_179, %c1_180, %c0_181] : memref<10x10x16xf32, #tpu.memory_space<vmem>>, vector<8x8x16xf32>
    %115 = arith.truncf %114 : vector<8x8x16xf32> to vector<8x8x16xbf16>
    %c0_182 = arith.constant 0 : index
    %c0_183 = arith.constant 0 : index
    %c112_184 = arith.constant 112 : index
    %116 = vector.load %arg10[%c0_182, %c0_183, %c112_184] : memref<8x8x144xbf16, #tpu.memory_space<vmem>>, vector<8x8x16xbf16>
    tpu.vector_store %arg10[%c0_182, %c0_183, %c112_184], %115 {strides = array<i32>} : memref<8x8x144xbf16, #tpu.memory_space<vmem>>, vector<8x8x16xbf16>,
    %c2_185 = arith.constant 2 : index
    %c2_186 = arith.constant 2 : index
    %c0_187 = arith.constant 0 : index
    %117 = vector.load %arg13[%c2_185, %c2_186, %c0_187] : memref<10x10x16xf32, #tpu.memory_space<vmem>>, vector<8x8x16xf32>
    %118 = arith.truncf %117 : vector<8x8x16xf32> to vector<8x8x16xbf16>
    %c0_188 = arith.constant 0 : index
    %c0_189 = arith.constant 0 : index
    %c128_190 = arith.constant 128 : index
    %119 = vector.load %arg10[%c0_188, %c0_189, %c128_190] : memref<8x8x144xbf16, #tpu.memory_space<vmem>>, vector<8x8x16xbf16>
    tpu.vector_store %arg10[%c0_188, %c0_189, %c128_190], %118 {strides = array<i32>} : memref<8x8x144xbf16, #tpu.memory_space<vmem>>, vector<8x8x16xbf16>,
    %c0_191 = arith.constant 0 : index
    %c0_192 = arith.constant 0 : index
    %c0_193 = arith.constant 0 : index
    %120 = vector.load %arg10[%c0_191, %c0_192, %c0_193] : memref<8x8x144xbf16, #tpu.memory_space<vmem>>, vector<8x8x144xbf16>
    %121 = vector.shape_cast %120 : vector<8x8x144xbf16> to vector<64x144xbf16>
    %c0_194 = arith.constant 0 : index
    %c0_195 = arith.constant 0 : index
    %122 = vector.load %arg7[%c0_194, %c0_195] : memref<144x4xbf16, #tpu.memory_space<vmem>>, vector<144x4xbf16>
    %cst_196 = arith.constant dense<0.000000e+00> : vector<64x4xf32>
    %123 = tpu.matmul %121, %122, %cst_196 {dimension_numbers = #tpu.dot_dimension_numbers<[1], [0], [0], [1], [0, 0, 1, 1], [], []>} : vector<64x144xbf16>, vector<144x4xbf16>, vector<64x4xf32> -> vector<64x4xf32>
    %c0_197 = arith.constant 0 : index
    %c0_198 = arith.constant 0 : index
    %124 = vector.load %arg8[%c0_197, %c0_198] : memref<1x4xf32, #tpu.memory_space<vmem>>, vector<1x4xf32>
    %125 = vector.broadcast %124 : vector<1x4xf32> to vector<64x4xf32>
    %126 = arith.addf %123, %125 : vector<64x4xf32>
    %c2_199 = arith.constant 2 : index
    %127 = memref.load %arg1[%c2_199] : memref<3xf32, #tpu.memory_space<smem>>
    %cst_200 = arith.constant 0.000000e+00 : f32
    %128 = vector.broadcast %cst_200 : f32 to vector<64x4xf32>
    %129 = arith.cmpf oge, %126, %128 : vector<64x4xf32>
    %130 = vector.broadcast %127 : f32 to vector<64x4xf32>
    %131 = arith.mulf %130, %126 : vector<64x4xf32>
    %132 = arith.select %129, %126, %131 : vector<64x4xi1>, vector<64x4xf32>
    %133 = arith.addf %39, %132 : vector<64x4xf32>
    %c0_201 = arith.constant 0 : index
    %c0_202 = arith.constant 0 : index
    %c0_203 = arith.constant 0 : index
    %134 = vector.load %arg9[%c0_201, %c0_202, %c0_203] : memref<1x64x4xf32, #tpu.memory_space<vmem>>, vector<1x64x4xf32>
    %135 = vector.shape_cast %134 : vector<1x64x4xf32> to vector<64x4xf32>
    %136 = vector.shape_cast %133 : vector<64x4xf32> to vector<1x64x4xf32>
    tpu.vector_store %arg9[%c0_201, %c0_202, %c0_203], %136 {strides = array<i32>} : memref<1x64x4xf32, #tpu.memory_space<vmem>>, vector<1x64x4xf32>,
    return
  }
  func.func @transform_0(%arg0: i32) -> i32 {
    %c0_i32 = arith.constant 0 : i32
    %c0_i32_0 = arith.constant 0 : i32
    return %c0_i32 : i32
  }
  func.func @transform_1(%arg0: i32) -> (i32, i32, i32, i32) {
    %c0_i32 = arith.constant 0 : i32
    %c0_i32_0 = arith.constant 0 : i32
    %c0_i32_1 = arith.constant 0 : i32
    %c0_i32_2 = arith.constant 0 : i32
    return %arg0, %c0_i32, %c0_i32_0, %c0_i32_1 : i32, i32, i32, i32
  }
  func.func @transform_2(%arg0: i32) -> (i32, i32) {
    %c0_i32 = arith.constant 0 : i32
    %c0_i32_0 = arith.constant 0 : i32
    %c0_i32_1 = arith.constant 0 : i32
    return %c0_i32, %c0_i32_0 : i32, i32
  }
  func.func @transform_3(%arg0: i32) -> (i32, i32) {
    %c0_i32 = arith.constant 0 : i32
    %c0_i32_0 = arith.constant 0 : i32
    %c0_i32_1 = arith.constant 0 : i32
    return %c0_i32, %c0_i32_0 : i32, i32
  }
  func.func @transform_4(%arg0: i32) -> (i32, i32) {
    %c0_i32 = arith.constant 0 : i32
    %c0_i32_0 = arith.constant 0 : i32
    %c0_i32_1 = arith.constant 0 : i32
    return %c0_i32, %c0_i32_0 : i32, i32
  }
  func.func @transform_5(%arg0: i32) -> (i32, i32) {
    %c0_i32 = arith.constant 0 : i32
    %c0_i32_0 = arith.constant 0 : i32
    %c0_i32_1 = arith.constant 0 : i32
    return %c0_i32, %c0_i32_0 : i32, i32
  }
  func.func @transform_6(%arg0: i32) -> (i32, i32) {
    %c0_i32 = arith.constant 0 : i32
    %c0_i32_0 = arith.constant 0 : i32
    %c0_i32_1 = arith.constant 0 : i32
    return %c0_i32, %c0_i32_0 : i32, i32
  }
  func.func @transform_7(%arg0: i32) -> (i32, i32) {
    %c0_i32 = arith.constant 0 : i32
    %c0_i32_0 = arith.constant 0 : i32
    %c0_i32_1 = arith.constant 0 : i32
    return %c0_i32, %c0_i32_0 : i32, i32
  }
  func.func @transform_8(%arg0: i32) -> (i32, i32, i32) {
    %c0_i32 = arith.constant 0 : i32
    %c0_i32_0 = arith.constant 0 : i32
    %c0_i32_1 = arith.constant 0 : i32
    return %arg0, %c0_i32, %c0_i32_0 : i32, i32, i32
  }
}

</mosaic_0001>

<bundles_post_ra>
// kernel: tile.8
= control target key start
LH: loop header
LB: loop body
LE: loop exit
PB: predicated region body
PF: predicated region fallthrough
CT: control target
= control target key end

     0   :  { %s22_s0 = inlined_call_operand.vmem [shape: f32[4], index: 0, kind: input, shape index: {}]   ;;  %s23_s1 = inlined_call_operand.vmem [shape: f32[4,4], index: 1, kind: output, shape index: {}]  }
   0x1   :  { %v4_v0 = vld [vmem:[%s22_s0] ss:$0 sm:$0xff] }
   0x2   :  { %5 = vst [vmem:[%s23_s1] sm:$0xf] %v4_v0 }

// kernel: tile.9
= control target key start
LH: loop header
LB: loop body
LE: loop exit
PB: predicated region body
PF: predicated region fallthrough
CT: control target
= control target key end

     0   :  { %s37_s8 = smov 4   ;;  %s38_s9 = smov 8   ;;  %vm7_vm0 = vcmask 31744   ;;  %vm13_vm1 = vcmask 130144   ;;  %vm19_vm2 = vcmask 97344   ;;  %vm25_vm3 = vcmask 64544   ;;  %s55_s0 = inlined_call_operand.vmem [shape: f32[4,4], index: 0, kind: input, shape index: {}]   ;;  %s56_s1 = inlined_call_operand.vmem [shape: f32[1,16], index: 1, kind: output, shape index: {}]  }
   0x1   :  { %v4_v0 = vld [vmem:[%s55_s0] sm:$0xf]  ;;  %s36_s0 = smov 12  }
   0x2   :  { %5 = vst [vmem:[#allocation1] sm:$0xf] %v4_v0 }
   0x9   :  { %v10_v1 = vld [vmem:[#allocation1 + $0x3] sm:$0x1]   ;;  %v22_v2 = vld [vmem:[#allocation1 + $0x1] sm:$0x1]   ;;  %v16_v3 = vld [vmem:[#allocation1 + $0x2] sm:$0x1]  }
   0xa   :  { %11 = vrot.lane.b32.xlu0 %v10_v1, %s36_s0  ;;  %23 = vrot.lane.b32.xlu1 %v22_v2, %s37_s8  ;;  %v6_v4 = vld [vmem:[#allocation1] sm:$0x1]  }
   0xb   :  { %8 = vst.msk [vmem:[#allocation0] sm:$0x1] %vm7_vm0, %v6_v4  }
  0x12   :  { %17 = vrot.lane.b32.xlu0 %v16_v3, %s38_s9 }
  0x7c   :  { %v12_v5 = vpop.permute.xlu0 %11   ;;  %v24_v6 = vpop.permute.xlu1 %23  }
  0x7d   :  { %14 = vst.msk [vmem:[#allocation0] sm:$0x1] %vm13_vm1, %v12_v5  }
  0x84   :  { %v18_v7 = vpop.permute.xlu0 %17  }
  0x85   :  { %20 = vst.msk [vmem:[#allocation0] sm:$0x1] %vm19_vm2, %v18_v7  }
  0x86   :  { %26 = vst.msk [vmem:[#allocation0] sm:$0x1] %vm25_vm3, %v24_v6  }
  0x8d   :  { %v29_v8 = vld [vmem:[#allocation0] sm:$0x1] }
  0x8e   :  { %32 = vst [vmem:[%s56_s1] sm:$0x1] %v29_v8 }

// kernel: downproj_block.1
= control target key start
LH: loop header
LB: loop body
LE: loop exit
PB: predicated region body
PF: predicated region fallthrough
CT: control target
= control target key end

     0   :  { %13 = vsyncpa [#allocation7], 0  ;;  %s3449_s27 = smov 0   ;;  %s4438_s0 = inlined_call_operand.vmem [shape: f32[3], index: 0, kind: input, shape index: {}]   ;;  %s4439_s1 = inlined_call_operand.vmem [shape: bf16[2,10,10,16], index: 1, kind: input, shape index: {}]   ;;  %s4440_s2 = inlined_call_operand.vmem [shape: bf16[144,4], index: 2, kind: input, shape index: {}]   ;;  %s4441_s3 = inlined_call_operand.vmem [shape: f32[1,4], index: 3, kind: input, shape index: {}]   ;;  %s4442_s4 = inlined_call_operand.vmem [shape: bf16[36,16], index: 4, kind: input, shape index: {}]   ;;  %s4443_s5 = inlined_call_operand.vmem [shape: f32[1,16], index: 5, kind: input, shape index: {}]   ;;  %s4444_s6 = inlined_call_operand.vmem [shape: bf16[144,4], index: 6, kind: input, shape index: {}]   ;;  %s4445_s7 = inlined_call_operand.vmem [shape: f32[1,4], index: 7, kind: input, shape index: {}]   ;;  %s4446_s8 = inlined_call_operand.vmem [shape: f32[2,64,4], index: 8, kind: output, shape index: {}]  }
   0x1 LB: > { %s2977_s28 = sadd.s32 4294967295, %s3387_s27   ;;  %p2979_p0 = scmp.ge.s32.totalorder %s3387_s27, 1  ;;  %s3387_s27 = sphi %s3449_s27, %s19_s27  }
   0x2   : > { %p223_p1 = scmp.lt.s32.totalorder %s3387_s27, 3  ;;  %s235_s9 = sshll.u32 %s4438_s0, 4  ;;  %s236_s9 = int_to_ptr.vmem [resolvable:$true] %s235_s9 }
   0x3   : > { %p3334_p3 = scmp.eq.s32.totalorder %s2977_s28, 0  ;;  %s3389_s10 = smov [#allocation6]  }
   0x4   : > { %p224_p2 = pnand %p2979_p0, %p223_p1 }
   0x6   : > { %p3330_p4 = pneg %p224_p2  ;;  %274 = sbr.rel (%p224_p2) target bundleno = 1087 (0x43f), region = 52 }
   0x8   : > { %p3331_p5 = pnand %p3334_p3, %p3330_p4 }
   0xa   : > { %3333 = dma.vmem_to_smem (!%p3331_p5), %s236_s9, 16, %s3389_s10, [#allocation7]  }
   0xb   : > { %3382 = dma.done.wait (%p3334_p3), [#allocation7], 16  }
   0xc   : > { %3384 = vsyncadd (%p3334_p3), [#allocation7], 4294967280 }
   0xd   : > { %281 = sfence }
   0xe   : > { %p310_p6 = scmp.lt.s32.totalorder %s2977_s28, 1  ;;  %vm534_vm0 = vcmask 1042432   ;;  %vm535_vm1 = vcmask 1046532   ;;  %vm354_vm3 = vsmask.f32 3328  ;;  %s3390_s15 = smov 32  }
   0xf   : > { %vm3468_vm2 = vmor %vm534_vm0, %vm535_vm1  ;;  %vm355_vm4 = vsmask.f32 7440  ;;  %s3391_s16 = smov 16   ;;  %s3392_s17 = smov 48   ;;  %vm329_vm6 = vcmask 125952   ;;  %vm1321_vm7 = vcmask 130048  }
  0x10   : > { %s4488_s28 = smov (!%p310_p6, %s2977_s28), 1  ;;  %vm3487_vm5 = vmor %vm354_vm3, %vm355_vm4  ;;  %s3393_s18 = smov 64   ;;  %vm493_vm8 = vcmask 257152   ;;  %vm593_vm9 = vcmask 388352   ;;  %vm643_vm10 = vcmask 519552   ;;  %vm804_vm11 = vcmask 650752  }
  0x11   : > { %s3325_s11 = smul.u32 80, %s4488_s28  ;;  %s3394_s19 = smov 96   ;;  %vm4450_vm12 = vcmask 781952   ;;  %vm4449_vm13 = vcmask 913152   ;;  %vm4448_vm14 = vcmask 1044352   ;;  %vm2208_vm15 = vcmask 123904  }
  0x12   : > { %s3395_s20 = smov 80   ;;  %s3396_s21 = smov 112   ;;  %vm4447_vm0 = vcmask 31744   ;;  %vm1420_vm1 = vcmask 25600   ;;  %vm1465_vm4 = vcmask 27648   ;;  %v3321_v25 = vld [vmem:[%s4444_s6 + $0x30] sm:$0xff] }
  0x13   : > { %s3466_s14 = scalar_lea.vmem %s4439_s1, %s3325_s11  ;;  %s3398_s30 = smov 8  }
  0x14   : > { %v502_v1 = vld [vmem:[%s3466_s14] sm:$0xe]  ;;  %v503_v2 = vld [vmem:[%s3466_s14 + $0x4] sm:$0x1]  ;;  %v504_v10 = vld [vmem:[%s3466_s14 + $0x8] sm:$0xe] }
  0x15   : > { %v338_v3 = vld [vmem:[%s3466_s14] sm:$0xf]  ;;  %v2987_v4 = vrot.slane %v502_v1, 9  ;;  %v539_v5 = vrot.slane %v503_v2, 5  ;;  %v339_v6 = vld [vmem:[%s3466_s14 + $0x4] sm:$0x1] }
  0x16   : > { %v358_v7 = vshrl.u32 %v338_v3, 16  ;;  %v361_v8 = vshll.u32 %v338_v3, 16  ;;  %v367_v9 = vshll.u32 %v339_v6, 16  ;;  %v505_v11 = vld [vmem:[%s3466_s14 + $0xc] sm:$0x1]  ;;  %v2988_v16 = vrot.slane %v504_v10, 9 }
  0x17   : > { %v540_v12 = vsel %vm3468_vm2, %v2987_v4, %v539_v5  ;;  %v340_v15 = vld [vmem:[%s3466_s14 + $0x8] sm:$0xf]  ;;  %v341_v17 = vld [vmem:[%s3466_s14 + $0xc] sm:$0x1]  ;;  %v543_v22 = vrot.slane %v505_v11, 5  ;;  %s3399_s9 = smov 4  }
  0x18   : > { %v360_v13 = vrot.slane %v358_v7, 4  ;;  %v363_v14 = vrot.slane %v361_v8, 5  ;;  %569 = vrot.lane.b32.xlu1 %v540_v12, %s3390_s15  ;;  %v372_v18 = vshrl.u32 %v340_v15, 16  ;;  %v375_v19 = vshll.u32 %v340_v15, 16  ;;  %v3005_v23 = vld [vmem:[%s3466_s14 + $0x10] sm:$0xf] }
  0x19   : > { %v369_v21 = vrot.slane %v367_v9, 5  ;;  %v3006_v24 = vld [vmem:[%s3466_s14 + $0x14] sm:$0x1]  ;;  %v381_v28 = vshll.u32 %v341_v17, 16  ;;  %v683_v29 = vshrl.u32 %v3005_v23, 16  ;;  %v686_v32 = vshll.u32 %v3005_v23, 16 }
  0x1a   : > { %v364_v20 = vor.u32 %v363_v14, %v360_v13  ;;  %v374_v26 = vrot.slane %v372_v18, 4  ;;  %v377_v27 = vrot.slane %v375_v19, 5  ;;  %v3003_v30 = vld [vmem:[%s3466_s14 + $0x8] sm:$0xf]  ;;  %v544_v38 = vsel %vm3468_vm2, %v2988_v16, %v543_v22  ;;  %v3004_v47 = vld [vmem:[%s3466_s14 + $0xc] sm:$0x1] }
  0x1b   : > { %v685_v34 = vrot.slane %v683_v29, 4  ;;  %v669_v35 = vshrl.u32 %v3003_v30, 16  ;;  %v672_v36 = vshll.u32 %v3003_v30, 16  ;;  %v688_v39 = vrot.slane %v686_v32, 5  ;;  %v2995_v46 = vld [vmem:[%s3466_s14 + $0x8] sm:$0xf] }
  0x1c   : > { %v365_v31 = vrot.slane %v364_v20, 4  ;;  %v378_v33 = vor.u32 %v377_v27, %v374_v26  ;;  %v692_v40 = vshll.u32 %v3006_v24, 16  ;;  %v383_v41 = vrot.slane %v381_v28, 5  ;;  %619 = vrot.lane.b32.xlu2 %v2995_v46, %s3392_s17  ;;  %v3053_v50 = vld [vmem:[%s3466_s14 + $0x18] sm:$0xf]  ;;  %s1392_s10 = sld [smem:[#allocation6]] }
  0x1d   : > { %v689_v43 = vor.u32 %v688_v39, %v685_v34  ;;  %v671_v44 = vrot.slane %v669_v35, 4  ;;  %v674_v45 = vrot.slane %v672_v36, 5  ;;  %v678_v53 = vshll.u32 %v3004_v47, 16  ;;  %v2996_v57 = vld [vmem:[%s3466_s14 + $0x10] sm:$0xf]  ;;  %s3400_s13 = smov 24  }
  0x1e   : > { %v370_v37 = vsel %vm3487_vm5, %v365_v31, %v369_v21  ;;  %v379_v42 = vrot.slane %v378_v33, 4  ;;  %v694_v49 = vrot.slane %v692_v40, 5  ;;  %v991_v55 = vshrl.u32 %v3053_v50, 16  ;;  %v3019_v58 = vld [vmem:[%s3466_s14 + $0x8] sm:$0xe]  ;;  %s3401_s22 = smov 20  }
  0x1f   : > { %469 = vrot.lane.b32.xlu0 %v370_v37, %s3391_s16  ;;  %v690_v48 = vrot.slane %v689_v43, 4  ;;  %v675_v52 = vor.u32 %v674_v45, %v671_v44  ;;  %v994_v56 = vshll.u32 %v3053_v50, 16  ;;  %v3020_v59 = vld [vmem:[%s3466_s14 + $0xc] sm:$0x1]  ;;  %v680_v61 = vrot.slane %v678_v53, 5  ;;  %s3402_s23 = smov 12  }
  0x20   : > { %571 = vrot.lane.b32.xlu1 %v544_v38, %s3390_s15  ;;  %v384_v51 = vsel %vm3487_vm5, %v379_v42, %v383_v41  ;;  %v3051_v62 = vld [vmem:[%s3466_s14 + $0x10] sm:$0xf]  ;;  %v993_v63 = vrot.slane %v991_v55, 4  ;;  %v3035_v2 = vrot.slane %v3019_v58, 9  ;;  %v847_v3 = vrot.slane %v3020_v59, 5  ;;  %s3403_s24 = smov 28  }
  0x21   : > { %v695_v54 = vsel %vm3487_vm5, %v690_v48, %v694_v49  ;;  %v676_v60 = vrot.slane %v675_v52, 4  ;;  %v996_v1 = vrot.slane %v994_v56, 5  ;;  %v3054_v4 = vld [vmem:[%s3466_s14 + $0x1c] sm:$0x1]  ;;  %v3021_v6 = vld [vmem:[%s3466_s14 + $0x10] sm:$0xe] }
  0x22   : > { %v3022_v7 = vld [vmem:[%s3466_s14 + $0x14] sm:$0x1]  ;;  %v977_v8 = vshrl.u32 %v3051_v62, 16  ;;  %v980_v9 = vshll.u32 %v3051_v62, 16  ;;  %v3043_v10 = vld [vmem:[%s3466_s14 + $0x10] sm:$0xf]  ;;  %v848_v13 = vsel %vm3468_vm2, %v3035_v2, %v847_v3 }
  0x23   : > { %v681_v5 = vsel %vm3487_vm5, %v676_v60, %v680_v61  ;;  %v997_v11 = vor.u32 %v996_v1, %v993_v63  ;;  %v1000_v12 = vshll.u32 %v3054_v4, 16  ;;  %v342_v14 = vld [vmem:[%s3466_s14 + $0x10] sm:$0xf]  ;;  %v3036_v15 = vrot.slane %v3021_v6, 9  ;;  %v3052_v20 = vld [vmem:[%s3466_s14 + $0x14] sm:$0x1] }
  0x24   : > { %621 = vrot.lane.b32.xlu2 %v2996_v57, %s3392_s17  ;;  %v851_v16 = vrot.slane %v3022_v7, 5  ;;  %v979_v17 = vrot.slane %v977_v8, 4  ;;  %v982_v18 = vrot.slane %v980_v9, 5  ;;  %v386_v19 = vshrl.u32 %v342_v14, 16  ;;  %v344_v21 = vld [vmem:[%s3466_s14 + $0x18] sm:$0xf] }
  0x25   : > { %v389_v22 = vshll.u32 %v342_v14, 16  ;;  %v998_v23 = vrot.slane %v997_v11, 4  ;;  %v1002_v24 = vrot.slane %v1000_v12, 5  ;;  %v343_v28 = vld [vmem:[%s3466_s14 + $0x14] sm:$0x1]  ;;  %v986_v31 = vshll.u32 %v3052_v20, 16 }
  0x26   : > { %v388_v26 = vrot.slane %v386_v19, 4  ;;  %v852_v27 = vsel %vm3468_vm2, %v3036_v15, %v851_v16  ;;  %v983_v30 = vor.u32 %v982_v18, %v979_v17  ;;  %v400_v32 = vshrl.u32 %v344_v21, 16  ;;  %v3044_v35 = vld [vmem:[%s3466_s14 + $0x18] sm:$0xf]  ;;  %v506_v38 = vld [vmem:[%s3466_s14 + $0x10] sm:$0xe] }
  0x27   : > { %471 = vrot.lane.b32.xlu0 %v384_v51, %s3391_s16  ;;  %v391_v29 = vrot.slane %v389_v22, 5  ;;  %v403_v33 = vshll.u32 %v344_v21, 16  ;;  %v1003_v34 = vsel %vm3487_vm5, %v998_v23, %v1002_v24  ;;  %v395_v37 = vshll.u32 %v343_v28, 16  ;;  %v507_v39 = vld [vmem:[%s3466_s14 + $0x14] sm:$0x1] }
  0x28   : > { %782 = vrot.lane.b32.xlu1 %v695_v54, %s3393_s18  ;;  %v984_v40 = vrot.slane %v983_v30, 4  ;;  %v988_v41 = vrot.slane %v986_v31, 5  ;;  %v402_v42 = vrot.slane %v400_v32, 4  ;;  %v345_v44 = vld [vmem:[%s3466_s14 + $0x1c] sm:$0x1]  ;;  %v2989_v45 = vrot.slane %v506_v38, 9 }
  0x29   : > { %v392_v36 = vor.u32 %v391_v29, %v388_v26  ;;  %v405_v43 = vrot.slane %v403_v33, 5  ;;  %v547_v46 = vrot.slane %v507_v39, 5  ;;  %v397_v48 = vrot.slane %v395_v37, 5  ;;  %v3007_v54 = vld [vmem:[%s3466_s14 + $0x18] sm:$0xf] }
  0x2a   : > { %v989_v49 = vsel %vm3487_vm5, %v984_v40, %v988_v41  ;;  %v409_v51 = vshll.u32 %v345_v44, 16  ;;  %v508_v55 = vld [vmem:[%s3466_s14 + $0x18] sm:$0xe]  ;;  %v509_v56 = vld [vmem:[%s3466_s14 + $0x1c] sm:$0x1]  ;;  %v697_v59 = vshrl.u32 %v3007_v54, 16 }
  0x2b   : > { %v393_v47 = vrot.slane %v392_v36, 4  ;;  %v406_v50 = vor.u32 %v405_v43, %v402_v42  ;;  %v548_v52 = vsel %vm3468_vm2, %v2989_v45, %v547_v46  ;;  %v3009_v60 = vld [vmem:[%s3466_s14 + $0x20] sm:$0xf]  ;;  %v700_v61 = vshll.u32 %v3007_v54, 16  ;;  %v3008_v2 = vld [vmem:[%s3466_s14 + $0x1c] sm:$0x1] }
  0x2c   : > { %877 = vrot.lane.b32.xlu2 %v848_v13, %s3395_s20  ;;  %v411_v58 = vrot.slane %v409_v51, 5  ;;  %v2990_v62 = vrot.slane %v508_v55, 9  ;;  %v551_v63 = vrot.slane %v509_v56, 5  ;;  %v699_v1 = vrot.slane %v697_v59, 4  ;;  %v2998_v7 = vld [vmem:[%s3466_s14 + $0x20] sm:$0xf] }
  0x2d   : > { %v398_v53 = vsel %vm3487_vm5, %v393_v47, %v397_v48  ;;  %v407_v57 = vrot.slane %v406_v50, 4  ;;  %v702_v3 = vrot.slane %v700_v61, 5  ;;  %v714_v6 = vshll.u32 %v3009_v60, 16  ;;  %v3023_v11 = vld [vmem:[%s3466_s14 + $0x18] sm:$0xe] }
  0x2e   : > { %v552_v8 = vsel %vm3468_vm2, %v2990_v62, %v551_v63  ;;  %v3024_v12 = vld [vmem:[%s3466_s14 + $0x1c] sm:$0x1]  ;;  %v3010_v15 = vld [vmem:[%s3466_s14 + $0x24] sm:$0x1]  ;;  %v3037_v16 = vrot.slane %v3023_v11, 9 }
  0x2f   : > { %780 = vrot.lane.b32.xlu0 %v681_v5, %s3393_s18  ;;  %v412_v4 = vsel %vm3487_vm5, %v407_v57, %v411_v58  ;;  %v711_v5 = vshrl.u32 %v3009_v60, 16  ;;  %v703_v9 = vor.u32 %v702_v3, %v699_v1  ;;  %v716_v14 = vrot.slane %v714_v6, 5  ;;  %v346_v18 = vld [vmem:[%s3466_s14 + $0x20] sm:$0xf]  ;;  %v2997_v21 = vld [vmem:[%s3466_s14 + $0x18] sm:$0xf] }
  0x30   : > { %927 = vrot.lane.b32.xlu1 %v3043_v10, %s3394_s19  ;;  %v706_v10 = vshll.u32 %v3008_v2, 16  ;;  %v855_v17 = vrot.slane %v3024_v12, 5  ;;  %v720_v23 = vshll.u32 %v3010_v15, 16  ;;  %v414_v24 = vshrl.u32 %v346_v18, 16  ;;  %v3055_v29 = vld [vmem:[%s3466_s14 + $0x20] sm:$0xf] }
  0x31   : > { %v713_v13 = vrot.slane %v711_v5, 4  ;;  %v704_v19 = vrot.slane %v703_v9, 4  ;;  %v417_v26 = vshll.u32 %v346_v18, 16  ;;  %v3025_v30 = vld [vmem:[%s3466_s14 + $0x20] sm:$0xe]  ;;  %v1005_v32 = vshrl.u32 %v3055_v29, 16 }
  0x32   : > { %v708_v20 = vrot.slane %v706_v10, 5  ;;  %v3026_v31 = vld [vmem:[%s3466_s14 + $0x24] sm:$0x1]  ;;  %v3057_v36 = vld [vmem:[%s3466_s14 + $0x28] sm:$0xf]  ;;  %v416_v37 = vrot.slane %v414_v24, 4 }
  0x33   : > { %v717_v22 = vor.u32 %v716_v14, %v713_v13  ;;  %v419_v38 = vrot.slane %v417_v26, 5  ;;  %v347_v39 = vld [vmem:[%s3466_s14 + $0x24] sm:$0x1]  ;;  %v3038_v40 = vrot.slane %v3025_v30, 9  ;;  %v859_v41 = vrot.slane %v3026_v31, 5 }
  0x34   : > { %929 = vrot.lane.b32.xlu2 %v3044_v35, %s3394_s19  ;;  %v709_v28 = vsel %vm3487_vm5, %v704_v19, %v708_v20  ;;  %v1008_v35 = vshll.u32 %v3055_v29, 16  ;;  %v1007_v42 = vrot.slane %v1005_v32, 4  ;;  %v3056_v44 = vld [vmem:[%s3466_s14 + $0x24] sm:$0x1]  ;;  %v1019_v46 = vshrl.u32 %v3057_v36, 16 }
  0x35   : > { %v718_v33 = vrot.slane %v717_v22, 4  ;;  %v1022_v47 = vshll.u32 %v3057_v36, 16  ;;  %v420_v48 = vor.u32 %v419_v38, %v416_v37  ;;  %v3046_v50 = vld [vmem:[%s3466_s14 + $0x28] sm:$0xf]  ;;  %v860_v51 = vsel %vm3468_vm2, %v3038_v40, %v859_v41  ;;  %v3058_v59 = vld [vmem:[%s3466_s14 + $0x2c] sm:$0x1] }
  0x36   : > { %v1010_v43 = vrot.slane %v1008_v35, 5  ;;  %v348_v54 = vld [vmem:[%s3466_s14 + $0x28] sm:$0xf]  ;;  %v1021_v57 = vrot.slane %v1019_v46, 4  ;;  %v3045_v5 = vld [vmem:[%s3466_s14 + $0x20] sm:$0xf] }
  0x37   : > { %879 = vrot.lane.b32.xlu0 %v852_v27, %s3395_s20  ;;  %v856_v27 = vsel %vm3468_vm2, %v3037_v16, %v855_v17  ;;  %v428_v55 = vshrl.u32 %v348_v54, 16  ;;  %v431_v56 = vshll.u32 %v348_v54, 16  ;;  %v1024_v58 = vrot.slane %v1022_v47, 5  ;;  %v3011_v62 = vld [vmem:[%s3466_s14 + $0x28] sm:$0xf] }
  0x38   : > { %1090 = vrot.lane.b32.xlu1 %v1003_v34, %s3396_s21  ;;  %v722_v34 = vrot.slane %v720_v23, 5  ;;  %v421_v60 = vrot.slane %v420_v48, 4  ;;  %v725_v9 = vshrl.u32 %v3011_v62, 16  ;;  %v512_v10 = vld [vmem:[%s3466_s14 + $0x28] sm:$0xe]  ;;  %v728_v12 = vshll.u32 %v3011_v62, 16 }
  0x39   : > { %v430_v2 = vrot.slane %v428_v55, 4  ;;  %v433_v3 = vrot.slane %v431_v56, 5  ;;  %v1025_v6 = vor.u32 %v1024_v58, %v1021_v57  ;;  %v513_v11 = vld [vmem:[%s3466_s14 + $0x2c] sm:$0x1]  ;;  %v2992_v18 = vrot.slane %v512_v10, 9 }
  0x3a   : > { %v723_v45 = vsel %vm3487_vm5, %v718_v33, %v722_v34  ;;  %v559_v19 = vrot.slane %v513_v11, 5  ;;  %v727_v20 = vrot.slane %v725_v9, 4  ;;  %v3012_v24 = vld [vmem:[%s3466_s14 + $0x2c] sm:$0x1]  ;;  %v3013_v33 = vld [vmem:[%s3466_s14 + $0x30] sm:$0xf] }
  0x3b   : > { %v434_v14 = vor.u32 %v433_v3, %v430_v2  ;;  %v1026_v16 = vrot.slane %v1025_v6, 4  ;;  %v734_v31 = vshll.u32 %v3012_v24, 16  ;;  %v739_v34 = vshrl.u32 %v3013_v33, 16  ;;  %v3059_v40 = vld [vmem:[%s3466_s14 + $0x30] sm:$0xf] }
  0x3c   : > { %473 = vrot.lane.b32.xlu2 %v398_v53, %s3391_s16  ;;  %v1014_v53 = vshll.u32 %v3056_v44, 16  ;;  %v560_v29 = vsel %vm3468_vm2, %v2992_v18, %v559_v19  ;;  %v742_v35 = vshll.u32 %v3013_v33, 16  ;;  %v1036_v46 = vshll.u32 %v3059_v40, 16  ;;  %v2999_v48 = vld [vmem:[%s3466_s14 + $0x28] sm:$0xf] }
  0x3d   : > { %v435_v22 = vrot.slane %v434_v14, 4  ;;  %v741_v41 = vrot.slane %v739_v34, 4  ;;  %v3060_v58 = vld [vmem:[%s3466_s14 + $0x34] sm:$0x1]  ;;  %v3000_v62 = vld [vmem:[%s3466_s14 + $0x30] sm:$0xf] }
  0x3e   : > { %v1016_v1 = vrot.slane %v1014_v53, 5  ;;  %v321_v53 = vld [vmem:[%s3466_s14] sm:$0xf]  ;;  %v1038_v55 = vrot.slane %v1036_v46, 5  ;;  %v1042_v3 = vshll.u32 %v3060_v58, 16 }
  0x3f   : > { %1088 = vrot.lane.b32.xlu0 %v989_v49, %s3396_s21  ;;  %v423_v49 = vshll.u32 %v347_v39, 16  ;;  %v736_v39 = vrot.slane %v734_v31, 5  ;;  %330 = vst.msk [vmem:[#allocation2] sm:$0xf] %vm329_vm6, %v321_v53  ;;  %v3061_v9 = vld [vmem:[%s3466_s14 + $0x38] sm:$0xf] }
  0x40   : > { %573 = vrot.lane.b32.xlu1 %v548_v52, %s3390_s15  ;;  %v1011_v52 = vor.u32 %v1010_v43, %v1007_v42  ;;  %v744_v42 = vrot.slane %v742_v35, 5  ;;  %v3014_v43 = vld [vmem:[%s3466_s14 + $0x34] sm:$0x1]  ;;  %v1047_v10 = vshrl.u32 %v3061_v9, 16  ;;  %v1050_v11 = vshll.u32 %v3061_v9, 16  ;;  %v3296_v53 = vld [vmem:[%s4440_s2 + $0x20] sm:$0xff] }
  0x41   : > { %v425_v61 = vrot.slane %v423_v49, 5  ;;  %v322_v14 = vld [vmem:[%s3466_s14 + $0x8] sm:$0xf]  ;;  %v3298_v35 = vld [vmem:[%s4440_s2 + $0x30] sm:$0xff]  ;;  %v3015_v58 = vld [vmem:[%s3466_s14 + $0x38] sm:$0xf] }
  0x42   : > { %v1012_v63 = vrot.slane %v1011_v52, 4  ;;  %v745_v49 = vor.u32 %v744_v42, %v741_v41  ;;  %v3030_v52 = vld [vmem:[%s3466_s14 + $0x34] sm:$0x1]  ;;  %331 = vst.msk [vmem:[#allocation2 + $0x8] sm:$0xf] %vm329_vm6, %v322_v14 }
  0x43   : > { %v867_v57 = vrot.slane %v3030_v52, 5  ;;  %v3294_v9 = vld [vmem:[%s4440_s2 + $0x10] sm:$0xff] }
  0x44   : > { %575 = vrot.lane.b32.xlu2 %v552_v8, %s3390_s15  ;;  %v426_v8 = vsel %vm3487_vm5, %v421_v60, %v425_v61  ;;  %v1017_v13 = vsel %vm3487_vm5, %v1012_v63, %v1016_v1  ;;  %v352_v61 = vld [vmem:[%s3466_s14 + $0x38] sm:$0xf]  ;;  %v3027_v63 = vld [vmem:[%s3466_s14 + $0x28] sm:$0xe]  ;;  %v3028_v1 = vld [vmem:[%s3466_s14 + $0x2c] sm:$0x1] }
  0x45   : > { %v456_v6 = vshrl.u32 %v352_v61, 16 }
  0x47   : > { %475 = vrot.lane.b32.xlu0 %v412_v4, %s3391_s16  ;;  %v349_v4 = vld [vmem:[%s3466_s14 + $0x2c] sm:$0x1]  ;;  %v458_v18 = vrot.slane %v456_v6, 4 }
  0x48   : > { %625 = vrot.lane.b32.xlu1 %v2998_v7, %s3392_s17  ;;  %v1028_v7 = vshll.u32 %v3058_v59, 16  ;;  %v437_v15 = vshll.u32 %v349_v4, 16  ;;  %v746_v59 = vrot.slane %v745_v49, 4 }
  0x4a   : > { %v1030_v17 = vrot.slane %v1028_v7, 5  ;;  %v439_v23 = vrot.slane %v437_v15, 5  ;;  %v459_v7 = vshll.u32 %v352_v61, 16 }
  0x4c   : > { %784 = vrot.lane.b32.xlu2 %v709_v28, %s3393_s18  ;;  %v1031_v26 = vsel %vm3487_vm5, %v1026_v16, %v1030_v17  ;;  %v511_v28 = vld [vmem:[%s3466_s14 + $0x24] sm:$0x1]  ;;  %v440_v32 = vsel %vm3487_vm5, %v435_v22, %v439_v23  ;;  %v1044_v16 = vrot.slane %v1042_v3, 5  ;;  %v461_v19 = vrot.slane %v459_v7, 5  ;;  %v353_v23 = vld [vmem:[%s3466_s14 + $0x3c] sm:$0x1] }
  0x4d   : > { %v555_v37 = vrot.slane %v511_v28, 5  ;;  %v465_v31 = vshll.u32 %v353_v23, 16  ;;  %v756_v3 = vshll.u32 %v3015_v58, 16  ;;  %v3397_v7 = vmov 0.0  }
  0x4e   : > { %2207 = vst.msk [vmem:[#allocation5] sm:$0xff] %vm1321_vm7, %v3397_v7 }
  0x4f   : > { %623 = vrot.lane.b32.xlu0 %v2997_v21, %s3392_s17  ;;  %v730_v21 = vrot.slane %v728_v12, 5  ;;  %v3039_v12 = vrot.slane %v3027_v63, 9  ;;  %v3295_v63 = vld [vmem:[%s4440_s2 + $0x18] sm:$0xff]  ;;  %2210 = vst.msk [vmem:[#allocation5 + $0x10] sm:$0xff] %vm1321_vm7, %v3397_v7  ;;  %v758_v14 = vrot.slane %v756_v3, 5 }
  0x50   : > { %881 = vrot.lane.b32.xlu1 %v856_v27, %s3395_s20  ;;  %v510_v27 = vld [vmem:[%s3466_s14 + $0x20] sm:$0xe]  ;;  %2212 = vst.msk [vmem:[#allocation5 + $0x20] sm:$0xff] %vm1321_vm7, %v3397_v7 }
  0x51   : > { %v731_v30 = vor.u32 %v730_v21, %v727_v20  ;;  %v2991_v36 = vrot.slane %v510_v27, 9  ;;  %v1049_v20 = vrot.slane %v1047_v10, 4  ;;  %v1052_v21 = vrot.slane %v1050_v11, 5  ;;  %v3062_v27 = vld [vmem:[%s3466_s14 + $0x3c] sm:$0x1]  ;;  %2214 = vst.msk [vmem:[#allocation5 + $0x30] sm:$0xff] %vm1321_vm7, %v3397_v7 }
  0x52   : > { %v1056_v34 = vshll.u32 %v3062_v27, 16  ;;  %2216 = vst.msk [vmem:[#allocation5 + $0x40] sm:$0xff] %vm1321_vm7, %v3397_v7 }
  0x53   : > { %v732_v38 = vrot.slane %v731_v30, 4  ;;  %v556_v44 = vsel %vm3468_vm2, %v2991_v36, %v555_v37  ;;  %v462_v30 = vor.u32 %v461_v19, %v458_v18  ;;  %v1053_v33 = vor.u32 %v1052_v21, %v1049_v20  ;;  %v3065_v18 = vld [vmem:[%s3466_s14 + $0x48] sm:$0xf]  ;;  %v514_v19 = vld [vmem:[%s3466_s14 + $0x30] sm:$0xe]  ;;  %2218 = vst.msk [vmem:[#allocation5 + $0x50] sm:$0xff] %vm1321_vm7, %v3397_v7 }
  0x54   : > { %883 = vrot.lane.b32.xlu2 %v860_v51, %s3395_s20  ;;  %v3029_v51 = vld [vmem:[%s3466_s14 + $0x30] sm:$0xe]  ;;  %v1058_v42 = vrot.slane %v1056_v34, 5  ;;  %v515_v20 = vld [vmem:[%s3466_s14 + $0x34] sm:$0x1]  ;;  %2220 = vst.msk [vmem:[#allocation5 + $0x60] sm:$0xff] %vm1321_vm7, %v3397_v7 }
  0x55   : > { %v737_v47 = vsel %vm3487_vm5, %v732_v38, %v736_v39  ;;  %v3040_v56 = vrot.slane %v3029_v51, 9  ;;  %v351_v38 = vld [vmem:[%s3466_s14 + $0x34] sm:$0x1]  ;;  %v463_v39 = vrot.slane %v462_v30, 4  ;;  %v1054_v41 = vrot.slane %v1053_v33, 4  ;;  %2222 = vst.msk [vmem:[#allocation5 + $0x70] sm:$0xff] %vm1321_vm7, %v3397_v7 }
  0x56   : > { %v563_v27 = vrot.slane %v515_v20, 5  ;;  %v1078_v33 = vshll.u32 %v3065_v18, 16  ;;  %2224 = vst.msk [vmem:[#allocation5 + $0x80] sm:$0xff] %vm1321_vm7, %v3397_v7 }
  0x57   : > { %786 = vrot.lane.b32.xlu0 %v723_v45, %s3393_s18  ;;  %v1033_v45 = vshrl.u32 %v3059_v40, 16  ;;  %v868_v4 = vsel %vm3468_vm2, %v3040_v56, %v867_v57  ;;  %v467_v40 = vrot.slane %v465_v31, 5  ;;  %v1059_v52 = vsel %vm3487_vm5, %v1054_v41, %v1058_v42  ;;  %2226 = vst.msk [vmem:[#allocation5 + $0x90] sm:$0xff] %vm1321_vm7, %v3397_v7  ;;  %v3066_v42 = vld [vmem:[%s3466_s14 + $0x4c] sm:$0x1] }
  0x58   : > { %933 = vrot.lane.b32.xlu1 %v3046_v50, %s3394_s19  ;;  %v748_v50 = vshll.u32 %v3014_v43, 16  ;;  %v3017_v43 = vld [vmem:[%s3466_s14 + $0x40] sm:$0xf]  ;;  %v1075_v31 = vshrl.u32 %v3065_v18, 16  ;;  %2227 = vst.msk [vmem:[#allocation5 + $0x98] sm:$0x3] %vm2208_vm15, %v3397_v7 }
  0x59   : > { %v1035_v54 = vrot.slane %v1033_v45, 4  ;;  %v451_v45 = vshll.u32 %v351_v38, 16  ;;  %v767_v49 = vshrl.u32 %v3017_v43, 16  ;;  %v468_v51 = vsel %vm3487_vm5, %v463_v39, %v467_v40  ;;  %v3063_v40 = vld [vmem:[%s3466_s14 + $0x40] sm:$0xf]  ;;  %1422 = vst.msk [vmem:[#allocation3 + $0x10] sm:$0xff] %vm4447_vm0, %v3397_v7 }
  0x5a   : > { %v750_v60 = vrot.slane %v748_v50, 5  ;;  %v770_v50 = vshll.u32 %v3017_v43, 16  ;;  %v1077_v39 = vrot.slane %v1075_v31, 4  ;;  %v1080_v43 = vrot.slane %v1078_v33, 5  ;;  %2209 = vst.msk [vmem:[#allocation5 + $0x8] sm:$0x3] %vm2208_vm15, %v3397_v7 }
  0x5b   : > { %v1039_v2 = vor.u32 %v1038_v55, %v1035_v54  ;;  %v453_v55 = vrot.slane %v451_v45, 5  ;;  %v769_v56 = vrot.slane %v767_v49, 4  ;;  %v3033_v45 = vld [vmem:[%s3466_s14 + $0x40] sm:$0xe]  ;;  %2211 = vst.msk [vmem:[#allocation5 + $0x18] sm:$0x3] %vm2208_vm15, %v3397_v7 }
  0x5c   : > { %1092 = vrot.lane.b32.xlu2 %v1017_v13, %s3396_s21  ;;  %v863_v13 = vrot.slane %v3028_v1, 5  ;;  %v772_v57 = vrot.slane %v770_v50, 5  ;;  %v516_v1 = vld [vmem:[%s3466_s14 + $0x38] sm:$0xe]  ;;  %v3042_v3 = vrot.slane %v3033_v45, 9  ;;  %1419 = vst.msk [vmem:[#allocation3] sm:$0xff] %vm4447_vm0, %v3397_v7 }
  0x5d   : > { %v1040_v15 = vrot.slane %v1039_v2, 4  ;;  %v753_v2 = vshrl.u32 %v3015_v58, 16  ;;  %v2994_v10 = vrot.slane %v516_v1, 9  ;;  %v3002_v58 = vld [vmem:[%s3466_s14 + $0x40] sm:$0xf]  ;;  %1424 = vst.msk [vmem:[#allocation3 + $0x20] sm:$0xff] %vm4447_vm0, %v3397_v7 }
  0x5e   : > { %v864_v28 = vsel %vm3468_vm2, %v3039_v12, %v863_v13  ;;  %v3016_v12 = vld [vmem:[%s3466_s14 + $0x3c] sm:$0x1]  ;;  %2213 = vst.msk [vmem:[#allocation5 + $0x28] sm:$0x3] %vm2208_vm15, %v3397_v7 }
  0x5f   : > { %931 = vrot.lane.b32.xlu0 %v3045_v5, %s3394_s19  ;;  %v751_v5 = vsel %vm3487_vm5, %v746_v59, %v750_v60  ;;  %v3018_v59 = vld [vmem:[%s3466_s14 + $0x44] sm:$0x1]  ;;  %v755_v13 = vrot.slane %v753_v2, 4  ;;  %v762_v30 = vshll.u32 %v3016_v12, 16  ;;  %2215 = vst.msk [vmem:[#allocation5 + $0x38] sm:$0x3] %vm2208_vm15, %v3397_v7 }
  0x60   : > { %477 = vrot.lane.b32.xlu1 %v426_v8, %s3391_s16  ;;  %v350_v8 = vld [vmem:[%s3466_s14 + $0x30] sm:$0xf]  ;;  %v776_v6 = vshll.u32 %v3018_v59, 16  ;;  %v3049_v59 = vld [vmem:[%s3466_s14 + $0x40] sm:$0xf]  ;;  %1426 = vst.msk [vmem:[#allocation3 + $0x30] sm:$0xff] %vm4447_vm0, %v3397_v7 }
  0x61   : > { %v442_v17 = vshrl.u32 %v350_v8, 16  ;;  %v445_v24 = vshll.u32 %v350_v8, 16  ;;  %v3001_v8 = vld [vmem:[%s3466_s14 + $0x38] sm:$0xf]  ;;  %v764_v38 = vrot.slane %v762_v30, 5  ;;  %1428 = vst.msk [vmem:[#allocation3 + $0x40] sm:$0xff] %vm4447_vm0, %v3397_v7 }
  0x62   : > { %2217 = vst.msk [vmem:[#allocation5 + $0x48] sm:$0x3] %vm2208_vm15, %v3397_v7 }
  0x63   : > { %v444_v36 = vrot.slane %v442_v17, 4  ;;  %v447_v37 = vrot.slane %v445_v24, 5  ;;  %v778_v17 = vrot.slane %v776_v6, 5  ;;  %v3293_v24 = vld [vmem:[%s4440_s2 + $0x8] sm:$0xff]  ;;  %2219 = vst.msk [vmem:[#allocation5 + $0x58] sm:$0x3] %vm2208_vm15, %v3397_v7 }
  0x64   : > { %479 = vrot.lane.b32.xlu2 %v440_v32, %s3391_s16  ;;  %v3047_v32 = vld [vmem:[%s3466_s14 + $0x30] sm:$0xf]  ;;  %2221 = vst.msk [vmem:[#allocation5 + $0x68] sm:$0x3] %vm2208_vm15, %v3397_v7 }
  0x65   : > { %2223 = vst.msk [vmem:[#allocation5 + $0x78] sm:$0x3] %vm2208_vm15, %v3397_v7 }
  0x66   : > { %2225 = vst.msk [vmem:[#allocation5 + $0x88] sm:$0x3] %vm2208_vm15, %v3397_v7 }
  0x67   : > { %1094 = vrot.lane.b32.xlu0 %v1031_v26, %s3396_s21  ;;  %v3299_v26 = vld [vmem:[%s4440_s2 + $0x38] sm:$0xff]  ;;  %1423 = vst.msk [vmem:[#allocation3 + $0x18] sm:$0x3] %vm1420_vm1, %v3397_v7 }
  0x68   : > { %579 = vrot.lane.b32.xlu1 %v560_v29, %s3390_s15  ;;  %v1045_v29 = vsel %vm3487_vm5, %v1040_v15, %v1044_v16  ;;  %1334 = vmatpush.bf16.msra.mxu0 %v3299_v26  ;;  %v2993_v26 = vrot.slane %v514_v19, 9  ;;  %1421 = vst.msk [vmem:[#allocation3 + $0x8] sm:$0x3] %vm1420_vm1, %v3397_v7 }
  0x69   : > { %1425 = vst.msk [vmem:[#allocation3 + $0x28] sm:$0x3] %vm1420_vm1, %v3397_v7 }
  0x6a   : > { %1427 = vst.msk [vmem:[#allocation3 + $0x38] sm:$0x3] %vm1420_vm1, %v3397_v7 }
  0x6b   : > { %1429 = vst.msk [vmem:[#allocation3 + $0x48] sm:$0x3] %vm1420_vm1, %v3397_v7 }
  0x6c   : > { %627 = vrot.lane.b32.xlu2 %v2999_v48, %s3392_s17  ;;  %1335 = vmatpush.bf16.msra.mxu0 %v3298_v35  ;;  %v3048_v48 = vld [vmem:[%s3466_s14 + $0x38] sm:$0xf]  ;;  %v3067_v35 = vld [vmem:[%s3466_s14 + $0x10] sm:$0xe]  ;;  %1430 = vst.msk [vmem:[#allocation3 + $0x50] sm:$0xff] %vm4447_vm0, %v3397_v7 }
  0x6d   : > { %v3083_v49 = vrot.slane %v3067_v35, 9  ;;  %1431 = vst.msk [vmem:[#allocation3 + $0x58] sm:$0x3] %vm1420_vm1, %v3397_v7 }
  0x6e   : > { %1432 = vst.msk [vmem:[#allocation3 + $0x60] sm:$0xff] %vm4447_vm0, %v3397_v7 }
  0x6f   : > { %577 = vrot.lane.b32.xlu0 %v556_v44, %s3390_s15  ;;  %v448_v44 = vor.u32 %v447_v37, %v444_v36  ;;  %v3068_v36 = vld [vmem:[%s3466_s14 + $0x14] sm:$0x1]  ;;  %1433 = vst.msk [vmem:[#allocation3 + $0x68] sm:$0x3] %vm1420_vm1, %v3397_v7 }
  0x70   : > { %788 = vrot.lane.b32.xlu1 %v737_v47, %s3393_s18  ;;  %v3297_v47 = vld [vmem:[%s4440_s2 + $0x28] sm:$0xff]  ;;  %v1155_v50 = vrot.slane %v3068_v36, 5  ;;  %v3071_v36 = vld [vmem:[%s3466_s14 + $0x20] sm:$0xe]  ;;  %1434 = vst.msk [vmem:[#allocation3 + $0x70] sm:$0xff] %vm4447_vm0, %v3397_v7 }
  0x71   : > { %1336 = vmatpush.bf16.msra.mxu0 %v3297_v47  ;;  %v449_v54 = vrot.slane %v448_v44, 4  ;;  %v3069_v44 = vld [vmem:[%s3466_s14 + $0x18] sm:$0xe]  ;;  %v3034_v47 = vld [vmem:[%s3466_s14 + $0x44] sm:$0x1]  ;;  %1436 = vst.msk [vmem:[#allocation3 + $0x80] sm:$0xff] %vm4447_vm0, %v3397_v7 }
  0x72   : > { %v3084_v1 = vrot.slane %v3069_v44, 9  ;;  %1435 = vst.msk [vmem:[#allocation3 + $0x78] sm:$0x3] %vm1420_vm1, %v3397_v7 }
  0x73   : > { %v454_v61 = vsel %vm3487_vm5, %v449_v54, %v453_v55  ;;  %v3070_v54 = vld [vmem:[%s3466_s14 + $0x1c] sm:$0x1]  ;;  %1437 = vst.msk [vmem:[#allocation3 + $0x88] sm:$0x3] %vm1420_vm1, %v3397_v7 }
  0x74   : > { %790 = vrot.lane.b32.xlu2 %v751_v5, %s3393_s18  ;;  %v773_v5 = vor.u32 %v772_v57, %v769_v56  ;;  %v1061_v56 = vshrl.u32 %v3063_v40, 16  ;;  %v1064_v57 = vshll.u32 %v3063_v40, 16  ;;  %v1159_v2 = vrot.slane %v3070_v54, 5  ;;  %1438 = vst.msk [vmem:[#allocation3 + $0x90] sm:$0xff] %vm4447_vm0, %v3397_v7 }
  0x75   : > { %1337 = vmatpush.bf16.msra.mxu0 %v3296_v53  ;;  %v323_v53 = vld [vmem:[%s3466_s14 + $0x10] sm:$0xf]  ;;  %1439 = vst.msk [vmem:[#allocation3 + $0x98] sm:$0x3] %vm1420_vm1, %v3397_v7 }
  0x76   : > { %v3644_v22 = vpop.permute.xlu2 %619  ;;  %v774_v16 = vrot.slane %v773_v5, 4  ;;  %332 = vst.msk [vmem:[#allocation2 + $0x10] sm:$0xf] %vm329_vm6, %v323_v53  ;;  %v1063_v5 = vrot.slane %v1061_v56, 4  ;;  %v1066_v6 = vrot.slane %v1064_v57, 5  ;;  %v1160_v12 = vsel %vm3468_vm2, %v3084_v1, %v1159_v2 }
  0x77   : > { %629 = vrot.lane.b32.xlu0 %v3000_v62, %s3392_s17  ;;  %1194 = vst.msk [vmem:[#allocation2 + $0xc] sm:$0xf] %vm329_vm6, %v1160_v12  ;;  %v325_v56 = vld [vmem:[%s3466_s14 + $0x20] sm:$0xf]  ;;  %v326_v57 = vld [vmem:[%s3466_s14 + $0x28] sm:$0xf] }
  0x78   : > { %887 = vrot.lane.b32.xlu1 %v868_v4, %s3395_s20  ;;  %v517_v4 = vld [vmem:[%s3466_s14 + $0x3c] sm:$0x1]  ;;  %v779_v34 = vsel %vm3487_vm5, %v774_v16, %v778_v17  ;;  %v3031_v16 = vld [vmem:[%s3466_s14 + $0x38] sm:$0xe]  ;;  %v1067_v18 = vor.u32 %v1066_v6, %v1063_v5  ;;  %334 = vst.msk [vmem:[#allocation2 + $0x20] sm:$0xf] %vm329_vm6, %v325_v56 }
  0x79   : > { %1338 = vmatpush.bf16.msra.mxu0 %v3295_v63  ;;  %v567_v11 = vrot.slane %v517_v4, 5  ;;  %v1084_v63 = vshll.u32 %v3066_v42, 16  ;;  %v875_v4 = vrot.slane %v3034_v47, 5  ;;  %v3032_v17 = vld [vmem:[%s3466_s14 + $0x3c] sm:$0x1]  ;;  %v3041_v20 = vrot.slane %v3031_v16, 9 }
  0x7a   : > { %335 = vst.msk [vmem:[#allocation2 + $0x28] sm:$0xf] %vm329_vm6, %v326_v57  ;;  %v3075_v6 = vld [vmem:[%s3466_s14 + $0x30] sm:$0xe] }
  0x7c   : > { %935 = vrot.lane.b32.xlu2 %v3047_v32, %s3394_s19  ;;  %v564_v32 = vsel %vm3468_vm2, %v2993_v26, %v563_v27  ;;  %v1068_v26 = vrot.slane %v1067_v18, 4 }
  0x7d   : > { %1339 = vmatpush.bf16.msra.mxu0 %v3294_v9  ;;  %v3064_v9 = vld [vmem:[%s3466_s14 + $0x44] sm:$0x1] }
  0x7e   : > { %v3664_v46 = vpop.permute.xlu2 %621  ;;  %v1070_v19 = vshll.u32 %v3064_v9, 16  ;;  %v3095_v33 = vld [vmem:[#allocation2 + $0x8] sm:$0xf0]  ;;  %v3077_v9 = vld [vmem:[%s3466_s14 + $0x38] sm:$0xe] }
  0x7f   : > { %885 = vrot.lane.b32.xlu0 %v864_v28, %s3395_s20  ;;  %v568_v28 = vsel %vm3468_vm2, %v2994_v10, %v567_v11  ;;  %v1086_v11 = vrot.slane %v1084_v63, 5 }
  0x80   : > { %1096 = vrot.lane.b32.xlu1 %v1045_v29, %s3396_s21  ;;  %v759_v29 = vor.u32 %v758_v14, %v755_v13  ;;  %v876_v14 = vsel %vm3468_vm2, %v3042_v3, %v875_v4  ;;  %v1072_v27 = vrot.slane %v1070_v19, 5 }
  0x81   : > { %1340 = vmatpush.bf16.msra.mxu0 %v3293_v24 }
  0x82   : > { %v760_v37 = vrot.slane %v759_v29, 4 }
  0x84   : > { %1098 = vrot.lane.b32.xlu2 %v1059_v52, %s3396_s21  ;;  %v765_v55 = vsel %vm3487_vm5, %v760_v37, %v764_v38  ;;  %v3073_v37 = vld [vmem:[%s3466_s14 + $0x28] sm:$0xe]  ;;  %v3074_v38 = vld [vmem:[%s3466_s14 + $0x2c] sm:$0x1] }
  0x85   : > { %v3086_v44 = vrot.slane %v3073_v37, 9  ;;  %v1167_v45 = vrot.slane %v3074_v38, 5 }
  0x86   : > { %v3684_v62 = vpop.permute.xlu2 %877 }
  0x87   : > { %937 = vrot.lane.b32.xlu0 %v3048_v48, %s3394_s19  ;;  %v3300_v48 = vld [vmem:[%s4440_s2 + $0x40] sm:$0xff] }
  0x88   : > { %483 = vrot.lane.b32.xlu1 %v468_v51, %s3391_s16  ;;  %1370 = vmatpush.bf16.msra.mxu1 %v3300_v48 }
  0x89   : > { %3324 = vmatpush.bf16.msra.mxu2 %v3300_v48  ;;  %v1168_v48 = vsel %vm3468_vm2, %v3086_v44, %v1167_v45  ;;  %v3080_v45 = vld [vmem:[%s3466_s14 + $0x44] sm:$0x1] }
  0x8a   : > { %v570_v60 = vpop.permute.xlu1 %569  ;;  %1196 = vst.msk [vmem:[#allocation2 + $0x1c] sm:$0xf] %vm329_vm6, %v1168_v48 }
  0x8c   : > { %581 = vrot.lane.b32.xlu2 %v564_v32, %s3390_s15  ;;  %v1073_v32 = vsel %vm3487_vm5, %v1068_v26, %v1072_v27 }
  0x8e   : > { %v3713_v23 = vpop.permute.xlu2 %929 }
  0x8f   : > { %481 = vrot.lane.b32.xlu0 %v454_v61, %s3391_s16  ;;  %v324_v61 = vld [vmem:[%s3466_s14 + $0x18] sm:$0xf] }
  0x90   : > { %631 = vrot.lane.b32.xlu1 %v3001_v8, %s3392_s17  ;;  %333 = vst.msk [vmem:[#allocation2 + $0x18] sm:$0xf] %vm329_vm6, %v324_v61 }
  0x91   : > { %v470_v15 = vpop.permute.xlu0 %469 }
  0x92   : > { %494 = vst.msk [vmem:[#allocation2] sm:$0xf] %vm493_vm8, %v470_v15  ;;  %v572_v21 = vpop.permute.xlu1 %571 }
  0x93   : > { %594 = vst.msk [vmem:[#allocation2] sm:$0xf] %vm593_vm9, %v570_v60  ;;  %v1081_v60 = vor.u32 %v1080_v43, %v1077_v39  ;;  %v3085_v39 = vrot.slane %v3071_v36, 9 }
  0x94   : > { %644 = vst.msk [vmem:[#allocation2] sm:$0xf] %vm643_vm10, %v3644_v22  ;;  %v3292_v22 = vld [vmem:[%s4440_s2] sm:$0xff]  ;;  %633 = vrot.lane.b32.xlu2 %v3002_v58, %s3392_s17 }
  0x95   : > { %1341 = vmatpush.bf16.msra.mxu0 %v3292_v22  ;;  %v1082_v10 = vrot.slane %v1081_v60, 4  ;;  %v3050_v22 = vld [vmem:[%s3466_s14 + $0x48] sm:$0xf] }
  0x96   : > { %v474_v52 = vpop.permute.xlu2 %473 }
  0x97   : > { %583 = vrot.lane.b32.xlu0 %v568_v28, %s3390_s15  ;;  %496 = vst.msk [vmem:[#allocation2 + $0x10] sm:$0xf] %vm493_vm8, %v474_v52  ;;  %v1087_v24 = vsel %vm3487_vm5, %v1082_v10, %v1086_v11  ;;  %v3078_v10 = vld [vmem:[%s3466_s14 + $0x3c] sm:$0x1]  ;;  %v3087_v11 = vrot.slane %v3075_v6, 9  ;;  %v1531_v6 = vld [vmem:[#allocation3 + $0x2] sm:$0xff] }
  0x98   : > { %794 = vrot.lane.b32.xlu1 %v779_v34, %s3393_s18 }
  0x99   : > { %v472_v41 = vpop.permute.xlu0 %471 }
  0x9a   : > { %495 = vst.msk [vmem:[#allocation2 + $0x8] sm:$0xf] %vm493_vm8, %v472_v41  ;;  %v783_v51 = vpop.permute.xlu1 %782  ;;  %v2237_v41 = vld [vmem:[#allocation5] sm:$0xff] }
  0x9b   : > { %595 = vst.msk [vmem:[#allocation2 + $0x8] sm:$0xf] %vm593_vm9, %v572_v21  ;;  %v871_v21 = vrot.slane %v3032_v17, 5 }
  0x9c   : > { %645 = vst.msk [vmem:[#allocation2 + $0x8] sm:$0xf] %vm643_vm10, %v3664_v46  ;;  %v1156_v46 = vsel %vm3468_vm2, %v3083_v49, %v1155_v50  ;;  %v2245_v49 = vpack.c.bf16 %v2237_v41, %v2237_v41 }
  0x9d   : > { %806 = vst.msk [vmem:[#allocation2 + $0x8] sm:$0xf] %vm804_vm11, %v783_v51 }
  0x9e   : > { %1193 = vst.msk [vmem:[#allocation2 + $0x4] sm:$0xf] %vm329_vm6, %v1156_v46  ;;  %v576_v15 = vpop.permute.xlu2 %575 }
  0x9f   : > { %792 = vrot.lane.b32.xlu0 %v765_v55, %s3393_s18 }
  0xa0   : > { %939 = vrot.lane.b32.xlu1 %v3049_v59, %s3394_s19  ;;  %v3103_v59 = vld [vmem:[#allocation2 + $0x18] sm:$0xf0] }
  0xa1   : > { %v781_v8 = vpop.permute.xlu0 %780 }
  0xa2   : > { %805 = vst.msk [vmem:[#allocation2] sm:$0xf] %vm804_vm11, %v781_v8  ;;  %v928_v13 = vpop.permute.xlu1 %927  ;;  %v3076_v8 = vld [vmem:[%s3466_s14 + $0x34] sm:$0x1] }
  0xa3   : > { %902 = vst.msk [vmem:[#allocation2] sm:$0xf] %vm4450_vm12, %v3684_v62  ;;  %v872_v62 = vsel %vm3468_vm2, %v3041_v20, %v871_v21  ;;  %v1171_v12 = vrot.slane %v3076_v8, 5  ;;  %v1474_v8 = vld [vmem:[#allocation3 + $0x1] sm:$0xff] }
  0xa4   : > { %952 = vst.msk [vmem:[#allocation2] sm:$0xf] %vm4449_vm13, %v928_v13  ;;  %889 = vrot.lane.b32.xlu2 %v872_v62, %s3395_s20  ;;  %v3088_v13 = vrot.slane %v3077_v9, 9 }
  0xa5   : > { %v3284_v29 = vld [vmem:[#allocation2 + $0x4] sm:$0xf] }
  0xa6   : > { %v785_v31 = vpop.permute.xlu2 %784  ;;  %v3098_v34 = vor.u32 %v3284_v29, %v3095_v33 }
  0xa7   : > { %891 = vrot.lane.b32.xlu0 %v876_v14, %s3395_s20  ;;  %v1175_v14 = vrot.slane %v3078_v10, 5  ;;  %v1539_v10 = vpack.c.bf16 %v1531_v6, %v1531_v6 }
  0xa8   : > { %1102 = vrot.lane.b32.xlu1 %v1087_v24, %s3396_s21  ;;  %3159 = vmatmul.msk.bf16.vlgmr.msra.gmra.mxu1 %vm1321_vm7, %v3098_v34 }
  0xa9   : > { %v880_v28 = vpop.permute.xlu0 %879  ;;  %v1176_v16 = vsel %vm3468_vm2, %v3088_v13, %v1175_v14  ;;  %v3952_v14 = vld [vmem:[%s4441_s3] ss:$0 sm:$0xff] }
  0xaa   : > { %903 = vst.msk [vmem:[#allocation2 + $0x8] sm:$0xf] %vm4450_vm12, %v880_v28  ;;  %v1091_v30 = vpop.permute.xlu1 %1090 }
  0xab   : > { %953 = vst.msk [vmem:[#allocation2 + $0x8] sm:$0xf] %vm4449_vm13, %v3713_v23  ;;  %v3072_v23 = vld [vmem:[%s3466_s14 + $0x24] sm:$0x1] }
  0xac   : > { %1114 = vst.msk [vmem:[#allocation2 + $0x8] sm:$0xf] %vm4448_vm14, %v1091_v30  ;;  %941 = vrot.lane.b32.xlu2 %v3050_v22, %s3394_s19  ;;  %v1163_v40 = vrot.slane %v3072_v23, 5  ;;  %v328_v30 = vld [vmem:[%s3466_s14 + $0x38] sm:$0xf] }
  0xad   : > { %1198 = vst.msk [vmem:[#allocation2 + $0x2c] sm:$0xf] %vm329_vm6, %v1176_v16 }
  0xae   : > { %v884_v43 = vpop.permute.xlu2 %883  ;;  %v1164_v47 = vsel %vm3468_vm2, %v3085_v39, %v1163_v40  ;;  %337 = vst.msk [vmem:[#allocation2 + $0x38] sm:$0xf] %vm329_vm6, %v328_v30 }
  0xaf   : > { %1100 = vrot.lane.b32.xlu0 %v1073_v32, %s3396_s21  ;;  %1195 = vst.msk [vmem:[#allocation2 + $0x14] sm:$0xf] %vm329_vm6, %v1164_v47  ;;  %v3081_v47 = vld [vmem:[%s3466_s14 + $0x48] sm:$0xe] }
  0xb0   : > { %1555 = vrot.lane.b32.xlu1 %v1539_v10, %s3398_s30 }
  0xb1   : > { %v1089_v35 = vpop.permute.xlu0 %1088 }
  0xb2   : > { %1113 = vst.msk [vmem:[#allocation2] sm:$0xf] %vm4448_vm14, %v1089_v35  ;;  %v574_v42 = vpop.permute.xlu1 %573 }
  0xb3   : > { %596 = vst.msk [vmem:[#allocation2 + $0x10] sm:$0xf] %vm593_vm9, %v574_v42  ;;  %v3285_v50 = vld [vmem:[#allocation2 + $0x4] sm:$0xf0]  ;;  %v3079_v42 = vld [vmem:[%s3466_s14 + $0x40] sm:$0xe] }
  0xb4   : > { %v3111_v24 = vld [vmem:[#allocation2 + $0x28] sm:$0xf0] }
  0xb6   : > { %v1093_v55 = vpop.permute.xlu2 %1092  ;;  %v3286_v58 = vld [vmem:[#allocation2 + $0x14] sm:$0xf] }
  0xb7   : > { %v3106_v60 = vor.u32 %v3286_v58, %v3103_v59  ;;  %v2661_v58 = vld [vmem:[#allocation5 + $0x92] sm:$0xff] }
  0xb9   : > { %v3093_v51 = vld [vmem:[#allocation2] sm:$0xf]  ;;  %v476_v52 = vpop.permute.xlu0 %475  ;;  %3160 = vmatmul.msk.bf16.gmra.mxu1 %vm1321_vm7, %v3106_v60  ;;  %v2669_v60 = vpack.c.bf16 %v2661_v58, %v2661_v58 }
  0xba   : > { %2253 = vst.msk [vmem:[#allocation2] sm:$0xf] %vm329_vm6, %v2245_v49  ;;  %v3094_v53 = vor.u32 %v3285_v50, %v3093_v51  ;;  %v626_v54 = vpop.permute.xlu1 %625  ;;  %v3082_v49 = vld [vmem:[%s3466_s14 + $0x4c] sm:$0x1]  ;;  %v3089_v50 = vrot.slane %v3079_v42, 9  ;;  %v1179_v51 = vrot.slane %v3080_v45, 5 }
  0xbb   : > { %497 = vst.msk [vmem:[#allocation2 + $0x18] sm:$0xf] %vm493_vm8, %v476_v52  ;;  %v3090_v52 = vrot.slane %v3081_v47, 9 }
  0xbc   : > { %597 = vst.msk [vmem:[#allocation2 + $0x18] sm:$0xf] %vm593_vm9, %v576_v15  ;;  %1342 = vmatmul.bf16.vlgmr.msra.gmra.mxu0 %v3094_v53  ;;  %v1172_v15 = vsel %vm3468_vm2, %v3087_v11, %v1171_v12  ;;  %v1183_v53 = vrot.slane %v3082_v49, 5  ;;  %v1482_v11 = vpack.c.bf16 %v1474_v8, %v1474_v8 }
  0xbd   : > { %647 = vst.msk [vmem:[#allocation2 + $0x18] sm:$0xf] %vm643_vm10, %v626_v54  ;;  %v1180_v54 = vsel %vm3468_vm2, %v3089_v50, %v1179_v51 }
  0xbe   : > { %v480_v46 = vpop.permute.xlu2 %479  ;;  %1197 = vst.msk [vmem:[#allocation2 + $0x24] sm:$0xf] %vm329_vm6, %v1172_v15  ;;  %1498 = vrot.lane.b32.xlu2 %v1482_v11, %s3399_s9  ;;  %v1767_v15 = vld [vmem:[#allocation3 + $0x90] sm:$0xff] }
  0xbf   : > { %499 = vst.msk [vmem:[#allocation2 + $0x28] sm:$0xf] %vm493_vm8, %v480_v46 }
  0xc0   : > { %1199 = vst.msk [vmem:[#allocation2 + $0x34] sm:$0xf] %vm329_vm6, %v1180_v54 }
  0xc1   : > { %v624_v61 = vpop.permute.xlu0 %623 }
  0xc2   : > { %646 = vst.msk [vmem:[#allocation2 + $0x10] sm:$0xf] %vm643_vm10, %v624_v61  ;;  %v882_v63 = vpop.permute.xlu1 %881 }
  0xc3   : > { %807 = vst.msk [vmem:[#allocation2 + $0x10] sm:$0xf] %vm804_vm11, %v785_v31  ;;  %v327_v31 = vld [vmem:[%s3466_s14 + $0x30] sm:$0xf] }
  0xc4   : > { %904 = vst.msk [vmem:[#allocation2 + $0x10] sm:$0xf] %vm4450_vm12, %v882_v63 }
  0xc5   : > { %v3288_v21 = vld [vmem:[#allocation2 + $0x24] sm:$0xf]  ;;  %336 = vst.msk [vmem:[#allocation2 + $0x30] sm:$0xf] %vm329_vm6, %v327_v31 }
  0xc6   : > { %v628_v5 = vpop.permute.xlu2 %627  ;;  %v3114_v27 = vor.u32 %v3288_v21, %v3111_v24 }
  0xc7   : > { %v3290_v59 = vld [vmem:[#allocation2 + $0x34] sm:$0xf] }
  0xc8   : > { %3161 = vmatmul.msk.bf16.vlgmr.msra.gmra.mxu2 %vm1321_vm7, %v3114_v27 }
  0xc9   : > { %v787_v1 = vpop.permute.xlu0 %786 }
  0xca   : > { %808 = vst.msk [vmem:[#allocation2 + $0x18] sm:$0xf] %vm804_vm11, %v787_v1  ;;  %v934_v2 = vpop.permute.xlu1 %933 }
  0xcb   : > { %905 = vst.msk [vmem:[#allocation2 + $0x18] sm:$0xf] %vm4450_vm12, %v884_v43 }
  0xcc   : > { %955 = vst.msk [vmem:[#allocation2 + $0x18] sm:$0xf] %vm4449_vm13, %v934_v2 }
  0xce   : > { %v791_v19 = vpop.permute.xlu2 %790 }
  0xd1   : > { %v932_v3 = vpop.permute.xlu0 %931 }
  0xd2   : > { %954 = vst.msk [vmem:[#allocation2 + $0x10] sm:$0xf] %vm4449_vm13, %v932_v3  ;;  %v478_v4 = vpop.permute.xlu1 %477 }
  0xd3   : > { %1115 = vst.msk [vmem:[#allocation2 + $0x10] sm:$0xf] %vm4448_vm14, %v1093_v55  ;;  %v1184_v55 = vsel %vm3468_vm2, %v3090_v52, %v1183_v53 }
  0xd4   : > { %498 = vst.msk [vmem:[#allocation2 + $0x20] sm:$0xf] %vm493_vm8, %v478_v4 }
  0xd5   : > { %1200 = vst.msk [vmem:[#allocation2 + $0x3c] sm:$0xf] %vm329_vm6, %v1184_v55 }
  0xd6   : > { %v936_v32 = vpop.permute.xlu2 %935 }
  0xd9   : > { %v1095_v17 = vpop.permute.xlu0 %1094 }
  0xda   : > { %1116 = vst.msk [vmem:[#allocation2 + $0x18] sm:$0xf] %vm4448_vm14, %v1095_v17  ;;  %v580_v18 = vpop.permute.xlu1 %579  ;;  %v3101_v20 = vld [vmem:[#allocation2 + $0x10] sm:$0xf]  ;;  %v1775_v17 = vpack.c.bf16 %v1767_v15, %v1767_v15 }
  0xdb   : > { %599 = vst.msk [vmem:[#allocation2 + $0x28] sm:$0xf] %vm593_vm9, %v580_v18 }
  0xdc   : > { %v3119_v61 = vld [vmem:[#allocation2 + $0x38] sm:$0xf0]  ;;  %1798 = vrot.lane.b32.xlu1 %v1775_v17, %s3400_s13 }
  0xdd   : > { %v3122_v63 = vor.u32 %v3290_v59, %v3119_v61  ;;  %2677 = vst.msk [vmem:[#allocation2 + $0x3c] sm:$0xf] %vm329_vm6, %v2669_v60  ;;  %v1449_v61 = vld [vmem:[#allocation3] sm:$0xff] }
  0xde   : > { %v1099_v35 = vpop.permute.xlu2 %1098 }
  0xdf   : > { %3162 = vmatmul.msk.bf16.gmra.mxu2 %vm1321_vm7, %v3122_v63  ;;  %v1457_v63 = vpack.c.bf16 %v1449_v61, %v1449_v61 }
  0xe1   : > { %v578_v62 = vpop.permute.xlu0 %577  ;;  %v3287_v26 = vld [vmem:[#allocation2 + $0x14] sm:$0xf0]  ;;  %1466 = vst.msk [vmem:[#allocation4] sm:$0xf] %vm1465_vm4, %v1457_v63 }
  0xe2   : > { %598 = vst.msk [vmem:[#allocation2 + $0x20] sm:$0xf] %vm593_vm9, %v578_v62  ;;  %v3102_v28 = vor.u32 %v3287_v26, %v3101_v20  ;;  %v789_v29 = vpop.permute.xlu1 %788  ;;  %v3956_v20 = vstv %s1392_s10 }
  0xe3   : > { %648 = vst.msk [vmem:[#allocation2 + $0x20] sm:$0xf] %vm643_vm10, %v628_v5 }
  0xe4   : > { %1347 = vmatmul.bf16.gmra.mxu0 %v3102_v28  ;;  %809 = vst.msk [vmem:[#allocation2 + $0x20] sm:$0xf] %vm804_vm11, %v789_v29 }
  0xe6   : > { %v582_v37 = vpop.permute.xlu2 %581 }
  0xe9   : > { %v630_v33 = vpop.permute.xlu0 %629 }
  0xea   : > { %649 = vst.msk [vmem:[#allocation2 + $0x28] sm:$0xf] %vm643_vm10, %v630_v33  ;;  %v888_v34 = vpop.permute.xlu1 %887 }
  0xeb   : > { %810 = vst.msk [vmem:[#allocation2 + $0x28] sm:$0xf] %vm804_vm11, %v791_v19 }
  0xec   : > { %907 = vst.msk [vmem:[#allocation2 + $0x28] sm:$0xf] %vm4450_vm12, %v888_v34 }
  0xee   : > { %v634_v48 = vpop.permute.xlu2 %633 }
  0xf1   : > { %v886_v22 = vpop.permute.xlu0 %885 }
  0xf2   : > { %906 = vst.msk [vmem:[#allocation2 + $0x20] sm:$0xf] %vm4450_vm12, %v886_v22  ;;  %v1097_v36 = vpop.permute.xlu1 %1096 }
  0xf3   : > { %956 = vst.msk [vmem:[#allocation2 + $0x20] sm:$0xf] %vm4449_vm13, %v936_v32 }
  0xf4   : > { %1117 = vst.msk [vmem:[#allocation2 + $0x20] sm:$0xf] %vm4448_vm14, %v1097_v36 }
  0xf9   : > { %v938_v23 = vpop.permute.xlu0 %937 }
  0xfa   : > { %957 = vst.msk [vmem:[#allocation2 + $0x28] sm:$0xf] %vm4449_vm13, %v938_v23  ;;  %v484_v38 = vpop.permute.xlu1 %483 }
  0xfb   : > { %1118 = vst.msk [vmem:[#allocation2 + $0x28] sm:$0xf] %vm4448_vm14, %v1099_v35  ;;  %v3109_v39 = vld [vmem:[#allocation2 + $0x20] sm:$0xf] }
  0xfc   : > { %501 = vst.msk [vmem:[#allocation2 + $0x38] sm:$0xf] %vm493_vm8, %v484_v38 }
  0xfe   : > { %v890_v0 = vpop.permute.xlu2 %889 }
 0x101   : > { %v482_v40 = vpop.permute.xlu0 %481 }
 0x102   : > { %v3289_v41 = vld [vmem:[#allocation2 + $0x24] sm:$0xf0]  ;;  %500 = vst.msk [vmem:[#allocation2 + $0x30] sm:$0xf] %vm493_vm8, %v482_v40  ;;  %v632_v44 = vpop.permute.xlu1 %631 }
 0x103   : > { %v3110_v43 = vor.u32 %v3289_v41, %v3109_v39  ;;  %600 = vst.msk [vmem:[#allocation2 + $0x30] sm:$0xf] %vm593_vm9, %v582_v37 }
 0x104   : > { %650 = vst.msk [vmem:[#allocation2 + $0x30] sm:$0xf] %vm643_vm10, %v632_v44 }
 0x105   : > { %1352 = vmatmul.bf16.gmra.mxu0 %v3110_v43 }
 0x106   : > { %v942_v2 = vpop.permute.xlu2 %941 }
 0x109   : > { %v584_v56 = vpop.permute.xlu0 %583 }
 0x10a   : > { %601 = vst.msk [vmem:[#allocation2 + $0x38] sm:$0xf] %vm593_vm9, %v584_v56  ;;  %v795_v57 = vpop.permute.xlu1 %794 }
 0x10b   : > { %651 = vst.msk [vmem:[#allocation2 + $0x38] sm:$0xf] %vm643_vm10, %v634_v48 }
 0x10c   : > { %812 = vst.msk [vmem:[#allocation2 + $0x38] sm:$0xf] %vm804_vm11, %v795_v57 }
 0x111   : > { %v793_v46 = vpop.permute.xlu0 %792 }
 0x112   : > { %811 = vst.msk [vmem:[#allocation2 + $0x30] sm:$0xf] %vm804_vm11, %v793_v46  ;;  %v940_v1 = vpop.permute.xlu1 %939 }
 0x113   : > { %908 = vst.msk [vmem:[#allocation2 + $0x30] sm:$0xf] %vm4450_vm12, %v890_v0 }
 0x114   : > { %958 = vst.msk [vmem:[#allocation2 + $0x30] sm:$0xf] %vm4449_vm13, %v940_v1 }
 0x119   : > { %v892_v3 = vpop.permute.xlu0 %891 }
 0x11a   : > { %909 = vst.msk [vmem:[#allocation2 + $0x38] sm:$0xf] %vm4450_vm12, %v892_v3  ;;  %v1103_v4 = vpop.permute.xlu1 %1102  ;;  %v1499_v3 = vpop.permute.xlu2 %1498  ;;  %vm1983_vm12 = vcmask 293888  }
 0x11b   : > { %959 = vst.msk [vmem:[#allocation2 + $0x38] sm:$0xf] %vm4449_vm13, %v942_v2  ;;  %vm1922_vm13 = vcmask 290048  }
 0x11c   : > { %1120 = vst.msk [vmem:[#allocation2 + $0x38] sm:$0xf] %vm4448_vm14, %v1103_v4 }
 0x121   : > { %v1101_v5 = vpop.permute.xlu0 %1100 }
 0x122   : > { %1119 = vst.msk [vmem:[#allocation2 + $0x30] sm:$0xf] %vm4448_vm14, %v1101_v5  ;;  %vm1865_vm14 = vcmask 257248  }
 0x123   : > { %v3291_v9 = vld [vmem:[#allocation2 + $0x34] sm:$0xf0] }
 0x125   : > { %v1372_v16 = vpop.f32.mrf.mxu1 }
 0x129   : > { %v3117_v12 = vld [vmem:[#allocation2 + $0x30] sm:$0xf] }
 0x12a   : > { %v3118_v13 = vor.u32 %v3291_v9, %v3117_v12 }
 0x12c   : > { %1357 = vmatmul.bf16.gmra.mxu0 %v3118_v13 }
 0x12d   : > { %v1374_v26 = vpop.f32.mrf.mxu1 }
 0x136   : > { %v1377_v41 = vpop.f32.mrf.mxu1 }
 0x139   : > { %v1343_v18 = vpop.f32.mrf.mxu0 }
 0x13a   : > { %v1344_v19 = vadd.f32 %v3952_v14, %v1343_v18 }
 0x13c   : > { %v1373_v21 = vadd.f32 %v1372_v16, %v1344_v19 }
 0x13e   : > { %vm1393_vm2 = vcmp.ge.f32.partialorder %v1373_v21, 0.0  ;;  %v1402_v7 = vmul.f32 %v3956_v20, %v1373_v21  ;;  %v1379_v50 = vpop.f32.mrf.mxu1 }
 0x140   : > { %v3959_v24 = vsel %vm1393_vm2, %v1373_v21, %v1402_v7  ;;  %vm1522_vm2 = vcmask 60448  }
 0x141   : > { %1441 = vst.msk [vmem:[#allocation3 + $0x11] sm:$0xff] %vm4447_vm0, %v3959_v24  ;;  %v1345_v62 = vpop.f32.mrf.mxu0 }
 0x142   : > { %v1346_v27 = vadd.f32 %v3952_v14, %v1345_v62  ;;  %1523 = vst.msk [vmem:[#allocation4] sm:$0xf] %vm1522_vm2, %v1499_v3  ;;  %v3306_v3 = vld [vmem:[%s4442_s4 + $0x8] sm:$0xff] }
 0x144   : > { %v1375_v28 = vadd.f32 %v1374_v26, %v1346_v27 }
 0x146   : > { %vm1394_vm3 = vcmp.ge.f32.partialorder %v1375_v28, 0.0  ;;  %v1403_v29 = vmul.f32 %v3956_v20, %v1375_v28 }
 0x148   : > { %v3965_v30 = vsel %vm1394_vm3, %v1375_v28, %v1403_v29  ;;  %v1702_v31 = vld [vmem:[#allocation3 + $0x12] sm:$0xff]  ;;  %v1556_v28 = vpop.permute.xlu1 %1555 }
 0x149   : > { %v1475_v32 = vld [vmem:[#allocation3 + $0x11] sm:$0xff]  ;;  %1442 = vst.msk [vmem:[#allocation3 + $0x21] sm:$0xff] %vm4447_vm0, %v3965_v30  ;;  %v1710_v34 = vpack.c.bf16 %v1702_v31, %v1702_v31 }
 0x14a   : > { %v1588_v33 = vld [vmem:[#allocation3 + $0x10] sm:$0xff]  ;;  %v1483_v22 = vpack.c.bf16 %v1475_v32, %v1475_v32 }
 0x14b   : > { %v1596_v35 = vpack.c.bf16 %v1588_v33, %v1588_v33  ;;  %1726 = vrot.lane.b32.xlu1 %v1710_v34, %s3401_s22  ;;  %1557 = vrot.lane.b32.xlu2 %v1710_v34, %s3398_s30  ;;  %v1382_v1 = vpop.f32.mrf.mxu2 }
 0x14c   : > { %1500 = vrot.lane.b32.xlu0 %v1483_v22, %s3399_s9 }
 0x14d   : > { %1467 = vst.msk [vmem:[#allocation4 + $0x4] sm:$0xf] %vm1465_vm4, %v1596_v35 }
 0x150   : > { %v1589_v36 = vld [vmem:[#allocation3 + $0x20] sm:$0xff] }
 0x151   : > { %v1597_v23 = vpack.c.bf16 %v1589_v36, %v1589_v36  ;;  %v1874_v37 = vld [vmem:[#allocation3 + $0x22] sm:$0xff] }
 0x152   : > { %v1646_v38 = vld [vmem:[#allocation3 + $0x21] sm:$0xff]  ;;  %v1882_v39 = vpack.c.bf16 %v1874_v37, %v1874_v37 }
 0x153   : > { %1614 = vrot.lane.b32.xlu1 %v1597_v23, %s3402_s23  ;;  %1669 = vrot.lane.b32.xlu2 %v1483_v22, %s3391_s16  ;;  %1468 = vst.msk [vmem:[#allocation4 + $0x8] sm:$0xf] %vm1465_vm4, %v1597_v23  ;;  %v1654_v40 = vpack.c.bf16 %v1646_v38, %v1646_v38  ;;  %v1384_v13 = vpop.f32.mrf.mxu2 }
 0x154   : > { %1612 = vrot.lane.b32.xlu0 %v1596_v35, %s3402_s23 }
 0x15b   : > { %1898 = vrot.lane.b32.xlu1 %v1882_v39, %s3390_s15  ;;  %1728 = vrot.lane.b32.xlu2 %v1882_v39, %s3401_s22 }
 0x15c   : > { %1671 = vrot.lane.b32.xlu0 %v1654_v40, %s3391_s16 }
 0x161   : > { %v1348_v42 = vpop.f32.mrf.mxu0 }
 0x162   : > { %v1349_v43 = vadd.f32 %v3952_v14, %v1348_v42  ;;  %v1387_v22 = vpop.f32.mrf.mxu2 }
 0x163   : > { %1841 = vrot.lane.b32.xlu2 %v1654_v40, %s3403_s24 }
 0x164   : > { %v1378_v44 = vadd.f32 %v1377_v41, %v1349_v43  ;;  %1784 = vrot.lane.b32.xlu0 %v1597_v23, %s3400_s13  ;;  %v4047_v43 = vpop.permute.xlu1 %1798 }
 0x166   : > { %vm1395_vm15 = vcmp.ge.f32.partialorder %v1378_v44, 0.0  ;;  %v1404_v45 = vmul.f32 %v3956_v20, %v1378_v44 }
 0x168   : > { %v3984_v47 = vsel %vm1395_vm15, %v1378_v44, %v1404_v45 }
 0x169   : > { %1443 = vst.msk [vmem:[#allocation3 + $0x31] sm:$0xff] %vm4447_vm0, %v3984_v47  ;;  %v1350_v48 = vpop.f32.mrf.mxu0 }
 0x16a   : > { %v1351_v49 = vadd.f32 %v3952_v14, %v1350_v48  ;;  %v1389_v41 = vpop.f32.mrf.mxu2 }
 0x16b   : > { %1559 = vrot.lane.b32.xlu2 %v1882_v39, %s3398_s30 }
 0x16c   : > { %v1380_v51 = vadd.f32 %v1379_v50, %v1351_v49  ;;  %1502 = vrot.lane.b32.xlu0 %v1654_v40, %s3399_s9 }
 0x16e   : > { %vm1396_vm1 = vcmp.ge.f32.partialorder %v1380_v51, 0.0  ;;  %v1405_v52 = vmul.f32 %v3956_v20, %v1380_v51 }
 0x170   : > { %v3992_v53 = vsel %vm1396_vm1, %v1380_v51, %v1405_v52  ;;  %v1761_v54 = vld [vmem:[#allocation3 + $0x30] sm:$0xff]  ;;  %vm1579_vm1 = vcmask 93248  }
 0x171   : > { %v1875_v55 = vld [vmem:[#allocation3 + $0x32] sm:$0xff]  ;;  %1444 = vst.msk [vmem:[#allocation3 + $0x41] sm:$0xff] %vm4447_vm0, %v3992_v53  ;;  %v1769_v57 = vpack.c.bf16 %v1761_v54, %v1761_v54 }
 0x172   : > { %v1818_v56 = vld [vmem:[#allocation3 + $0x31] sm:$0xff]  ;;  %v1883_v58 = vpack.c.bf16 %v1875_v55, %v1875_v55  ;;  %1580 = vst.msk [vmem:[#allocation4] sm:$0xf] %vm1579_vm1, %v1556_v28 }
 0x173   : > { %v1826_v0 = vpack.c.bf16 %v1818_v56, %v1818_v56  ;;  %1786 = vrot.lane.b32.xlu1 %v1769_v57, %s3400_s13  ;;  %1469 = vst.msk [vmem:[#allocation4 + $0xc] sm:$0xf] %vm1465_vm4, %v1769_v57  ;;  %v1881_v28 = vld [vmem:[#allocation3 + $0x92] sm:$0xff] }
 0x174   : > { %1900 = vrot.lane.b32.xlu2 %v1883_v58, %s3390_s15 }
 0x175   : > { %1843 = vrot.lane.b32.xlu0 %v1826_v0, %s3403_s24 }
 0x178   : > { %v1591_v59 = vld [vmem:[#allocation3 + $0x40] sm:$0xff] }
 0x179   : > { %v1599_v60 = vpack.c.bf16 %v1591_v59, %v1591_v59  ;;  %v1648_v5 = vld [vmem:[#allocation3 + $0x41] sm:$0xff] }
 0x17a   : > { %v1876_v6 = vld [vmem:[#allocation3 + $0x42] sm:$0xff]  ;;  %v1656_v10 = vpack.c.bf16 %v1648_v5, %v1648_v5 }
 0x17b   : > { %1504 = vrot.lane.b32.xlu1 %v1826_v0, %s3399_s9  ;;  %1470 = vst.msk [vmem:[#allocation4 + $0x10] sm:$0xf] %vm1465_vm4, %v1599_v60  ;;  %v1884_v11 = vpack.c.bf16 %v1876_v6, %v1876_v6  ;;  %v3305_v5 = vld [vmem:[%s4442_s4] sm:$0xff] }
 0x17c   : > { %1730 = vrot.lane.b32.xlu2 %v1883_v58, %s3401_s22 }
 0x17d   : > { %1561 = vrot.lane.b32.xlu0 %v1883_v58, %s3398_s30  ;;  %v1943_v58 = vld [vmem:[%s4442_s4 + $0x10] sm:$0x3] }
 0x182   : > { %v1353_v46 = vpop.f32.mrf.mxu0 }
 0x183   : > { %v1354_v2 = vadd.f32 %v3952_v14, %v1353_v46  ;;  %1616 = vrot.lane.b32.xlu1 %v1769_v57, %s3402_s23 }
 0x184   : > { %1618 = vrot.lane.b32.xlu2 %v1599_v60, %s3402_s23 }
 0x185   : > { %1673 = vrot.lane.b32.xlu0 %v1826_v0, %s3391_s16  ;;  %v1383_v4 = vadd.f32 %v1382_v1, %v1354_v2  ;;  %v1977_v0 = vunpack.c.l.b16 %v1943_v58 }
 0x187   : > { %vm1397_vm3 = vcmp.ge.f32.partialorder %v1383_v4, 0.0  ;;  %v1406_v8 = vmul.f32 %v3956_v20, %v1383_v4  ;;  %v1980_v59 = vpack.c.b16 %v1977_v0, %v1977_v0 }
 0x189   : > { %v4011_v9 = vsel %vm1397_vm3, %v1383_v4, %v1406_v8 }
 0x18a   : > { %1445 = vst.msk [vmem:[#allocation3 + $0x51] sm:$0xff] %vm4447_vm0, %v4011_v9  ;;  %v1355_v12 = vpop.f32.mrf.mxu0 }
 0x18b   : > { %1675 = vrot.lane.b32.xlu1 %v1656_v10, %s3391_s16  ;;  %v1356_v15 = vadd.f32 %v3952_v14, %v1355_v12 }
 0x18c   : > { %1902 = vrot.lane.b32.xlu2 %v1884_v11, %s3390_s15 }
 0x18d   : > { %1732 = vrot.lane.b32.xlu0 %v1884_v11, %s3401_s22  ;;  %v1385_v16 = vadd.f32 %v1384_v13, %v1356_v15 }
 0x18f   : > { %vm1398_vm15 = vcmp.ge.f32.partialorder %v1385_v16, 0.0  ;;  %v1407_v17 = vmul.f32 %v3956_v20, %v1385_v16 }
 0x191   : > { %v4020_v18 = vsel %vm1398_vm15, %v1385_v16, %v1407_v17  ;;  %v1763_v19 = vld [vmem:[#allocation3 + $0x50] sm:$0xff] }
 0x192   : > { %1446 = vst.msk [vmem:[#allocation3 + $0x61] sm:$0xff] %vm4447_vm0, %v4020_v18  ;;  %v1771_v21 = vpack.c.bf16 %v1763_v19, %v1763_v19  ;;  %v1479_v7 = vld [vmem:[#allocation3 + $0x51] sm:$0xff] }
 0x193   : > { %1788 = vrot.lane.b32.xlu1 %v1599_v60, %s3400_s13  ;;  %v1487_v62 = vpack.c.bf16 %v1479_v7, %v1479_v7  ;;  %v1877_v29 = vld [vmem:[#allocation3 + $0x52] sm:$0xff] }
 0x194   : > { %1790 = vrot.lane.b32.xlu2 %v1771_v21, %s3400_s13  ;;  %1471 = vst.msk [vmem:[#allocation4 + $0x14] sm:$0xf] %vm1465_vm4, %v1771_v21  ;;  %v1885_v31 = vpack.c.bf16 %v1877_v29, %v1877_v29 }
 0x195   : > { %1845 = vrot.lane.b32.xlu0 %v1656_v10, %s3403_s24 }
 0x199   : > { %v1593_v26 = vld [vmem:[#allocation3 + $0x60] sm:$0xff] }
 0x19a   : > { %v1601_v27 = vpack.c.bf16 %v1593_v26, %v1593_v26  ;;  %v1650_v33 = vld [vmem:[#allocation3 + $0x61] sm:$0xff] }
 0x19b   : > { %1506 = vrot.lane.b32.xlu1 %v1656_v10, %s3399_s9  ;;  %v1658_v35 = vpack.c.bf16 %v1650_v33, %v1650_v33  ;;  %v1707_v48 = vld [vmem:[#allocation3 + $0x62] sm:$0xff] }
 0x19c   : > { %1508 = vrot.lane.b32.xlu2 %v1487_v62, %s3399_s9  ;;  %1472 = vst.msk [vmem:[#allocation4 + $0x18] sm:$0xf] %vm1465_vm4, %v1601_v27  ;;  %v1715_v52 = vpack.c.bf16 %v1707_v48, %v1707_v48 }
 0x19d   : > { %1563 = vrot.lane.b32.xlu0 %v1884_v11, %s3398_s30 }
 0x1a3   : > { %1847 = vrot.lane.b32.xlu1 %v1487_v62, %s3403_s24 }
 0x1a4   : > { %1620 = vrot.lane.b32.xlu2 %v1771_v21, %s3402_s23 }
 0x1a5   : > { %1904 = vrot.lane.b32.xlu0 %v1885_v31, %s3390_s15  ;;  %v1558_v32 = vpop.permute.xlu2 %1557 }
 0x1a9   : > { %v1358_v34 = vpop.f32.mrf.mxu0 }
 0x1aa   : > { %v1359_v36 = vadd.f32 %v3952_v14, %v1358_v34 }
 0x1ab   : > { %1565 = vrot.lane.b32.xlu1 %v1885_v31, %s3398_s30 }
 0x1ac   : > { %1679 = vrot.lane.b32.xlu2 %v1658_v35, %s3391_s16  ;;  %v1388_v23 = vadd.f32 %v1387_v22, %v1359_v36 }
 0x1ad   : > { %1734 = vrot.lane.b32.xlu0 %v1885_v31, %s3401_s22  ;;  %v1670_v37 = vpop.permute.xlu2 %1669 }
 0x1ae   : > { %vm1399_vm3 = vcmp.ge.f32.partialorder %v1388_v23, 0.0  ;;  %v1408_v38 = vmul.f32 %v3956_v20, %v1388_v23 }
 0x1b0   : > { %v4041_v39 = vsel %vm1399_vm3, %v1388_v23, %v1408_v38  ;;  %vm1693_vm3 = vcmask 158848  }
 0x1b1   : > { %1447 = vst.msk [vmem:[#allocation3 + $0x71] sm:$0xff] %vm4447_vm0, %v4041_v39  ;;  %v1360_v40 = vpop.f32.mrf.mxu0 }
 0x1b2   : > { %v1361_v42 = vadd.f32 %v3952_v14, %v1360_v40 }
 0x1b3   : > { %1677 = vrot.lane.b32.xlu1 %v1487_v62, %s3391_s16 }
 0x1b4   : > { %1792 = vrot.lane.b32.xlu2 %v1601_v27, %s3400_s13  ;;  %v1390_v44 = vadd.f32 %v1389_v41, %v1361_v42 }
 0x1b5   : > { %1622 = vrot.lane.b32.xlu0 %v1601_v27, %s3402_s23  ;;  %v1729_v45 = vpop.permute.xlu2 %1728  ;;  %v1824_v27 = vld [vmem:[#allocation3 + $0x91] sm:$0xff] }
 0x1b6   : > { %vm1400_vm15 = vcmp.ge.f32.partialorder %v1390_v44, 0.0  ;;  %v1409_v49 = vmul.f32 %v3956_v20, %v1390_v44  ;;  %v1832_v31 = vpack.c.bf16 %v1824_v27, %v1824_v27 }
 0x1b8   : > { %v4052_v50 = vsel %vm1400_vm15, %v1390_v44, %v1409_v49  ;;  %v1765_v51 = vld [vmem:[#allocation3 + $0x70] sm:$0xff]  ;;  %vm1996_vm15 = vcmask 1041408  }
 0x1b9   : > { %1448 = vst.msk [vmem:[#allocation3 + $0x81] sm:$0xff] %vm4447_vm0, %v4052_v50  ;;  %v1773_v14 = vpack.c.bf16 %v1765_v51, %v1765_v51  ;;  %v1822_v56 = vld [vmem:[#allocation3 + $0x71] sm:$0xff]  ;;  %vm1750_vm0 = vcmask 191648   ;;  %v1998_v1 = vsel %vm1996_vm15, %v1980_v59, 0  ;;  %vm1808_vm15 = vcmask 224448  }
 0x1ba   : > { %v1830_v57 = vpack.c.bf16 %v1822_v56, %v1822_v56  ;;  %v1538_v63 = vld [vmem:[#allocation3 + $0x72] sm:$0xff]  ;;  %2005 = vmatpush.bf16.msrb.mxu2 %v1998_v1 }
 0x1bb   : > { %1736 = vrot.lane.b32.xlu1 %v1715_v52, %s3401_s22  ;;  %1473 = vst.msk [vmem:[#allocation4 + $0x1c] sm:$0xf] %vm1465_vm4, %v1773_v14  ;;  %vm1636_vm4 = vcmask 126048   ;;  %v1546_v2 = vpack.c.bf16 %v1538_v63, %v1538_v63 }
 0x1bc   : > { %1510 = vrot.lane.b32.xlu2 %v1658_v35, %s3399_s9 }
 0x1bd   : > { %1906 = vrot.lane.b32.xlu0 %v1715_v52, %s3390_s15  ;;  %v1727_v54 = vpop.permute.xlu1 %1726  ;;  %v1842_v55 = vpop.permute.xlu2 %1841 }
 0x1be   : > { %v1501_v20 = vpop.permute.xlu0 %1500  ;;  %2006 = vmatpush.bf16.msrb.mxu2 %v3306_v3 }
 0x1bf   : > { %1524 = vst.msk [vmem:[#allocation4 + $0x4] sm:$0xf] %vm1522_vm2, %v1501_v20 }
 0x1c0   : > { %1581 = vst.msk [vmem:[#allocation4 + $0x4] sm:$0xf] %vm1579_vm1, %v1558_v32  ;;  %v1652_v11 = vld [vmem:[#allocation3 + $0x81] sm:$0xff]  ;;  %v1889_v32 = vpack.c.bf16 %v1881_v28, %v1881_v28 }
 0x1c1   : > { %v1709_v12 = vld [vmem:[#allocation3 + $0x82] sm:$0xff]  ;;  %v1660_v15 = vpack.c.bf16 %v1652_v11, %v1652_v11 }
 0x1c2   : > { %2007 = vmatpush.bf16.msrb.mxu2 %v3305_v5  ;;  %v1717_v16 = vpack.c.bf16 %v1709_v12, %v1709_v12  ;;  %v1595_v21 = vld [vmem:[#allocation3 + $0x80] sm:$0xff] }
 0x1c3   : > { %1849 = vrot.lane.b32.xlu1 %v1658_v35, %s3403_s24  ;;  %v1603_v7 = vpack.c.bf16 %v1595_v21, %v1595_v21  ;;  %v2317_v21 = vld [vmem:[#allocation5 + $0x2] sm:$0xff] }
 0x1c4   : > { %1851 = vrot.lane.b32.xlu2 %v1830_v57, %s3403_s24 }
 0x1c5   : > { %1794 = vrot.lane.b32.xlu0 %v1773_v14, %s3400_s13  ;;  %v1615_v60 = vpop.permute.xlu1 %1614  ;;  %v1560_v61 = vpop.permute.xlu2 %1559 }
 0x1c6   : > { %1638 = vst.msk [vmem:[#allocation4 + $0x4] sm:$0xf] %vm1636_vm4, %v1615_v60  ;;  %v1613_v46 = vpop.permute.xlu0 %1612 }
 0x1c7   : > { %1637 = vst.msk [vmem:[#allocation4] sm:$0xf] %vm1636_vm4, %v1613_v46 }
 0x1c8   : > { %1694 = vst.msk [vmem:[#allocation4] sm:$0xf] %vm1693_vm3, %v1670_v37 }
 0x1c9   : > { %1751 = vst.msk [vmem:[#allocation4] sm:$0xf] %vm1750_vm0, %v1727_v54 }
 0x1cb   : > { %1567 = vrot.lane.b32.xlu1 %v1715_v52, %s3398_s30 }
 0x1cc   : > { %1569 = vrot.lane.b32.xlu2 %v1546_v2, %s3398_s30  ;;  %s3191_s30 = sld [smem:[#allocation6 + $0x1]] }
 0x1cd   : > { %1512 = vrot.lane.b32.xlu0 %v1830_v57, %s3399_s9  ;;  %v1899_v13 = vpop.permute.xlu1 %1898 }
 0x1ce   : > { %v1901_v4 = vpop.permute.xlu2 %1900  ;;  %v1672_v6 = vpop.permute.xlu0 %1671 }
 0x1cf   : > { %1695 = vst.msk [vmem:[#allocation4 + $0x4] sm:$0xf] %vm1693_vm3, %v1672_v6 }
 0x1d0   : > { %1752 = vst.msk [vmem:[#allocation4 + $0x4] sm:$0xf] %vm1750_vm0, %v1729_v45 }
 0x1d3   : > { %1908 = vrot.lane.b32.xlu1 %v1546_v2, %s3390_s15 }
 0x1d4   : > { %1681 = vrot.lane.b32.xlu2 %v1830_v57, %s3391_s16 }
 0x1d5   : > { %1624 = vrot.lane.b32.xlu0 %v1773_v14, %s3402_s23 }
 0x1d6   : > { %v1731_v8 = vpop.permute.xlu2 %1730  ;;  %v1785_v10 = vpop.permute.xlu0 %1784 }
 0x1d7   : > { %1809 = vst.msk [vmem:[#allocation4] sm:$0xf] %vm1808_vm15, %v1785_v10 }
 0x1d8   : > { %1866 = vst.msk [vmem:[#allocation4] sm:$0xf] %vm1865_vm14, %v1842_v55 }
 0x1d9   : > { %1923 = vst.msk [vmem:[#allocation4] sm:$0xf] %vm1922_vm13, %v1899_v13 }
 0x1db   : > { %1738 = vrot.lane.b32.xlu1 %v1546_v2, %s3401_s22 }
 0x1dc   : > { %1740 = vrot.lane.b32.xlu2 %v1717_v16, %s3401_s22 }
 0x1dd   : > { %1683 = vrot.lane.b32.xlu0 %v1660_v15, %s3391_s16 }
 0x1de   : > { %v1619_v17 = vpop.permute.xlu2 %1618  ;;  %v1503_v19 = vpop.permute.xlu0 %1502 }
 0x1df   : > { %1525 = vst.msk [vmem:[#allocation4 + $0x8] sm:$0xf] %vm1522_vm2, %v1503_v19 }
 0x1e0   : > { %1582 = vst.msk [vmem:[#allocation4 + $0x8] sm:$0xf] %vm1579_vm1, %v1560_v61 }
 0x1e3   : > { %1626 = vrot.lane.b32.xlu1 %v1603_v7, %s3402_s23 }
 0x1e4   : > { %1853 = vrot.lane.b32.xlu2 %v1660_v15, %s3403_s24 }
 0x1e5   : > { %1796 = vrot.lane.b32.xlu0 %v1603_v7, %s3400_s13  ;;  %v1787_v62 = vpop.permute.xlu1 %1786  ;;  %v2261_v7 = vld [vmem:[#allocation5 + $0x1] sm:$0xff] }
 0x1e6   : > { %v1903_v26 = vpop.permute.xlu2 %1902  ;;  %1810 = vst.msk [vmem:[#allocation4 + $0x4] sm:$0xf] %vm1808_vm15, %v1787_v62  ;;  %v3192_v62 = vld [vmem:[%s3466_s14 + $0x8] sm:$0xf]  ;;  %v2269_v27 = vpack.c.bf16 %v2261_v7, %v2261_v7 }
 0x1e7   : > { %v1844_v29 = vpop.permute.xlu0 %1843  ;;  %v2075_v28 = vshll.u32 %v3192_v62, 16 }
 0x1e8   : > { %1867 = vst.msk [vmem:[#allocation4 + $0x4] sm:$0xf] %vm1865_vm14, %v1844_v29 }
 0x1e9   : > { %1924 = vst.msk [vmem:[#allocation4 + $0x4] sm:$0xf] %vm1922_vm13, %v1901_v4 }
 0x1eb   : > { %1910 = vrot.lane.b32.xlu1 %v1717_v16, %s3390_s15 }
 0x1ec   : > { %1912 = vrot.lane.b32.xlu2 %v1889_v32, %s3390_s15  ;;  %v2077_v32 = vrot.slane %v2075_v28, 5 }
 0x1ed   : > { %1855 = vrot.lane.b32.xlu0 %v1832_v31, %s3403_s24  ;;  %v1505_v33 = vpop.permute.xlu1 %1504 }
 0x1ee   : > { %1526 = vst.msk [vmem:[#allocation4 + $0xc] sm:$0xf] %vm1522_vm2, %v1505_v33  ;;  %v1791_v22 = vpop.permute.xlu2 %1790  ;;  %v3193_v33 = vld [vmem:[%s3466_s14 + $0xc] sm:$0x1] }
 0x1ef   : > { %v1562_v34 = vpop.permute.xlu0 %1561 }
 0x1f0   : > { %1583 = vst.msk [vmem:[#allocation4 + $0xc] sm:$0xf] %vm1579_vm1, %v1562_v34  ;;  %v3301_v35 = vld [vmem:[#allocation4] sm:$0xff]  ;;  %v3194_v34 = vld [vmem:[%s3466_s14 + $0x10] sm:$0xf] }
 0x1f1   : > { %1640 = vst.msk [vmem:[#allocation4 + $0xc] sm:$0xf] %vm1636_vm4, %v1619_v17  ;;  %3187 = vmatmul.msk.bf16.vlgmr.msrb.gmra.mxu2 %vm1983_vm12, %v3301_v35  ;;  %v2081_v35 = vshll.u32 %v3193_v33, 16 }
 0x1f5   : > { %v1617_v36 = vpop.permute.xlu1 %1616  ;;  %2285 = vrot.lane.b32.xlu0 %v2269_v27, %s3391_s16  ;;  %v3197_v27 = vld [vmem:[%s3466_s14 + $0x1c] sm:$0x1] }
 0x1f6   : > { %1639 = vst.msk [vmem:[#allocation4 + $0x8] sm:$0xf] %vm1636_vm4, %v1617_v36  ;;  %v1509_v37 = vpop.permute.xlu2 %1508  ;;  %v2086_v36 = vshrl.u32 %v3194_v34, 16 }
 0x1f7   : > { %v1674_v23 = vpop.permute.xlu0 %1673  ;;  %1528 = vst.msk [vmem:[#allocation4 + $0x14] sm:$0xf] %vm1522_vm2, %v1509_v37 }
 0x1f8   : > { %1696 = vst.msk [vmem:[#allocation4 + $0x8] sm:$0xf] %vm1693_vm3, %v1674_v23  ;;  %v2089_v23 = vshll.u32 %v3194_v34, 16 }
 0x1f9   : > { %1753 = vst.msk [vmem:[#allocation4 + $0x8] sm:$0xf] %vm1750_vm0, %v1731_v8 }
 0x1fd   : > { %v1676_v38 = vpop.permute.xlu1 %1675 }
 0x1fe   : > { %1697 = vst.msk [vmem:[#allocation4 + $0xc] sm:$0xf] %vm1693_vm3, %v1676_v38  ;;  %v1621_v41 = vpop.permute.xlu2 %1620  ;;  %v2083_v38 = vrot.slane %v2081_v35, 5 }
 0x1ff   : > { %v1733_v40 = vpop.permute.xlu0 %1732 }
 0x200   : > { %1754 = vst.msk [vmem:[#allocation4 + $0xc] sm:$0xf] %vm1750_vm0, %v1733_v40  ;;  %v2088_v40 = vrot.slane %v2086_v36, 4  ;;  %v3199_v36 = vld [vmem:[%s3466_s14 + $0x24] sm:$0x1] }
 0x201   : > { %1812 = vst.msk [vmem:[#allocation4 + $0xc] sm:$0xf] %vm1808_vm15, %v1791_v22 }
 0x205   : > { %v1789_v42 = vpop.permute.xlu1 %1788 }
 0x206   : > { %1811 = vst.msk [vmem:[#allocation4 + $0x8] sm:$0xf] %vm1808_vm15, %v1789_v42  ;;  %v1680_v45 = vpop.permute.xlu2 %1679  ;;  %v3195_v42 = vld [vmem:[%s3466_s14 + $0x14] sm:$0x1] }
 0x207   : > { %v1846_v44 = vpop.permute.xlu0 %1845 }
 0x208   : > { %1868 = vst.msk [vmem:[#allocation4 + $0x8] sm:$0xf] %vm1865_vm14, %v1846_v44  ;;  %v4163_v44 = vld [vmem:[%s4443_s5] ss:$0 sm:$0xff] }
 0x209   : > { %1925 = vst.msk [vmem:[#allocation4 + $0x8] sm:$0xf] %vm1922_vm13, %v1903_v26  ;;  %v2325_v26 = vpack.c.bf16 %v2317_v21, %v2317_v21 }
 0x20b   : > { %2341 = vrot.lane.b32.xlu2 %v2325_v26, %s3390_s15  ;;  %v3323_v26 = vld [vmem:[%s4444_s6 + $0x40] sm:$0xff] }
 0x20c   : > { %2846 = vmatpush.bf16.msrb.mxu1 %v3323_v26 }
 0x20d   : > { %v1507_v48 = vpop.permute.xlu1 %1506 }
 0x20e   : > { %1527 = vst.msk [vmem:[#allocation4 + $0x10] sm:$0xf] %vm1522_vm2, %v1507_v48  ;;  %v1793_v51 = vpop.permute.xlu2 %1792 }
 0x20f   : > { %v1564_v49 = vpop.permute.xlu0 %1563 }
 0x210   : > { %1584 = vst.msk [vmem:[#allocation4 + $0x10] sm:$0xf] %vm1579_vm1, %v1564_v49  ;;  %v2095_v49 = vshll.u32 %v3195_v42, 16 }
 0x211   : > { %1641 = vst.msk [vmem:[#allocation4 + $0x10] sm:$0xf] %vm1636_vm4, %v1621_v41  ;;  %v2091_v41 = vrot.slane %v2089_v23, 5 }
 0x213   : > { %v2092_v48 = vor.u32 %v2091_v41, %v2088_v40 }
 0x215   : > { %v1848_v52 = vpop.permute.xlu1 %1847 }
 0x216   : > { %1869 = vst.msk [vmem:[#allocation4 + $0xc] sm:$0xf] %vm1865_vm14, %v1848_v52  ;;  %v1511_v54 = vpop.permute.xlu2 %1510  ;;  %v4167_v52 = vstv %s3191_s30 }
 0x217   : > { %v1905_v14 = vpop.permute.xlu0 %1904  ;;  %1529 = vst.msk [vmem:[#allocation4 + $0x18] sm:$0xf] %vm1522_vm2, %v1511_v54 }
 0x218   : > { %1926 = vst.msk [vmem:[#allocation4 + $0xc] sm:$0xf] %vm1922_vm13, %v1905_v14 }
 0x21d   : > { %v1566_v55 = vpop.permute.xlu1 %1565 }
 0x21e   : > { %1585 = vst.msk [vmem:[#allocation4 + $0x14] sm:$0xf] %vm1579_vm1, %v1566_v55  ;;  %v1852_v0 = vpop.permute.xlu2 %1851 }
 0x21f   : > { %v1735_v56 = vpop.permute.xlu0 %1734  ;;  %v3302_v20 = vld [vmem:[#allocation4 + $0x8] sm:$0xff] }
 0x220   : > { %3188 = vmatmul.msk.bf16.gmra.mxu2 %vm1983_vm12, %v3302_v20  ;;  %v2097_v20 = vrot.slane %v2095_v49, 5 }
 0x225   : > { %v1678_v57 = vpop.permute.xlu1 %1677 }
 0x226   : > { %1698 = vst.msk [vmem:[#allocation4 + $0x10] sm:$0xf] %vm1693_vm3, %v1678_v57  ;;  %v1570_v46 = vpop.permute.xlu2 %1569 }
 0x227   : > { %v1623_v58 = vpop.permute.xlu0 %1622  ;;  %1755 = vst.msk [vmem:[#allocation4 + $0x10] sm:$0xf] %vm1750_vm0, %v1735_v56  ;;  %v2093_v56 = vrot.slane %v2092_v48, 4 }
 0x228   : > { %1813 = vst.msk [vmem:[#allocation4 + $0x10] sm:$0xf] %vm1808_vm15, %v1793_v51 }
 0x229   : > { %1642 = vst.msk [vmem:[#allocation4 + $0x14] sm:$0xf] %vm1636_vm4, %v1623_v58 }
 0x22a   : > { %1699 = vst.msk [vmem:[#allocation4 + $0x14] sm:$0xf] %vm1693_vm3, %v1680_v45 }
 0x22d   : > { %v1737_v59 = vpop.permute.xlu1 %1736 }
 0x22e   : > { %1756 = vst.msk [vmem:[#allocation4 + $0x14] sm:$0xf] %vm1750_vm0, %v1737_v59  ;;  %v1682_v3 = vpop.permute.xlu2 %1681 }
 0x22f   : > { %v1907_v60 = vpop.permute.xlu0 %1906 }
 0x235   : > { %v1850_v61 = vpop.permute.xlu1 %1849 }
 0x236   : > { %1870 = vst.msk [vmem:[#allocation4 + $0x10] sm:$0xf] %vm1865_vm14, %v1850_v61  ;;  %v1741_v6 = vpop.permute.xlu2 %1740 }
 0x237   : > { %v1795_v63 = vpop.permute.xlu0 %1794  ;;  %1927 = vst.msk [vmem:[#allocation4 + $0x10] sm:$0xf] %vm1922_vm13, %v1907_v60 }
 0x238   : > { %1814 = vst.msk [vmem:[#allocation4 + $0x14] sm:$0xf] %vm1808_vm15, %v1795_v63 }
 0x239   : > { %1871 = vst.msk [vmem:[#allocation4 + $0x14] sm:$0xf] %vm1865_vm14, %v1852_v0  ;;  %v2098_v0 = vsel %vm3487_vm5, %v2093_v56, %v2097_v20 }
 0x23a   : > { %v2192_v61 = vunpack.c.l.bf16 %v2098_v0 }
 0x23d   : > { %v1568_v1 = vpop.permute.xlu1 %1567 }
 0x23e   : > { %1586 = vst.msk [vmem:[#allocation4 + $0x18] sm:$0xf] %vm1579_vm1, %v1568_v1  ;;  %v1854_v12 = vpop.permute.xlu2 %1853 }
 0x23f   : > { %v1513_v2 = vpop.permute.xlu0 %1512 }
 0x240   : > { %1530 = vst.msk [vmem:[#allocation4 + $0x1c] sm:$0xf] %vm1522_vm2, %v1513_v2 }
 0x241   : > { %1587 = vst.msk [vmem:[#allocation4 + $0x1c] sm:$0xf] %vm1579_vm1, %v1570_v46 }
 0x245   : > { %v1909_v4 = vpop.permute.xlu1 %1908 }
 0x246   : > { %1928 = vst.msk [vmem:[#allocation4 + $0x14] sm:$0xf] %vm1922_vm13, %v1909_v4  ;;  %v1913_v17 = vpop.permute.xlu2 %1912 }
 0x247   : > { %v1625_v5 = vpop.permute.xlu0 %1624 }
 0x248   : > { %1643 = vst.msk [vmem:[#allocation4 + $0x18] sm:$0xf] %vm1636_vm4, %v1625_v5 }
 0x249   : > { %1700 = vst.msk [vmem:[#allocation4 + $0x18] sm:$0xf] %vm1693_vm3, %v1682_v3 }
 0x24d   : > { %v1739_v8 = vpop.permute.xlu1 %1738  ;;  %v3303_v10 = vld [vmem:[#allocation4 + $0x10] sm:$0xff] }
 0x24e   : > { %1757 = vst.msk [vmem:[#allocation4 + $0x18] sm:$0xf] %vm1750_vm0, %v1739_v8  ;;  %3189 = vmatmul.msk.bf16.gmra.mxu2 %vm1983_vm12, %v3303_v10 }
 0x24f   : > { %v1684_v11 = vpop.permute.xlu0 %1683 }
 0x255   : > { %v1627_v13 = vpop.permute.xlu1 %1626 }
 0x256   : > { %1644 = vst.msk [vmem:[#allocation4 + $0x1c] sm:$0xf] %vm1636_vm4, %v1627_v13 }
 0x257   : > { %v1797_v15 = vpop.permute.xlu0 %1796  ;;  %1701 = vst.msk [vmem:[#allocation4 + $0x1c] sm:$0xf] %vm1693_vm3, %v1684_v11  ;;  %vm4455_vm3 = vcmask 781952  }
 0x258   : > { %1758 = vst.msk [vmem:[#allocation4 + $0x1c] sm:$0xf] %vm1750_vm0, %v1741_v6 }
 0x259   : > { %1815 = vst.msk [vmem:[#allocation4 + $0x18] sm:$0xf] %vm1808_vm15, %v1797_v15  ;;  %v3196_v15 = vld [vmem:[%s3466_s14 + $0x18] sm:$0xf] }
 0x25a   : > { %1816 = vst.msk [vmem:[#allocation4 + $0x1c] sm:$0xf] %vm1808_vm15, %v4047_v43  ;;  %v2072_v43 = vshrl.u32 %v3192_v62, 16  ;;  %vm4456_vm15 = vmmov %vm4455_vm3 }
 0x25b   : > { %1872 = vst.msk [vmem:[#allocation4 + $0x18] sm:$0xf] %vm1865_vm14, %v1854_v12 }
 0x25c   : > { %v2074_v31 = vrot.slane %v2072_v43, 4  ;;  %v3198_v43 = vld [vmem:[%s3466_s14 + $0x20] sm:$0xf] }
 0x25d   : > { %v1911_v16 = vpop.permute.xlu1 %1910 }
 0x25e   : > { %1929 = vst.msk [vmem:[#allocation4 + $0x18] sm:$0xf] %vm1922_vm13, %v1911_v16  ;;  %v2078_v22 = vor.u32 %v2077_v32, %v2074_v31  ;;  %v2114_v31 = vshrl.u32 %v3198_v43, 16  ;;  %v2117_v32 = vshll.u32 %v3198_v43, 16 }
 0x25f   : > { %v1856_v19 = vpop.permute.xlu0 %1855 }
 0x260   : > { %1873 = vst.msk [vmem:[#allocation4 + $0x1c] sm:$0xf] %vm1865_vm14, %v1856_v19  ;;  %v2079_v37 = vrot.slane %v2078_v22, 4  ;;  %v2103_v19 = vshll.u32 %v3196_v15, 16  ;;  %v2116_v22 = vrot.slane %v2114_v31, 4  ;;  %v2119_v35 = vrot.slane %v2117_v32, 5 }
 0x261   : > { %1930 = vst.msk [vmem:[#allocation4 + $0x1c] sm:$0xf] %vm1922_vm13, %v1913_v17  ;;  %v2100_v17 = vshrl.u32 %v3196_v15, 16 }
 0x262   : > { %v2084_v45 = vsel %vm3487_vm5, %v2079_v37, %v2083_v38  ;;  %v2105_v62 = vrot.slane %v2103_v19, 5  ;;  %v2120_v37 = vor.u32 %v2119_v35, %v2116_v22  ;;  %v2123_v38 = vshll.u32 %v3199_v36, 16 }
 0x263   : > { %v2191_v54 = vunpack.c.l.bf16 %v2084_v45  ;;  %v2102_v7 = vrot.slane %v2100_v17, 4 }
 0x264   : > { %v2121_v48 = vrot.slane %v2120_v37, 4  ;;  %v2125_v49 = vrot.slane %v2123_v38, 5 }
 0x265   : > { %v2106_v28 = vor.u32 %v2105_v62, %v2102_v7  ;;  %v3202_v7 = vld [vmem:[%s3466_s14 + $0x30] sm:$0xf] }
 0x266   : > { %v2145_v43 = vshll.u32 %v3202_v7, 16 }
 0x267   : > { %v2107_v33 = vrot.slane %v2106_v28, 4  ;;  %v2286_v38 = vpop.permute.xlu0 %2285 }
 0x268   : > { %v3304_v29 = vld [vmem:[#allocation4 + $0x18] sm:$0xff]  ;;  %v2147_v32 = vrot.slane %v2145_v43, 5  ;;  %2309 = vst.msk [vmem:[#allocation2] sm:$0xf] %vm493_vm8, %v2286_v38 }
 0x269   : > { %3190 = vmatmul.msk.bf16.gmra.mxu2 %vm1983_vm12, %v3304_v29  ;;  %v2109_v29 = vshll.u32 %v3197_v27, 16  ;;  %v2142_v27 = vshrl.u32 %v3202_v7, 16  ;;  %v3207_v7 = vld [vmem:[%s3466_s14 + $0x44] sm:$0x1] }
 0x26b   : > { %v2111_v34 = vrot.slane %v2109_v29, 5  ;;  %v2144_v31 = vrot.slane %v2142_v27, 4 }
 0x26d   : > { %v2112_v23 = vsel %vm3487_vm5, %v2107_v33, %v2111_v34  ;;  %v3203_v33 = vld [vmem:[%s3466_s14 + $0x34] sm:$0x1]  ;;  %v2148_v22 = vor.u32 %v2147_v32, %v2144_v31 }
 0x26e   : > { %v2193_v42 = vunpack.c.l.bf16 %v2112_v23  ;;  %v2151_v35 = vshll.u32 %v3203_v33, 16  ;;  %v2179_v33 = vshll.u32 %v3207_v7, 16 }
 0x270   : > { %v2181_v38 = vrot.slane %v2179_v33, 5 }
 0x274   : > { %v2009_v51 = vpop.f32.mrf.mxu2 }
 0x275   : > { %v2010_v14 = vadd.f32 %v4163_v44, %v2009_v51 }
 0x277   : > { %vm2030_vm12 = vcmp.ge.f32.partialorder %v2010_v14, 0.0  ;;  %v2039_v55 = vmul.f32 %v4167_v52, %v2010_v14 }
 0x279   : > { %v2047_v57 = vsel %vm2030_vm12, %v2010_v14, %v2039_v55 }
 0x27a   : > { %v2199_v58 = vsub.f32 %v2047_v57, %v2191_v54  ;;  %v2126_v54 = vsel %vm3487_vm5, %v2121_v48, %v2125_v49 }
 0x27b   : > { %v2194_v20 = vunpack.c.l.bf16 %v2126_v54 }
 0x27c   : > { %2229 = vst.msk [vmem:[#allocation5 + $0x11] sm:$0xff] %vm1321_vm7, %v2199_v58  ;;  %v2011_v59 = vpop.f32.mrf.mxu2 }
 0x27d   : > { %v2012_v60 = vadd.f32 %v4163_v44, %v2011_v59 }
 0x27f   : > { %vm2031_vm13 = vcmp.ge.f32.partialorder %v2012_v60, 0.0  ;;  %v2040_v63 = vmul.f32 %v4167_v52, %v2012_v60 }
 0x281   : > { %v2048_v46 = vsel %vm2031_vm13, %v2012_v60, %v2040_v63  ;;  %vm4459_vm13 = vcmask 1044352  }
 0x282   : > { %v2200_v1 = vsub.f32 %v2048_v46, %v2192_v61 }
 0x283   : > { %v2485_v2 = vld [vmem:[#allocation5 + $0x12] sm:$0xff] }
 0x284   : > { %v2262_v3 = vld [vmem:[#allocation5 + $0x11] sm:$0xff]  ;;  %2230 = vst.msk [vmem:[#allocation5 + $0x21] sm:$0xff] %vm1321_vm7, %v2200_v1  ;;  %v2493_v5 = vpack.c.bf16 %v2485_v2, %v2485_v2 }
 0x285   : > { %v2373_v4 = vld [vmem:[#allocation5 + $0x10] sm:$0xff]  ;;  %v2270_v6 = vpack.c.bf16 %v2262_v3, %v2262_v3 }
 0x286   : > { %v2381_v8 = vpack.c.bf16 %v2373_v4, %v2373_v4  ;;  %2509 = vrot.lane.b32.xlu2 %v2493_v5, %s3395_s20  ;;  %2343 = vrot.lane.b32.xlu0 %v2493_v5, %s3390_s15 }
 0x287   : > { %2287 = vrot.lane.b32.xlu1 %v2270_v6, %s3391_s16 }
 0x288   : > { %2254 = vst.msk [vmem:[#allocation2 + $0x8] sm:$0xf] %vm329_vm6, %v2381_v8 }
 0x28b   : > { %v2654_v10 = vld [vmem:[#allocation5 + $0x22] sm:$0xff] }
 0x28c   : > { %v2374_v11 = vld [vmem:[#allocation5 + $0x20] sm:$0xff]  ;;  %v2662_v12 = vpack.c.bf16 %v2654_v10, %v2654_v10 }
 0x28d   : > { %v2382_v13 = vpack.c.bf16 %v2374_v11, %v2374_v11  ;;  %v2263_v16 = vld [vmem:[#allocation5 + $0x21] sm:$0xff] }
 0x28e   : > { %2670 = vst.msk [vmem:[#allocation2 + $0x4] sm:$0xf] %vm329_vm6, %v2662_v12  ;;  %2453 = vrot.lane.b32.xlu0 %v2270_v6, %s3393_s18  ;;  %v2271_v21 = vpack.c.bf16 %v2263_v16, %v2263_v16  ;;  %v3200_v11 = vld [vmem:[%s3466_s14 + $0x28] sm:$0xf] }
 0x28f   : > { %2399 = vrot.lane.b32.xlu2 %v2382_v13, %s3392_s17  ;;  %2397 = vrot.lane.b32.xlu1 %v2381_v8, %s3392_s17  ;;  %2255 = vst.msk [vmem:[#allocation2 + $0x10] sm:$0xf] %vm329_vm6, %v2382_v13  ;;  %v2131_v15 = vshll.u32 %v3200_v11, 16 }
 0x291   : > { %v2133_v19 = vrot.slane %v2131_v15, 5 }
 0x295   : > { %v3307_v6 = vld [vmem:[#allocation2 + $0x4] sm:$0xf] }
 0x296   : > { %2511 = vrot.lane.b32.xlu0 %v2662_v12, %s3395_s20 }
 0x297   : > { %2289 = vrot.lane.b32.xlu2 %v2271_v21, %s3391_s16  ;;  %2455 = vrot.lane.b32.xlu1 %v2271_v21, %s3393_s18 }
 0x29e   : > { %2622 = vrot.lane.b32.xlu0 %v2271_v21, %s3396_s21  ;;  %v3201_v21 = vld [vmem:[%s3466_s14 + $0x2c] sm:$0x1] }
 0x29f   : > { %2566 = vrot.lane.b32.xlu1 %v2382_v13, %s3394_s19  ;;  %v2128_v13 = vshrl.u32 %v3200_v11, 16  ;;  %v2137_v26 = vshll.u32 %v3201_v21, 16 }
 0x2a1   : > { %v2130_v17 = vrot.slane %v2128_v13, 4  ;;  %v2139_v29 = vrot.slane %v2137_v26, 5 }
 0x2a3   : > { %v2014_v40 = vpop.f32.mrf.mxu2  ;;  %v2134_v62 = vor.u32 %v2133_v19, %v2130_v17 }
 0x2a4   : > { %v2015_v41 = vadd.f32 %v4163_v44, %v2014_v40 }
 0x2a5   : > { %v2135_v28 = vrot.slane %v2134_v62, 4 }
 0x2a6   : > { %vm2032_vm14 = vcmp.ge.f32.partialorder %v2015_v41, 0.0  ;;  %v2041_v45 = vmul.f32 %v4167_v52, %v2015_v41 }
 0x2a7   : > { %2345 = vrot.lane.b32.xlu1 %v2662_v12, %s3390_s15  ;;  %v2140_v34 = vsel %vm3487_vm5, %v2135_v28, %v2139_v29 }
 0x2a8   : > { %v2049_v51 = vsel %vm2032_vm14, %v2015_v41, %v2041_v45  ;;  %v2195_v37 = vunpack.c.l.bf16 %v2140_v34  ;;  %v2342_v41 = vpop.permute.xlu2 %2341  ;;  %v2153_v45 = vrot.slane %v2151_v35, 5  ;;  %vm4461_vm14 = vmmov %vm4455_vm3 }
 0x2a9   : > { %v2201_v14 = vsub.f32 %v2049_v51, %v2193_v42  ;;  %v2149_v42 = vrot.slane %v2148_v22, 4  ;;  %2365 = vst.msk [vmem:[#allocation2] sm:$0xf] %vm593_vm9, %v2342_v41  ;;  %v3204_v51 = vld [vmem:[%s3466_s14 + $0x38] sm:$0xf] }
 0x2ab   : > { %2231 = vst.msk [vmem:[#allocation5 + $0x31] sm:$0xff] %vm1321_vm7, %v2201_v14  ;;  %v2016_v55 = vpop.f32.mrf.mxu2  ;;  %v2154_v14 = vsel %vm3487_vm5, %v2149_v42, %v2153_v45 }
 0x2ac   : > { %v2017_v56 = vadd.f32 %v4163_v44, %v2016_v55 }
 0x2ae   : > { %vm2033_vm0 = vcmp.ge.f32.partialorder %v2017_v56, 0.0  ;;  %v2042_v57 = vmul.f32 %v4167_v52, %v2017_v56 }
 0x2b0   : > { %v2050_v58 = vsel %vm2033_vm0, %v2017_v56, %v2042_v57  ;;  %v2156_v56 = vshrl.u32 %v3204_v51, 16  ;;  %v2196_v57 = vunpack.c.l.bf16 %v2154_v14  ;;  %vm4462_vm0 = vmmov %vm4455_vm3 }
 0x2b1   : > { %v2202_v0 = vsub.f32 %v2050_v58, %v2194_v20  ;;  %v2159_v20 = vshll.u32 %v3204_v51, 16  ;;  %v3322_v51 = vld [vmem:[%s4444_s6 + $0x38] sm:$0xff] }
 0x2b2   : > { %v2655_v59 = vld [vmem:[#allocation5 + $0x32] sm:$0xff]  ;;  %2810 = vmatpush.bf16.msra.mxu3 %v3322_v51 }
 0x2b3   : > { %v2543_v60 = vld [vmem:[#allocation5 + $0x30] sm:$0xff]  ;;  %v2663_v63 = vpack.c.bf16 %v2655_v59, %v2655_v59  ;;  %2232 = vst.msk [vmem:[#allocation5 + $0x41] sm:$0xff] %vm1321_vm7, %v2202_v0  ;;  %v2158_v59 = vrot.slane %v2156_v56, 4 }
 0x2b4   : > { %v2264_v61 = vld [vmem:[#allocation5 + $0x31] sm:$0xff]  ;;  %v2551_v46 = vpack.c.bf16 %v2543_v60, %v2543_v60  ;;  %v2161_v60 = vrot.slane %v2159_v20, 5 }
 0x2b5   : > { %v2272_v1 = vpack.c.bf16 %v2264_v61, %v2264_v61  ;;  %2671 = vst.msk [vmem:[#allocation2 + $0xc] sm:$0xf] %vm329_vm6, %v2663_v63 }
 0x2b6   : > { %2568 = vrot.lane.b32.xlu2 %v2551_v46, %s3394_s19  ;;  %2256 = vst.msk [vmem:[#allocation2 + $0x18] sm:$0xf] %vm329_vm6, %v2551_v46  ;;  %2811 = vmatpush.bf16.msra.mxu3 %v3321_v25 }
 0x2b7   : > { %2291 = vrot.lane.b32.xlu0 %v2272_v1, %s3391_s16  ;;  %2624 = vrot.lane.b32.xlu1 %v2272_v1, %s3396_s21 }
 0x2ba   : > { %v2376_v2 = vld [vmem:[#allocation5 + $0x40] sm:$0xff] }
 0x2bb   : > { %v2488_v3 = vld [vmem:[#allocation5 + $0x42] sm:$0xff]  ;;  %v2384_v4 = vpack.c.bf16 %v2376_v2, %v2376_v2 }
 0x2bc   : > { %v2496_v5 = vpack.c.bf16 %v2488_v3, %v2488_v3  ;;  %v3212_v8 = vld [vmem:[#allocation2 + $0x8] sm:$0xf0]  ;;  %v2432_v12 = vld [vmem:[#allocation5 + $0x41] sm:$0xff] }
 0x2bd   : > { %v3215_v10 = vor.u32 %v3307_v6, %v3212_v8  ;;  %2257 = vst.msk [vmem:[#allocation2 + $0x20] sm:$0xf] %vm329_vm6, %v2384_v4  ;;  %v2440_v16 = vpack.c.bf16 %v2432_v12, %v2432_v12 }
 0x2be   : > { %2347 = vrot.lane.b32.xlu2 %v2663_v63, %s3390_s15  ;;  %2672 = vst.msk [vmem:[#allocation2 + $0x14] sm:$0xf] %vm329_vm6, %v2496_v5 }
 0x2bf   : > { %2401 = vrot.lane.b32.xlu0 %v2551_v46, %s3392_s17  ;;  %2513 = vrot.lane.b32.xlu1 %v2663_v63, %s3395_s20  ;;  %v3205_v46 = vld [vmem:[%s3466_s14 + $0x3c] sm:$0x1] }
 0x2c0   : > { %3276 = vmatmul.msk.bf16.vlgmr.msrb.gmra.mxu1 %vm1321_vm7, %v3215_v10  ;;  %v2162_v10 = vor.u32 %v2161_v60, %v2158_v59  ;;  %v2165_v11 = vshll.u32 %v3205_v46, 16  ;;  %v3319_v46 = vld [vmem:[%s4444_s6 + $0x20] sm:$0xff] }
 0x2c2   : > { %v2163_v15 = vrot.slane %v2162_v10, 4  ;;  %v3317_v10 = vld [vmem:[%s4444_s6 + $0x10] sm:$0xff] }
 0x2c5   : > { %v3309_v29 = vld [vmem:[#allocation2 + $0x14] sm:$0xf] }
 0x2c6   : > { %2457 = vrot.lane.b32.xlu2 %v2272_v1, %s3393_s18  ;;  %v3206_v1 = vld [vmem:[%s3466_s14 + $0x40] sm:$0xf] }
 0x2c7   : > { %2459 = vrot.lane.b32.xlu0 %v2440_v16, %s3393_s18  ;;  %2403 = vrot.lane.b32.xlu1 %v2384_v4, %s3392_s17  ;;  %v2170_v12 = vshrl.u32 %v3206_v1, 16  ;;  %v2173_v13 = vshll.u32 %v3206_v1, 16 }
 0x2c9   : > { %v2172_v17 = vrot.slane %v2170_v12, 4  ;;  %v2175_v19 = vrot.slane %v2173_v13, 5 }
 0x2cb   : > { %v2176_v32 = vor.u32 %v2175_v19, %v2172_v17  ;;  %v3315_v17 = vld [vmem:[%s4444_s6] sm:$0xff] }
 0x2ce   : > { %2515 = vrot.lane.b32.xlu2 %v2496_v5, %s3395_s20 }
 0x2cf   : > { %2570 = vrot.lane.b32.xlu0 %v2384_v4, %s3394_s19  ;;  %2293 = vrot.lane.b32.xlu1 %v2440_v16, %s3391_s16 }
 0x2d1   : > { %v2019_v36 = vpop.f32.mrf.mxu2 }
 0x2d2   : > { %v2020_v23 = vadd.f32 %v4163_v44, %v2019_v36 }
 0x2d4   : > { %vm2034_vm2 = vcmp.ge.f32.partialorder %v2020_v23, 0.0  ;;  %v2043_v40 = vmul.f32 %v4167_v52, %v2020_v23 }
 0x2d6   : > { %2626 = vrot.lane.b32.xlu2 %v2440_v16, %s3396_s21  ;;  %v2051_v48 = vsel %vm2034_vm2, %v2020_v23, %v2043_v40  ;;  %v2167_v16 = vrot.slane %v2165_v11, 5 }
 0x2d7   : > { %2349 = vrot.lane.b32.xlu0 %v2496_v5, %s3390_s15  ;;  %v2203_v49 = vsub.f32 %v2051_v48, %v2195_v37  ;;  %v2177_v37 = vrot.slane %v2176_v32, 4 }
 0x2d8   : > { %v2168_v28 = vsel %vm3487_vm5, %v2163_v15, %v2167_v16  ;;  %v3316_v16 = vld [vmem:[%s4444_s6 + $0x8] sm:$0xff] }
 0x2d9   : > { %2233 = vst.msk [vmem:[#allocation5 + $0x51] sm:$0xff] %vm1321_vm7, %v2203_v49  ;;  %v2021_v54 = vpop.f32.mrf.mxu2  ;;  %v2197_v36 = vunpack.c.l.bf16 %v2168_v28  ;;  %v2182_v49 = vsel %vm3487_vm5, %v2177_v37, %v2181_v38 }
 0x2da   : > { %v2022_v55 = vadd.f32 %v4163_v44, %v2021_v54 }
 0x2dc   : > { %vm2035_vm1 = vcmp.ge.f32.partialorder %v2022_v55, 0.0  ;;  %v2044_v58 = vmul.f32 %v4167_v52, %v2022_v55 }
 0x2de   : > { %v2052_v0 = vsel %vm2035_vm1, %v2022_v55, %v2044_v58  ;;  %v2198_v55 = vunpack.c.l.bf16 %v2182_v49 }
 0x2df   : > { %v2204_v61 = vsub.f32 %v2052_v0, %v2196_v57 }
 0x2e0   : > { %v4244_v63 = vpop.permute.xlu2 %2509  ;;  %v2266_v2 = vld [vmem:[#allocation5 + $0x51] sm:$0xff] }
 0x2e1   : > { %v2545_v3 = vld [vmem:[#allocation5 + $0x50] sm:$0xff]  ;;  %2234 = vst.msk [vmem:[#allocation5 + $0x61] sm:$0xff] %vm1321_vm7, %v2204_v61  ;;  %v2274_v5 = vpack.c.bf16 %v2266_v2, %v2266_v2 }
 0x2e2   : > { %v2489_v4 = vld [vmem:[#allocation5 + $0x52] sm:$0xff]  ;;  %v2553_v6 = vpack.c.bf16 %v2545_v3, %v2545_v3 }
 0x2e3   : > { %v2497_v8 = vpack.c.bf16 %v2489_v4, %v2489_v4  ;;  %2295 = vrot.lane.b32.xlu2 %v2274_v5, %s3391_s16  ;;  %2628 = vrot.lane.b32.xlu0 %v2274_v5, %s3396_s21  ;;  %v3318_v3 = vld [vmem:[%s4444_s6 + $0x18] sm:$0xff] }
 0x2e4   : > { %2572 = vrot.lane.b32.xlu1 %v2553_v6, %s3394_s19  ;;  %2258 = vst.msk [vmem:[#allocation2 + $0x28] sm:$0xf] %vm329_vm6, %v2553_v6 }
 0x2e5   : > { %2673 = vst.msk [vmem:[#allocation2 + $0x1c] sm:$0xf] %vm329_vm6, %v2497_v8 }
 0x2e8   : > { %v2378_v62 = vld [vmem:[#allocation5 + $0x60] sm:$0xff] }
 0x2e9   : > { %v2400_v21 = vpop.permute.xlu2 %2399  ;;  %v2490_v26 = vld [vmem:[#allocation5 + $0x62] sm:$0xff]  ;;  %v2386_v27 = vpack.c.bf16 %v2378_v62, %v2378_v62 }
 0x2ea   : > { %v4255_v43 = vpack.c.bf16 %v2490_v26, %v2490_v26  ;;  %v2434_v40 = vld [vmem:[#allocation5 + $0x61] sm:$0xff]  ;;  %v3236_v26 = vld [vmem:[#allocation2 + $0x38] sm:$0xf0] }
 0x2eb   : > { %2405 = vrot.lane.b32.xlu2 %v2553_v6, %s3392_s17  ;;  %2517 = vrot.lane.b32.xlu0 %v2497_v8, %s3395_s20  ;;  %2259 = vst.msk [vmem:[#allocation2 + $0x30] sm:$0xf] %vm329_vm6, %v2386_v27  ;;  %v2442_v48 = vpack.c.bf16 %v2434_v40, %v2434_v40 }
 0x2ec   : > { %v3220_v31 = vld [vmem:[#allocation2 + $0x18] sm:$0xf0]  ;;  %v2024_v34 = vpop.f32.mrf.mxu2  ;;  %2674 = vst.msk [vmem:[#allocation2 + $0x24] sm:$0xf] %vm329_vm6, %v4255_v43  ;;  %2351 = vrot.lane.b32.xlu1 %v2497_v8, %s3390_s15 }
 0x2ed   : > { %v3223_v22 = vor.u32 %v3309_v29, %v3220_v31  ;;  %v2025_v35 = vadd.f32 %v4163_v44, %v2024_v34 }
 0x2ef   : > { %3277 = vmatmul.msk.bf16.gmra.mxu1 %vm1321_vm7, %v3223_v22  ;;  %vm2036_vm4 = vcmp.ge.f32.partialorder %v2025_v35, 0.0  ;;  %v2045_v23 = vmul.f32 %v4167_v52, %v2025_v35  ;;  %v2549_v22 = vld [vmem:[#allocation5 + $0x90] sm:$0xff] }
 0x2f1   : > { %v2290_v41 = vpop.permute.xlu2 %2289  ;;  %v2053_v42 = vsel %vm2036_vm4, %v2025_v35, %v2045_v23  ;;  %v2557_v35 = vpack.c.bf16 %v2549_v22, %v2549_v22 }
 0x2f2   : > { %2311 = vst.msk [vmem:[#allocation2 + $0x10] sm:$0xf] %vm493_vm8, %v2290_v41  ;;  %v2205_v45 = vsub.f32 %v2053_v42, %v2197_v36  ;;  %v2605_v36 = vld [vmem:[#allocation5 + $0x91] sm:$0xff] }
 0x2f3   : > { %2463 = vrot.lane.b32.xlu2 %v2442_v48, %s3393_s18  ;;  %2407 = vrot.lane.b32.xlu0 %v2386_v27, %s3392_s17  ;;  %v3311_v6 = vld [vmem:[#allocation2 + $0x24] sm:$0xf]  ;;  %v2613_v38 = vpack.c.bf16 %v2605_v36, %v2605_v36 }
 0x2f4   : > { %2235 = vst.msk [vmem:[#allocation5 + $0x71] sm:$0xff] %vm1321_vm7, %v2205_v45  ;;  %v2026_v14 = vpop.f32.mrf.mxu2  ;;  %2461 = vrot.lane.b32.xlu1 %v2274_v5, %s3393_s18 }
 0x2f5   : > { %v2027_v54 = vadd.f32 %v4163_v44, %v2026_v14  ;;  %v3320_v44 = vld [vmem:[%s4444_s6 + $0x28] sm:$0xff] }
 0x2f6   : > { %2812 = vmatpush.bf16.msra.mxu3 %v3320_v44 }
 0x2f7   : > { %vm2037_vm5 = vcmp.ge.f32.partialorder %v2027_v54, 0.0  ;;  %v2046_v56 = vmul.f32 %v4167_v52, %v2027_v54 }
 0x2f8   : > { %v2344_v20 = vpop.permute.xlu0 %2343 }
 0x2f9   : > { %v2054_v57 = vsel %vm2037_vm5, %v2027_v54, %v2046_v56  ;;  %v2288_v58 = vpop.permute.xlu1 %2287 }
 0x2fa   : > { %v2206_v0 = vsub.f32 %v2054_v57, %v2198_v55  ;;  %2310 = vst.msk [vmem:[#allocation2 + $0x8] sm:$0xf] %vm493_vm8, %v2288_v58  ;;  %2813 = vmatpush.bf16.msra.mxu3 %v3319_v46 }
 0x2fb   : > { %2366 = vst.msk [vmem:[#allocation2 + $0x8] sm:$0xf] %vm593_vm9, %v2344_v20  ;;  %v2547_v59 = vld [vmem:[#allocation5 + $0x70] sm:$0xff]  ;;  %2574 = vrot.lane.b32.xlu2 %v2386_v27, %s3394_s19  ;;  %2297 = vrot.lane.b32.xlu0 %v2442_v48, %s3391_s16 }
 0x2fc   : > { %v2659_v60 = vld [vmem:[#allocation5 + $0x72] sm:$0xff]  ;;  %2236 = vst.msk [vmem:[#allocation5 + $0x81] sm:$0xff] %vm1321_vm7, %v2206_v0  ;;  %v2555_v52 = vpack.c.bf16 %v2547_v59, %v2547_v59  ;;  %2519 = vrot.lane.b32.xlu1 %v4255_v43, %s3395_s20 }
 0x2fd   : > { %v2667_v61 = vpack.c.bf16 %v2659_v60, %v2659_v60  ;;  %2422 = vst.msk [vmem:[#allocation2 + $0x8] sm:$0xf] %vm643_vm10, %v2400_v21  ;;  %v2603_v12 = vld [vmem:[#allocation5 + $0x71] sm:$0xff] }
 0x2fe   : > { %2260 = vst.msk [vmem:[#allocation2 + $0x38] sm:$0xf] %vm329_vm6, %v2555_v52  ;;  %2814 = vmatpush.bf16.msra.mxu3 %v3318_v3  ;;  %v2611_v15 = vpack.c.bf16 %v2603_v12, %v2603_v12 }
 0x2ff   : > { %2675 = vst.msk [vmem:[#allocation2 + $0x2c] sm:$0xf] %vm329_vm6, %v2667_v61 }
 0x300   : > { %v2454_v1 = vpop.permute.xlu0 %2453 }
 0x301   : > { %v2398_v2 = vpop.permute.xlu1 %2397 }
 0x302   : > { %2421 = vst.msk [vmem:[#allocation2] sm:$0xf] %vm643_vm10, %v2398_v2  ;;  %2815 = vmatpush.bf16.msra.mxu3 %v3317_v10 }
 0x303   : > { %2477 = vst.msk [vmem:[#allocation2] sm:$0xf] %vm804_vm11, %v2454_v1  ;;  %v2660_v4 = vld [vmem:[#allocation5 + $0x82] sm:$0xff]  ;;  %2353 = vrot.lane.b32.xlu2 %v4255_v43, %s3390_s15  ;;  %2576 = vrot.lane.b32.xlu0 %v2555_v52, %s3394_s19 }
 0x304   : > { %2533 = vst.msk [vmem:[#allocation2] sm:$0xf] %vm4455_vm3, %v4244_v63  ;;  %v2668_v5 = vpack.c.bf16 %v2660_v4, %v2660_v4  ;;  %2630 = vrot.lane.b32.xlu1 %v2442_v48, %s3396_s21  ;;  %v2380_v43 = vld [vmem:[#allocation5 + $0x80] sm:$0xff]  ;;  %vm4467_vm3 = vmmov %vm4462_vm0 }
 0x305   : > { %v2436_v29 = vld [vmem:[#allocation5 + $0x81] sm:$0xff]  ;;  %v2388_v32 = vpack.c.bf16 %v2380_v43, %v2380_v43 }
 0x306   : > { %v3228_v8 = vld [vmem:[#allocation2 + $0x28] sm:$0xf0]  ;;  %2676 = vst.msk [vmem:[#allocation2 + $0x34] sm:$0xf] %vm329_vm6, %v2668_v5  ;;  %2816 = vmatpush.bf16.msra.mxu3 %v3316_v16  ;;  %vm4457_vm6 = vcmask 913152   ;;  %v2444_v33 = vpack.c.bf16 %v2436_v29, %v2436_v29 }
 0x307   : > { %v3231_v11 = vor.u32 %v3311_v6, %v3228_v8  ;;  %vm4458_vm12 = vmmov %vm4457_vm6 }
 0x308   : > { %v2512_v63 = vpop.permute.xlu0 %2511  ;;  %vm4463_vm2 = vmmov %vm4457_vm6 }
 0x309   : > { %3278 = vmatmul.msk.bf16.gmra.mxu1 %vm1321_vm7, %v3231_v11  ;;  %v2456_v13 = vpop.permute.xlu1 %2455  ;;  %vm4465_vm4 = vmmov %vm4463_vm2 }
 0x30a   : > { %2478 = vst.msk [vmem:[#allocation2 + $0x8] sm:$0xf] %vm804_vm11, %v2456_v13  ;;  %2817 = vmatpush.bf16.msra.mxu3 %v3315_v17 }
 0x30b   : > { %2534 = vst.msk [vmem:[#allocation2 + $0x8] sm:$0xf] %vm4456_vm15, %v2512_v63  ;;  %2632 = vrot.lane.b32.xlu2 %v2611_v15, %s3396_s21  ;;  %2355 = vrot.lane.b32.xlu0 %v2667_v61, %s3390_s15  ;;  %vm4468_vm15 = vmmov %vm4463_vm2  ;;  %s3280_s15 = sld [smem:[#allocation6 + $0x2]] }
 0x30c   : > { %2299 = vrot.lane.b32.xlu1 %v2611_v15, %s3391_s16 }
 0x30d   : > { %v3313_v62 = vld [vmem:[#allocation2 + $0x34] sm:$0xf] }
 0x30e   : > { %v3239_v27 = vor.u32 %v3313_v62, %v3236_v26 }
 0x310   : > { %v2569_v19 = vpop.permute.xlu2 %2568  ;;  %v2623_v21 = vpop.permute.xlu0 %2622 }
 0x311   : > { %2591 = vst.msk [vmem:[#allocation2 + $0x8] sm:$0xf] %vm4457_vm6, %v2569_v19  ;;  %v2567_v7 = vpop.permute.xlu1 %2566  ;;  %vm4469_vm6 = vmmov %vm4462_vm0 }
 0x312   : > { %2590 = vst.msk [vmem:[#allocation2] sm:$0xf] %vm4458_vm12, %v2567_v7  ;;  %vm4470_vm12 = vmmov %vm4463_vm2 }
 0x313   : > { %2646 = vst.msk [vmem:[#allocation2] sm:$0xf] %vm4459_vm13, %v2623_v21  ;;  %2521 = vrot.lane.b32.xlu2 %v2667_v61, %s3395_s20  ;;  %2465 = vrot.lane.b32.xlu0 %v2611_v15, %s3393_s18 }
 0x314   : > { %2409 = vrot.lane.b32.xlu1 %v2555_v52, %s3392_s17 }
 0x318   : > { %v2348_v28 = vpop.permute.xlu2 %2347 }
 0x319   : > { %3279 = vmatmul.msk.bf16.gmra.mxu1 %vm1321_vm7, %v3239_v27  ;;  %v2346_v31 = vpop.permute.xlu1 %2345  ;;  %vm4460_vm7 = vmmov %vm4459_vm13 }
 0x31a   : > { %2367 = vst.msk [vmem:[#allocation2 + $0x10] sm:$0xf] %vm593_vm9, %v2346_v31  ;;  %v3210_v45 = vld [vmem:[#allocation2] sm:$0xf]  ;;  %vm4464_vm1 = vmmov %vm4460_vm7 }
 0x31b   : > { %2411 = vrot.lane.b32.xlu2 %v2388_v32, %s3392_s17  ;;  %2523 = vrot.lane.b32.xlu0 %v2668_v5, %s3395_s20  ;;  %vm4466_vm5 = vmmov %vm4464_vm1 }
 0x31c   : > { %2467 = vrot.lane.b32.xlu1 %v2444_v33, %s3393_s18  ;;  %vm4471_vm13 = vmmov %vm4464_vm1  ;;  %s3283_s18 = sshll.u32 %s4488_s28, 6 }
 0x320   : > { %v2458_v34 = vpop.permute.xlu2 %2457 }
 0x323   : > { %2634 = vrot.lane.b32.xlu0 %v2444_v33, %s3396_s21  ;;  %2580 = vrot.lane.b32.xlu2 %v2557_v35, %s3394_s19 }
 0x324   : > { %2578 = vrot.lane.b32.xlu1 %v2388_v32, %s3394_s19 }
 0x328   : > { %v2516_v40 = vpop.permute.xlu2 %2515 }
 0x329   : > { %v2292_v23 = vpop.permute.xlu0 %2291  ;;  %v2625_v37 = vpop.permute.xlu1 %2624 }
 0x32a   : > { %2312 = vst.msk [vmem:[#allocation2 + $0x18] sm:$0xf] %vm493_vm8, %v2292_v23  ;;  %v4388_v23 = vstv %s3280_s15 }
 0x32b   : > { %2368 = vst.msk [vmem:[#allocation2 + $0x18] sm:$0xf] %vm593_vm9, %v2348_v28 }
 0x32c   : > { %2647 = vst.msk [vmem:[#allocation2 + $0x8] sm:$0xf] %vm4460_vm7, %v2625_v37  ;;  %2636 = vrot.lane.b32.xlu1 %v2613_v38, %s3396_s21  ;;  %vm4472_vm7 = vmmov %vm4464_vm1  ;;  %s4395_s21 = scalar_lea.vmem %s4446_s8, %s3283_s18 }
 0x330   : > { %v2627_v51 = vpop.permute.xlu2 %2626 }
 0x331   : > { %v2402_v41 = vpop.permute.xlu0 %2401  ;;  %v2514_v42 = vpop.permute.xlu1 %2513 }
 0x332   : > { %2423 = vst.msk [vmem:[#allocation2 + $0x10] sm:$0xf] %vm643_vm10, %v2402_v41 }
 0x333   : > { %2479 = vst.msk [vmem:[#allocation2 + $0x10] sm:$0xf] %vm804_vm11, %v2458_v34  ;;  %v3308_v48 = vld [vmem:[#allocation2 + $0x4] sm:$0xf0]  ;;  %v4385_v34 = vld [vmem:[%s4445_s7] ss:$0 sm:$0xff] }
 0x334   : > { %2535 = vst.msk [vmem:[#allocation2 + $0x10] sm:$0xf] %vm4461_vm14, %v2514_v42  ;;  %v3211_v49 = vor.u32 %v3308_v48, %v3210_v45  ;;  %vm4473_vm14 = vmmov %vm4462_vm0 }
 0x336   : > { %2818 = vmatmul.bf16.vlgmr.msra.gmra.mxu3 %v3211_v49 }
 0x339   : > { %v2460_v14 = vpop.permute.xlu0 %2459  ;;  %v2404_v54 = vpop.permute.xlu1 %2403 }
 0x33a   : > { %2424 = vst.msk [vmem:[#allocation2 + $0x18] sm:$0xf] %vm643_vm10, %v2404_v54 }
 0x33b   : > { %2480 = vst.msk [vmem:[#allocation2 + $0x18] sm:$0xf] %vm804_vm11, %v2460_v14 }
 0x33c   : > { %2536 = vst.msk [vmem:[#allocation2 + $0x18] sm:$0xf] %vm4462_vm0, %v2516_v40 }
 0x33d   : > { %v2296_v25 = vpop.permute.xlu2 %2295  ;;  %v2848_v22 = vpop.f32.mrf.mxu1 }
 0x33e   : > { %2314 = vst.msk [vmem:[#allocation2 + $0x28] sm:$0xf] %vm493_vm8, %v2296_v25 }
 0x341   : > { %v2571_v55 = vpop.permute.xlu0 %2570  ;;  %v2294_v56 = vpop.permute.xlu1 %2293 }
 0x342   : > { %2592 = vst.msk [vmem:[#allocation2 + $0x10] sm:$0xf] %vm4463_vm2, %v2571_v55 }
 0x343   : > { %2648 = vst.msk [vmem:[#allocation2 + $0x10] sm:$0xf] %vm4464_vm1, %v2627_v51 }
 0x344   : > { %2313 = vst.msk [vmem:[#allocation2 + $0x20] sm:$0xf] %vm493_vm8, %v2294_v56 }
 0x345   : > { %v2406_v20 = vpop.permute.xlu2 %2405  ;;  %v2850_v48 = vpop.f32.mrf.mxu1 }
 0x349   : > { %v2350_v57 = vpop.permute.xlu0 %2349 }
 0x34a   : > { %2369 = vst.msk [vmem:[#allocation2 + $0x20] sm:$0xf] %vm593_vm9, %v2350_v57  ;;  %v3218_v61 = vld [vmem:[#allocation2 + $0x10] sm:$0xf] }
 0x34b   : > { %2425 = vst.msk [vmem:[#allocation2 + $0x20] sm:$0xf] %vm643_vm10, %v2406_v20 }
 0x34d   : > { %v2464_v58 = vpop.permute.xlu2 %2463 }
 0x355   : > { %v2629_v0 = vpop.permute.xlu0 %2628  ;;  %v2575_v59 = vpop.permute.xlu2 %2574 }
 0x356   : > { %v2573_v44 = vpop.permute.xlu1 %2572 }
 0x357   : > { %2593 = vst.msk [vmem:[#allocation2 + $0x18] sm:$0xf] %vm4465_vm4, %v2573_v44 }
 0x358   : > { %2649 = vst.msk [vmem:[#allocation2 + $0x18] sm:$0xf] %vm4466_vm5, %v2629_v0 }
 0x35d   : > { %v2518_v60 = vpop.permute.xlu0 %2517  ;;  %v2354_v2 = vpop.permute.xlu2 %2353 }
 0x35e   : > { %v2352_v52 = vpop.permute.xlu1 %2351 }
 0x35f   : > { %2370 = vst.msk [vmem:[#allocation2 + $0x28] sm:$0xf] %vm593_vm9, %v2352_v52  ;;  %v3310_v46 = vld [vmem:[#allocation2 + $0x14] sm:$0xf0] }
 0x360   : > { %v3219_v1 = vor.u32 %v3310_v46, %v3218_v61 }
 0x362   : > { %2823 = vmatmul.bf16.gmra.mxu3 %v3219_v1 }
 0x365   : > { %v2408_v3 = vpop.permute.xlu0 %2407  ;;  %v2633_v5 = vpop.permute.xlu2 %2632 }
 0x366   : > { %2426 = vst.msk [vmem:[#allocation2 + $0x28] sm:$0xf] %vm643_vm10, %v2408_v3  ;;  %v2462_v4 = vpop.permute.xlu1 %2461 }
 0x367   : > { %2482 = vst.msk [vmem:[#allocation2 + $0x28] sm:$0xf] %vm804_vm11, %v2464_v58 }
 0x368   : > { %2481 = vst.msk [vmem:[#allocation2 + $0x20] sm:$0xf] %vm804_vm11, %v2462_v4 }
 0x369   : > { %2537 = vst.msk [vmem:[#allocation2 + $0x20] sm:$0xf] %vm4467_vm3, %v2518_v60 }
 0x36a   : > { %2594 = vst.msk [vmem:[#allocation2 + $0x20] sm:$0xf] %vm4468_vm15, %v2575_v59 }
 0x36c   : > { %v2853_v25 = vpop.f32.mrf.mxu1 }
 0x36d   : > { %v2298_v6 = vpop.permute.xlu0 %2297  ;;  %v2522_v11 = vpop.permute.xlu2 %2521 }
 0x36e   : > { %2315 = vst.msk [vmem:[#allocation2 + $0x30] sm:$0xf] %vm493_vm8, %v2298_v6  ;;  %v2520_v8 = vpop.permute.xlu1 %2519 }
 0x36f   : > { %2371 = vst.msk [vmem:[#allocation2 + $0x30] sm:$0xf] %vm593_vm9, %v2354_v2 }
 0x370   : > { %2538 = vst.msk [vmem:[#allocation2 + $0x28] sm:$0xf] %vm4469_vm6, %v2520_v8 }
 0x374   : > { %v2855_v59 = vpop.f32.mrf.mxu1 }
 0x375   : > { %v2577_v10 = vpop.permute.xlu0 %2576  ;;  %v2412_v17 = vpop.permute.xlu2 %2411 }
 0x376   : > { %2595 = vst.msk [vmem:[#allocation2 + $0x28] sm:$0xf] %vm4470_vm12, %v2577_v10  ;;  %v2631_v12 = vpop.permute.xlu1 %2630 }
 0x377   : > { %2651 = vst.msk [vmem:[#allocation2 + $0x28] sm:$0xf] %vm4471_vm13, %v2633_v5 }
 0x378   : > { %2650 = vst.msk [vmem:[#allocation2 + $0x20] sm:$0xf] %vm4472_vm7, %v2631_v12 }
 0x37d   : > { %v2356_v63 = vpop.permute.xlu0 %2355  ;;  %v2581_v27 = vpop.permute.xlu2 %2580 }
 0x37e   : > { %v2300_v13 = vpop.permute.xlu1 %2299  ;;  %v3312_v15 = vld [vmem:[#allocation2 + $0x24] sm:$0xf0] }
 0x37f   : > { %2316 = vst.msk [vmem:[#allocation2 + $0x38] sm:$0xf] %vm493_vm8, %v2300_v13  ;;  %v3226_v16 = vld [vmem:[#allocation2 + $0x20] sm:$0xf]  ;;  %vm4474_vm8 = vmmov %vm4462_vm0 }
 0x380   : > { %2372 = vst.msk [vmem:[#allocation2 + $0x38] sm:$0xf] %vm593_vm9, %v2356_v63  ;;  %v3227_v19 = vor.u32 %v3312_v15, %v3226_v16  ;;  %vm4475_vm9 = vmmov %vm4463_vm2 }
 0x381   : > { %2428 = vst.msk [vmem:[#allocation2 + $0x38] sm:$0xf] %vm643_vm10, %v2412_v17  ;;  %vm4476_vm0 = vmmov %vm4463_vm2 }
 0x382   : > { %2828 = vmatmul.bf16.gmra.mxu3 %v3227_v19  ;;  %vm4477_vm2 = vmmov %vm4464_vm1 }
 0x385   : > { %v2466_v21 = vpop.permute.xlu0 %2465 }
 0x386   : > { %v2410_v7 = vpop.permute.xlu1 %2409  ;;  %v2858_v46 = vpop.f32.mrf.mxu1 }
 0x387   : > { %2427 = vst.msk [vmem:[#allocation2 + $0x30] sm:$0xf] %vm643_vm10, %v2410_v7  ;;  %vm4478_vm10 = vmmov %vm4464_vm1  ;;  %vm4479_vm1 = vcmask 31744  }
 0x388   : > { %2483 = vst.msk [vmem:[#allocation2 + $0x30] sm:$0xf] %vm804_vm11, %v2466_v21  ;;  %vm4480_vm5 = vmmov %vm4479_vm1 }
 0x389   : > { %2539 = vst.msk [vmem:[#allocation2 + $0x30] sm:$0xf] %vm4473_vm14, %v2522_v11  ;;  %vm4481_vm15 = vmmov %vm4479_vm1 }
 0x38a   : > { %vm4482_vm12 = vmmov %vm4479_vm1 }
 0x38b   : > { %vm4483_vm7 = vmmov %vm4479_vm1 }
 0x38d   : > { %v2524_v62 = vpop.permute.xlu0 %2523 }
 0x38e   : > { %v2468_v26 = vpop.permute.xlu1 %2467  ;;  %v2860_v10 = vpop.f32.mrf.mxu1 }
 0x38f   : > { %2484 = vst.msk [vmem:[#allocation2 + $0x38] sm:$0xf] %vm804_vm11, %v2468_v26 }
 0x390   : > { %2540 = vst.msk [vmem:[#allocation2 + $0x38] sm:$0xf] %vm4474_vm8, %v2524_v62  ;;  %vm4484_vm8 = vmmov %vm4479_vm1 }
 0x391   : > { %2597 = vst.msk [vmem:[#allocation2 + $0x38] sm:$0xf] %vm4475_vm9, %v2581_v27 }
 0x395   : > { %v2635_v43 = vpop.permute.xlu0 %2634 }
 0x396   : > { %v2579_v28 = vpop.permute.xlu1 %2578  ;;  %v2863_v13 = vpop.f32.mrf.mxu1 }
 0x397   : > { %2596 = vst.msk [vmem:[#allocation2 + $0x30] sm:$0xf] %vm4476_vm0, %v2579_v28  ;;  %vm4485_vm0 = vmmov %vm4479_vm1 }
 0x398   : > { %2652 = vst.msk [vmem:[#allocation2 + $0x30] sm:$0xf] %vm4477_vm2, %v2635_v43 }
 0x39e   : > { %v2637_v29 = vpop.permute.xlu1 %2636  ;;  %v2865_v26 = vpop.f32.mrf.mxu1 }
 0x39f   : > { %2653 = vst.msk [vmem:[#allocation2 + $0x38] sm:$0xf] %vm4478_vm10, %v2637_v29  ;;  %v3234_v31 = vld [vmem:[#allocation2 + $0x30] sm:$0xf]  ;;  %vm4486_vm10 = vmmov %vm4485_vm0 }
 0x3a6   : > { %v3314_v32 = vld [vmem:[#allocation2 + $0x34] sm:$0xf0] }
 0x3a7   : > { %v3235_v33 = vor.u32 %v3314_v32, %v3234_v31 }
 0x3a9   : > { %2833 = vmatmul.bf16.gmra.mxu3 %v3235_v33 }
 0x3b9   : > { %v2819_v35 = vpop.f32.mrf.mxu3 }
 0x3ba   : > { %v2820_v36 = vadd.f32 %v4385_v34, %v2819_v35 }
 0x3bc   : > { %v2849_v37 = vadd.f32 %v2848_v22, %v2820_v36 }
 0x3be   : > { %vm2869_vm11 = vcmp.ge.f32.partialorder %v2849_v37, 0.0  ;;  %v2878_v38 = vmul.f32 %v4388_v23, %v2849_v37 }
 0x3c0   : > { %v2886_v40 = vsel %vm2869_vm11, %v2849_v37, %v2878_v38 }
 0x3c1   : > { %v2894_v41 = vadd.f32 %v2886_v40, %v3959_v24  ;;  %v2821_v42 = vpop.f32.mrf.mxu3 }
 0x3c2   : > { %v2822_v45 = vadd.f32 %v4385_v34, %v2821_v42 }
 0x3c3   : > { %2902 = vst.msk [vmem:[%s4395_s21] sm:$0xff] %vm4479_vm1, %v2894_v41 }
 0x3c4   : > { %v2851_v49 = vadd.f32 %v2850_v48, %v2822_v45 }
 0x3c6   : > { %vm2870_vm4 = vcmp.ge.f32.partialorder %v2851_v49, 0.0  ;;  %v2879_v51 = vmul.f32 %v4388_v23, %v2851_v49 }
 0x3c8   : > { %v2887_v14 = vsel %vm2870_vm4, %v2851_v49, %v2879_v51 }
 0x3c9   : > { %v2895_v54 = vadd.f32 %v2887_v14, %v3965_v30 }
 0x3cb   : > { %2903 = vst.msk [vmem:[%s4395_s21 + $0x8] sm:$0xff] %vm4480_vm5, %v2895_v54 }
 0x3e5   : > { %v2824_v55 = vpop.f32.mrf.mxu3 }
 0x3e6   : > { %v2825_v24 = vadd.f32 %v4385_v34, %v2824_v55 }
 0x3e8   : > { %v2854_v56 = vadd.f32 %v2853_v25, %v2825_v24 }
 0x3ea   : > { %vm2871_vm3 = vcmp.ge.f32.partialorder %v2854_v56, 0.0  ;;  %v2880_v20 = vmul.f32 %v4388_v23, %v2854_v56 }
 0x3ec   : > { %v2888_v57 = vsel %vm2871_vm3, %v2854_v56, %v2880_v20 }
 0x3ed   : > { %v2896_v58 = vadd.f32 %v2888_v57, %v3984_v47  ;;  %v2826_v0 = vpop.f32.mrf.mxu3 }
 0x3ee   : > { %v2827_v44 = vadd.f32 %v4385_v34, %v2826_v0 }
 0x3ef   : > { %2904 = vst.msk [vmem:[%s4395_s21 + $0x10] sm:$0xff] %vm4481_vm15, %v2896_v58 }
 0x3f0   : > { %v2856_v30 = vadd.f32 %v2855_v59, %v2827_v44 }
 0x3f2   : > { %vm2872_vm6 = vcmp.ge.f32.partialorder %v2856_v30, 0.0  ;;  %v2881_v60 = vmul.f32 %v4388_v23, %v2856_v30 }
 0x3f4   : > { %v2889_v52 = vsel %vm2872_vm6, %v2856_v30, %v2881_v60 }
 0x3f5   : > { %v2897_v61 = vadd.f32 %v2889_v52, %v3992_v53 }
 0x3f7   : > { %2905 = vst.msk [vmem:[%s4395_s21 + $0x18] sm:$0xff] %vm4482_vm12, %v2897_v61 }
 0x405   : > { %v2829_v1 = vpop.f32.mrf.mxu3 }
 0x406   : > { %v2830_v47 = vadd.f32 %v4385_v34, %v2829_v1 }
 0x408   : > { %v2859_v2 = vadd.f32 %v2858_v46, %v2830_v47 }
 0x40a   : > { %vm2873_vm13 = vcmp.ge.f32.partialorder %v2859_v2, 0.0  ;;  %v2882_v3 = vmul.f32 %v4388_v23, %v2859_v2 }
 0x40c   : > { %v2890_v4 = vsel %vm2873_vm13, %v2859_v2, %v2882_v3 }
 0x40d   : > { %v2898_v5 = vadd.f32 %v2890_v4, %v4011_v9  ;;  %v2831_v6 = vpop.f32.mrf.mxu3 }
 0x40e   : > { %v2832_v8 = vadd.f32 %v4385_v34, %v2831_v6 }
 0x40f   : > { %2906 = vst.msk [vmem:[%s4395_s21 + $0x20] sm:$0xff] %vm4483_vm7, %v2898_v5 }
 0x410   : > { %v2861_v53 = vadd.f32 %v2860_v10, %v2832_v8 }
 0x412   : > { %vm2874_vm14 = vcmp.ge.f32.partialorder %v2861_v53, 0.0  ;;  %v2883_v11 = vmul.f32 %v4388_v23, %v2861_v53 }
 0x414   : > { %v2891_v12 = vsel %vm2874_vm14, %v2861_v53, %v2883_v11 }
 0x415   : > { %v2899_v63 = vadd.f32 %v2891_v12, %v4020_v18 }
 0x417   : > { %2907 = vst.msk [vmem:[%s4395_s21 + $0x28] sm:$0xff] %vm4484_vm8, %v2899_v63 }
 0x42c   : > { %v2834_v15 = vpop.f32.mrf.mxu3 }
 0x42d   : > { %v2835_v9 = vadd.f32 %v4385_v34, %v2834_v15 }
 0x42f   : > { %v2864_v16 = vadd.f32 %v2863_v13, %v2835_v9 }
 0x431   : > { %vm2875_vm9 = vcmp.ge.f32.partialorder %v2864_v16, 0.0  ;;  %v2884_v17 = vmul.f32 %v4388_v23, %v2864_v16 }
 0x433   : > { %v2892_v19 = vsel %vm2875_vm9, %v2864_v16, %v2884_v17 }
 0x434   : > { %v2900_v21 = vadd.f32 %v2892_v19, %v4041_v39  ;;  %v2836_v7 = vpop.f32.mrf.mxu3 }
 0x435   : > { %v2837_v62 = vadd.f32 %v4385_v34, %v2836_v7 }
 0x436   : > { %2908 = vst.msk [vmem:[%s4395_s21 + $0x30] sm:$0xff] %vm4485_vm0, %v2900_v21 }
 0x437   : > { %v2866_v18 = vadd.f32 %v2865_v26, %v2837_v62 }
 0x439   : > { %vm2876_vm2 = vcmp.ge.f32.partialorder %v2866_v18, 0.0  ;;  %v2885_v27 = vmul.f32 %v4388_v23, %v2866_v18 }
 0x43b   : > { %v2893_v43 = vsel %vm2876_vm2, %v2866_v18, %v2885_v27 }
 0x43c   : > { %v2901_v28 = vadd.f32 %v2893_v43, %v4052_v50 }
 0x43e   : > { %2909 = vst.msk [vmem:[%s4395_s21 + $0x38] sm:$0xff] %vm4486_vm10, %v2901_v28 }
 0x43f PF: > { %s19_s27 = sadd.s32 1, %s3387_s27  }
 0x440   : > { %p16_p7 = scmp.ge.s32.totalorder %s19_s27, 4  }
 0x442   :  { %18 = sbr.rel (!%p16_p7) target bundleno = 1 (0x1), region = 93 }
 0x447   :  { %2931 = vsyncpa [#allocation7], 1 }
 0x448   :  { %2933 = vsyncpa [#allocation7 + $0x1], 1 }

</bundles_post_ra>
